<compile_context>
chip_gen: v5e
topology: v5e:2x2
jax: 0.10.0
libtpu: 0.0.40
codegen_flags: <defaults>
</compile_context>

<pallas_src>
import functools

import jax
import jax.numpy as jnp
from jax.experimental import pallas as pl
from jax.experimental.pallas import tpu as pltpu

H, W = 6, 7          # board size fixed by the module
SEG = 72             # 8 x 9 zero-ring-padded board, flattened per batch element
CH = 64              # trunk channels
MARGIN = 128         # lane guard each side of the data region (multiple of 128)
_OFFSETS = [(kh - 1) * 9 + (kw - 1) for kh in range(3) for kw in range(3)]


# ---------------------------------------------------------------------------
# Fused kernel: conv trunk + both heads for one block of `tb` batch elements
# ---------------------------------------------------------------------------
def _fused_kernel(x_ref, mask_ref,
                  w1_ref, b1_ref, w2_ref, b2_ref, w3_ref, b3_ref,
                  wpv_ref, bpv_ref,
                  t0_ref, t1_ref, bpl_ref,
                  tv_ref, bv1_ref, wv2_ref, bv2_ref, ind_ref,
                  out_ref,
                  abuf_ref, stage_ref, *, tb):
    f32 = jnp.float32
    bf16 = jnp.bfloat16
    ncols = tb * SEG
    interior = mask_ref[...]                                   # (1, ncols) f32

    # Zero the lane guards every step (megacore-safe; see header comment).
    zg = jnp.zeros((CH, MARGIN), abuf_ref.dtype)
    abuf_ref[:, 0:MARGIN] = zg
    abuf_ref[:, MARGIN + ncols:MARGIN + ncols + MARGIN] = zg

    def epilogue(acc, b_ref):
        # bias + ReLU in f32, re-zero the ring, store bf16 activations.
        out = jnp.maximum(acc + b_ref[...], 0.0) * interior
        abuf_ref[:, MARGIN:MARGIN + ncols] = out.astype(abuf_ref.dtype)

    # ---- conv1: taps pre-stacked by the wrapper -> single K=18 matmul
    epilogue(jnp.dot(w1_ref[...], x_ref[...], preferred_element_type=f32), b1_ref)

    # ---- conv2 / conv3: stack 9 shifted views into the staging buffer, then
    #      one K=576 matmul per layer (no per-tap accumulator RMW).
    def conv3x3(w_ref, b_ref):
        for k, d in enumerate(_OFFSETS):
            stage_ref[k * CH:(k + 1) * CH, :] = (
                abuf_ref[:, MARGIN + d:MARGIN + d + ncols])
        epilogue(jnp.dot(w_ref[...], stage_ref[...],
                         preferred_element_type=f32), b_ref)

    conv3x3(w2_ref, b2_ref)
    conv3x3(w3_ref, b3_ref)

    # ---- heads, batched over the whole block (no per-element loop).
    act = abuf_ref[:, MARGIN:MARGIN + ncols]                   # (64, ncols) bf16
    pv = jnp.dot(wpv_ref[...], act, preferred_element_type=f32)  # fused 1x1 conv
    pv = jnp.maximum(pv + bpv_ref[...], 0.0)                   # (3, ncols) f32

    # Per-position product with tiled (ring-zeroed) head weights, then a
    # segment-sum matmul against the 0/1 indicator -> per-element head rows.
    ind = ind_ref[...]                                         # (ncols, tb) bf16
    ep = (pv[0:1, :] * t0_ref[...] + pv[1:2, :] * t1_ref[...]).astype(bf16)
    ev = (pv[2:3, :] * tv_ref[...]).astype(bf16)

    logits_t = jnp.dot(ep, ind, preferred_element_type=f32) + bpl_ref[...]   # (7, tb)
    m = jnp.max(logits_t, axis=0, keepdims=True)
    s = logits_t - m
    logp_t = s - jnp.log(jnp.sum(jnp.exp(s), axis=0, keepdims=True))

    vh = jnp.maximum(jnp.dot(ev, ind, preferred_element_type=f32)
                     + bv1_ref[...], 0.0)                                    # (64, tb)
    val_t = jnp.tanh(jnp.dot(wv2_ref[...], vh.astype(bf16),
                             preferred_element_type=f32) + bv2_ref[...])     # (1, tb)

    out_ref[0:7, :] = logp_t                                   # policy rows
    out_ref[7:8, :] = val_t                                    # value row


# ---------------------------------------------------------------------------
# One-time parameter re-layout (PyTorch layouts -> kernel layouts)
# ---------------------------------------------------------------------------
def prepare_params(params, block_b):
    ncols = block_b * SEG
    bf16, f32 = jnp.bfloat16, jnp.float32

    def stack_conv(w):  # (O, C, 3, 3) -> (O, 9*C) bf16, tap-major / channel-minor
        o = w.shape[0]
        return jnp.transpose(w, (0, 2, 3, 1)).reshape(o, -1).astype(bf16)

    def col(b):         # (O,) -> (O, 1) f32 bias column
        return jnp.asarray(b).reshape(-1, 1).astype(f32)

    def expand(w):      # (O, 42) -> (O, 72) rows over padded board (zero ring)
        o = w.shape[0]
        w_pad = jnp.pad(w.reshape(o, H, W), ((0, 0), (1, 1), (1, 1)))
        return w_pad.reshape(o, SEG)

    tile = lambda w: jnp.tile(w, (1, block_b)).astype(bf16)          # (O, ncols)
    ind = (jnp.arange(ncols)[:, None] // SEG ==
           jnp.arange(block_b)[None, :]).astype(bf16)                # (ncols, tb)

    return {
        "w1": stack_conv(params["c1_w"]), "b1": col(params["c1_b"]),
        "w2": stack_conv(params["c2_w"]), "b2": col(params["c2_b"]),
        "w3": stack_conv(params["c3_w"]), "b3": col(params["c3_b"]),
        "wpv": jnp.concatenate([params["pc_w"].reshape(2, CH),
                                params["vc_w"].reshape(1, CH)],
                               axis=0).astype(bf16),
        "bpv": col(jnp.concatenate([params["pc_b"], params["vc_b"]])),
        "t0": tile(expand(params["pl_w"][:, :H * W])),               # (7, ncols)
        "t1": tile(expand(params["pl_w"][:, H * W:])),               # (7, ncols)
        "bpl": col(params["pl_b"]),
        "tv": tile(expand(params["v1_w"])),                          # (64, ncols)
        "bv1": col(params["v1_b"]),
        "wv2": params["v2_w"].astype(bf16),                          # (1, 64)
        "bv2": col(params["v2_b"]),
        "ind": ind,
    }


def pick_block_b(B):
    """Lane-aligned blocks (SEG*16 = 1152 = 9*128) with >= 2 grid steps when the
    batch allows it (v7x has 2 TensorCores on the 'parallel' axis)."""
    for cand in (64, 32, 16):
        if B >= 2 * cand:
            return cand
    if B > 8:
        return 8
    return max(int(B), 1)


# ---------------------------------------------------------------------------
# Forward pass
# ---------------------------------------------------------------------------
@functools.partial(jax.jit, static_argnames=("block_b",))
def alphazero_forward(x_nchw, prep, block_b):
    B = x_nchw.shape[0]
    g = pl.cdiv(B, block_b)
    bp = g * block_b
    ncols = block_b * SEG

    # ---- input: pre-stack the 9 conv-1 taps in the wrapper (tiny tensor), so
    #      layer 1 in the kernel is a single aligned K=18 matmul.
    xf = x_nchw.astype(jnp.float32)
    if bp != B:
        xf = jnp.pad(xf, ((0, bp - B), (0, 0), (0, 0), (0, 0)))
    xq = jnp.pad(xf, ((0, 0), (0, 0), (2, 2), (2, 2)))               # (bp, 2, 10, 11)
    taps = [xq[:, :, kh:kh + 8, kw:kw + 9]
            for kh in range(3) for kw in range(3)]
    xs = jnp.stack(taps, axis=1).reshape(bp, 18, SEG)                # row = tap*2+chan
    x_prep = (jnp.transpose(xs.reshape(g, block_b, 18, SEG), (0, 2, 1, 3))
              .reshape(g, 18, ncols).astype(jnp.bfloat16))

    # ---- interior mask: 1 on real board cells, 0 on the zero ring
    seg_mask = jnp.zeros((8, 9), jnp.float32).at[1:7, 1:8].set(1.0)
    mask = jnp.tile(seg_mask.reshape(1, SEG), (1, block_b))          # (1, ncols)

    const = lambda i: (0, 0)

    out = pl.pallas_call(
        functools.partial(_fused_kernel, tb=block_b),
        out_shape=jax.ShapeDtypeStruct((g, 8, block_b), jnp.float32),
        grid=(g,),
        in_specs=[
            pl.BlockSpec((None, 18, ncols), lambda i: (i, 0, 0)),    # stacked taps
            pl.BlockSpec((1, ncols), const),                         # interior mask
            pl.BlockSpec((CH, 18), const),      pl.BlockSpec((CH, 1), const),   # conv1
            pl.BlockSpec((CH, 9 * CH), const),  pl.BlockSpec((CH, 1), const),   # conv2
            pl.BlockSpec((CH, 9 * CH), const),  pl.BlockSpec((CH, 1), const),   # conv3
            pl.BlockSpec((3, CH), const),       pl.BlockSpec((3, 1), const),    # 1x1 conv
            pl.BlockSpec((7, ncols), const),    pl.BlockSpec((7, ncols), const),# policy W
            pl.BlockSpec((7, 1), const),                                        # policy b
            pl.BlockSpec((CH, ncols), const),   pl.BlockSpec((CH, 1), const),   # value W1
            pl.BlockSpec((1, CH), const),       pl.BlockSpec((1, 1), const),    # value W2
            pl.BlockSpec((ncols, block_b), const),                              # indicator
        ],
        out_specs=pl.BlockSpec((None, 8, block_b), lambda i: (i, 0, 0)),
        scratch_shapes=[
            pltpu.VMEM((CH, ncols + 2 * MARGIN), jnp.bfloat16),      # activations
            pltpu.VMEM((9 * CH, ncols), jnp.bfloat16),               # stacked-K staging
        ],
        compiler_params=pltpu.CompilerParams(
            dimension_semantics=("parallel",),
            vmem_limit_bytes=32 * 1024 * 1024),
    )(x_prep, mask,
      prep["w1"], prep["b1"], prep["w2"], prep["b2"], prep["w3"], prep["b3"],
      prep["wpv"], prep["bpv"],
      prep["t0"], prep["t1"], prep["bpl"],
      prep["tv"], prep["bv1"], prep["wv2"], prep["bv2"], prep["ind"])

    out = jnp.transpose(out, (0, 2, 1)).reshape(bp, 8)
    return out[:B, :7], out[:B, 7]


# ---------------------------------------------------------------------------
# Deterministic synthetic parameters (PyTorch-layout weights)
# ---------------------------------------------------------------------------
def init_params(key):
    ks = jax.random.split(key, 16)

    def nrm(k, shape, scale=0.1):
        return scale * jax.random.normal(k, shape, dtype=jnp.float32)

    return {
        "c1_w": nrm(ks[0], (64, 2, 3, 3)),  "c1_b": nrm(ks[1], (64,)),
        "c2_w": nrm(ks[2], (64, 64, 3, 3)), "c2_b": nrm(ks[3], (64,)),
        "c3_w": nrm(ks[4], (64, 64, 3, 3)), "c3_b": nrm(ks[5], (64,)),
        "pc_w": nrm(ks[6], (2, 64, 1, 1)),  "pc_b": nrm(ks[7], (2,)),
        "pl_w": nrm(ks[8], (7, 2 * H * W)), "pl_b": nrm(ks[9], (7,)),
        "vc_w": nrm(ks[10], (1, 64, 1, 1)), "vc_b": nrm(ks[11], (1,)),
        "v1_w": nrm(ks[12], (64, H * W)),   "v1_b": nrm(ks[13], (64,)),
        "v2_w": nrm(ks[14], (1, 64)),       "v2_b": nrm(ks[15], (1,)),
    }


# ---------------------------------------------------------------------------
# Pure-JAX reference (for correctness check only)
# ---------------------------------------------------------------------------
def _reference_forward(x, params):
    xf = x.astype(jnp.float32)

    def conv3(a, w, b):
        ap = jnp.pad(a, ((0, 0), (0, 0), (1, 1), (1, 1)))
        out = jnp.zeros((a.shape[0], w.shape[0], H, W), jnp.float32)
        for kh in range(3):
            for kw in range(3):
                out = out + jnp.einsum("bchw,oc->bohw",
                                       ap[:, :, kh:kh + H, kw:kw + W],
                                       w[:, :, kh, kw])
        return jax.nn.relu(out + b[None, :, None, None])

    a = conv3(xf, params["c1_w"], params["c1_b"])
    a = conv3(a, params["c2_w"], params["c2_b"])
    a = conv3(a, params["c3_w"], params["c3_b"])

    p = jax.nn.relu(jnp.einsum("bchw,oc->bohw", a, params["pc_w"][:, :, 0, 0])
                    + params["pc_b"][None, :, None, None])
    logits = p.reshape(p.shape[0], -1) @ params["pl_w"].T + params["pl_b"]
    policy = jax.nn.log_softmax(logits, axis=1)

    v = jax.nn.relu(jnp.einsum("bchw,oc->bohw", a, params["vc_w"][:, :, 0, 0])
                    + params["vc_b"][None, :, None, None])
    v = jax.nn.relu(v.reshape(v.shape[0], -1) @ params["v1_w"].T + params["v1_b"])
    v = jnp.tanh(v @ params["v2_w"].T + params["v2_b"])
    return policy, v[:, 0]


if __name__ == "__main__":
    key = jax.random.PRNGKey(0)
    k_params, k_x1, k_x2 = jax.random.split(key, 3)
    params = init_params(k_params)

    # -- small batch (tiny-batch fallback path): batch=2, 2 planes, 6x7 board
    x = jax.random.normal(k_x1, (2, 2, H, W), dtype=jnp.float32)
    bb = pick_block_b(x.shape[0])
    prep = prepare_params(params, bb)
    policy, value = alphazero_forward(x, prep, block_b=bb)
    jax.block_until_ready((policy, value))

    assert policy.shape == (2, 7) and value.shape == (2,)
    assert bool(jnp.all(jnp.abs(jnp.sum(jnp.exp(policy), axis=1) - 1.0) < 1e-4))
    assert bool(jnp.all(jnp.abs(value) <= 1.0))
    pol_ref, val_ref = _reference_forward(x, params)
    assert bool(jnp.all(jnp.abs(policy - pol_ref) < 5e-2))
    assert bool(jnp.all(jnp.abs(value - val_ref) < 5e-2))

    # -- larger batch: exercises the lane-aligned block_b=16, g=2 fast path
    x2 = jax.random.normal(k_x2, (32, 2, H, W), dtype=jnp.float32)
    bb2 = pick_block_b(x2.shape[0])
    prep2 = prepare_params(params, bb2)
    policy2, value2 = alphazero_forward(x2, prep2, block_b=bb2)
    jax.block_until_ready((policy2, value2))

    assert policy2.shape == (32, 7) and value2.shape == (32,)
    pol_ref2, val_ref2 = _reference_forward(x2, params)
    assert bool(jnp.all(jnp.abs(policy2 - pol_ref2) < 5e-2))
    assert bool(jnp.all(jnp.abs(value2 - val_ref2) < 5e-2))

    print("KERNEL_OK")
</pallas_src>

<mosaic_0001>
module attributes {stable_mosaic.version = 11 : i64} {
  func.func @_fused_kernel(%arg0: i32, %arg1: memref<1x18x144xbf16, #tpu.memory_space<vmem>>, %arg2: memref<1x144xf32, #tpu.memory_space<vmem>>, %arg3: memref<64x18xbf16, #tpu.memory_space<vmem>>, %arg4: memref<64x1xf32, #tpu.memory_space<vmem>>, %arg5: memref<64x576xbf16, #tpu.memory_space<vmem>>, %arg6: memref<64x1xf32, #tpu.memory_space<vmem>>, %arg7: memref<64x576xbf16, #tpu.memory_space<vmem>>, %arg8: memref<64x1xf32, #tpu.memory_space<vmem>>, %arg9: memref<3x64xbf16, #tpu.memory_space<vmem>>, %arg10: memref<3x1xf32, #tpu.memory_space<vmem>>, %arg11: memref<7x144xbf16, #tpu.memory_space<vmem>>, %arg12: memref<7x144xbf16, #tpu.memory_space<vmem>>, %arg13: memref<7x1xf32, #tpu.memory_space<vmem>>, %arg14: memref<64x144xbf16, #tpu.memory_space<vmem>>, %arg15: memref<64x1xf32, #tpu.memory_space<vmem>>, %arg16: memref<1x64xbf16, #tpu.memory_space<vmem>>, %arg17: memref<1x1xf32, #tpu.memory_space<vmem>>, %arg18: memref<144x2xbf16, #tpu.memory_space<vmem>>, %arg19: memref<1x8x2xf32, #tpu.memory_space<vmem>>, %arg20: memref<64x400xbf16, #tpu.memory_space<vmem>>, %arg21: memref<576x144xbf16, #tpu.memory_space<vmem>>) attributes {dimension_semantics = [#tpu.dimension_semantics<parallel>], iteration_bounds = array<i64: 1>, scalar_prefetch = 0 : i64, scratch_operands = 2 : i64, tpu.core_type = #tpu.core_type<tc>, window_params = [{transform_indices = @transform_0, window_bounds = array<i64: 1, 18, 144>}, {pipeline_mode = #tpu.pipeline_mode<synchronous>, transform_indices = @transform_1, window_bounds = array<i64: 1, 144>}, {pipeline_mode = #tpu.pipeline_mode<synchronous>, transform_indices = @transform_2, window_bounds = array<i64: 64, 18>}, {pipeline_mode = #tpu.pipeline_mode<synchronous>, transform_indices = @transform_3, window_bounds = array<i64: 64, 1>}, {pipeline_mode = #tpu.pipeline_mode<synchronous>, transform_indices = @transform_4, window_bounds = array<i64: 64, 576>}, {pipeline_mode = #tpu.pipeline_mode<synchronous>, transform_indices = @transform_5, window_bounds = array<i64: 64, 1>}, {pipeline_mode = #tpu.pipeline_mode<synchronous>, transform_indices = @transform_6, window_bounds = array<i64: 64, 576>}, {pipeline_mode = #tpu.pipeline_mode<synchronous>, transform_indices = @transform_7, window_bounds = array<i64: 64, 1>}, {pipeline_mode = #tpu.pipeline_mode<synchronous>, transform_indices = @transform_8, window_bounds = array<i64: 3, 64>}, {pipeline_mode = #tpu.pipeline_mode<synchronous>, transform_indices = @transform_9, window_bounds = array<i64: 3, 1>}, {pipeline_mode = #tpu.pipeline_mode<synchronous>, transform_indices = @transform_10, window_bounds = array<i64: 7, 144>}, {pipeline_mode = #tpu.pipeline_mode<synchronous>, transform_indices = @transform_11, window_bounds = array<i64: 7, 144>}, {pipeline_mode = #tpu.pipeline_mode<synchronous>, transform_indices = @transform_12, window_bounds = array<i64: 7, 1>}, {pipeline_mode = #tpu.pipeline_mode<synchronous>, transform_indices = @transform_13, window_bounds = array<i64: 64, 144>}, {pipeline_mode = #tpu.pipeline_mode<synchronous>, transform_indices = @transform_14, window_bounds = array<i64: 64, 1>}, {pipeline_mode = #tpu.pipeline_mode<synchronous>, transform_indices = @transform_15, window_bounds = array<i64: 1, 64>}, {pipeline_mode = #tpu.pipeline_mode<synchronous>, transform_indices = @transform_16, window_bounds = array<i64: 1, 1>}, {pipeline_mode = #tpu.pipeline_mode<synchronous>, transform_indices = @transform_17, window_bounds = array<i64: 144, 2>}, {transform_indices = @transform_18, window_bounds = array<i64: 1, 8, 2>}]} {
    %c0 = arith.constant 0 : index
    %c0_0 = arith.constant 0 : index
    %0 = vector.load %arg2[%c0, %c0_0] : memref<1x144xf32, #tpu.memory_space<vmem>>, vector<1x144xf32>
    %cst = arith.constant 0.000000e+00 : bf16
    %1 = vector.broadcast %cst : bf16 to vector<64x128xbf16>
    %c0_1 = arith.constant 0 : index
    %c0_2 = arith.constant 0 : index
    %2 = vector.load %arg20[%c0_1, %c0_2] : memref<64x400xbf16, #tpu.memory_space<vmem>>, vector<64x128xbf16>
    tpu.vector_store %arg20[%c0_1, %c0_2], %1 {strides = array<i32>} : memref<64x400xbf16, #tpu.memory_space<vmem>>, vector<64x128xbf16>,
    %c0_3 = arith.constant 0 : index
    %c272 = arith.constant 272 : index
    %3 = vector.load %arg20[%c0_3, %c272] : memref<64x400xbf16, #tpu.memory_space<vmem>>, vector<64x128xbf16>
    tpu.vector_store %arg20[%c0_3, %c272], %1 {strides = array<i32>} : memref<64x400xbf16, #tpu.memory_space<vmem>>, vector<64x128xbf16>,
    %c0_4 = arith.constant 0 : index
    %c0_5 = arith.constant 0 : index
    %4 = vector.load %arg3[%c0_4, %c0_5] : memref<64x18xbf16, #tpu.memory_space<vmem>>, vector<64x18xbf16>
    %c0_6 = arith.constant 0 : index
    %c0_7 = arith.constant 0 : index
    %c0_8 = arith.constant 0 : index
    %5 = vector.load %arg1[%c0_6, %c0_7, %c0_8] : memref<1x18x144xbf16, #tpu.memory_space<vmem>>, vector<1x18x144xbf16>
    %6 = vector.shape_cast %5 : vector<1x18x144xbf16> to vector<18x144xbf16>
    %cst_9 = arith.constant dense<0.000000e+00> : vector<64x144xf32>
    %7 = tpu.matmul %4, %6, %cst_9 {dimension_numbers = #tpu.dot_dimension_numbers<[1], [0], [0], [1], [0, 0, 1, 1], [], []>} : vector<64x18xbf16>, vector<18x144xbf16>, vector<64x144xf32> -> vector<64x144xf32>
    %c0_10 = arith.constant 0 : index
    %c0_11 = arith.constant 0 : index
    %8 = vector.load %arg4[%c0_10, %c0_11] : memref<64x1xf32, #tpu.memory_space<vmem>>, vector<64x1xf32>
    %9 = vector.broadcast %8 : vector<64x1xf32> to vector<64x144xf32>
    %10 = arith.addf %7, %9 : vector<64x144xf32>
    %cst_12 = arith.constant 0.000000e+00 : f32
    %11 = vector.broadcast %cst_12 : f32 to vector<64x144xf32>
    %12 = arith.maximumf %10, %11 : vector<64x144xf32>
    %13 = vector.broadcast %0 : vector<1x144xf32> to vector<64x144xf32>
    %14 = arith.mulf %12, %13 : vector<64x144xf32>
    %15 = arith.truncf %14 : vector<64x144xf32> to vector<64x144xbf16>
    %c0_13 = arith.constant 0 : index
    %c128 = arith.constant 128 : index
    %16 = vector.load %arg20[%c0_13, %c128] : memref<64x400xbf16, #tpu.memory_space<vmem>>, vector<64x144xbf16>
    tpu.vector_store %arg20[%c0_13, %c128], %15 {strides = array<i32>} : memref<64x400xbf16, #tpu.memory_space<vmem>>, vector<64x144xbf16>,
    %c0_14 = arith.constant 0 : index
    %c118 = arith.constant 118 : index
    %17 = vector.load %arg20[%c0_14, %c118] : memref<64x400xbf16, #tpu.memory_space<vmem>>, vector<64x144xbf16>
    %c0_15 = arith.constant 0 : index
    %c0_16 = arith.constant 0 : index
    %18 = vector.load %arg21[%c0_15, %c0_16] : memref<576x144xbf16, #tpu.memory_space<vmem>>, vector<64x144xbf16>
    tpu.vector_store %arg21[%c0_15, %c0_16], %17 {strides = array<i32>} : memref<576x144xbf16, #tpu.memory_space<vmem>>, vector<64x144xbf16>,
    %c0_17 = arith.constant 0 : index
    %c119 = arith.constant 119 : index
    %19 = vector.load %arg20[%c0_17, %c119] : memref<64x400xbf16, #tpu.memory_space<vmem>>, vector<64x144xbf16>
    %c64 = arith.constant 64 : index
    %c0_18 = arith.constant 0 : index
    %20 = vector.load %arg21[%c64, %c0_18] : memref<576x144xbf16, #tpu.memory_space<vmem>>, vector<64x144xbf16>
    tpu.vector_store %arg21[%c64, %c0_18], %19 {strides = array<i32>} : memref<576x144xbf16, #tpu.memory_space<vmem>>, vector<64x144xbf16>,
    %c0_19 = arith.constant 0 : index
    %c120 = arith.constant 120 : index
    %21 = vector.load %arg20[%c0_19, %c120] : memref<64x400xbf16, #tpu.memory_space<vmem>>, vector<64x144xbf16>
    %c128_20 = arith.constant 128 : index
    %c0_21 = arith.constant 0 : index
    %22 = vector.load %arg21[%c128_20, %c0_21] : memref<576x144xbf16, #tpu.memory_space<vmem>>, vector<64x144xbf16>
    tpu.vector_store %arg21[%c128_20, %c0_21], %21 {strides = array<i32>} : memref<576x144xbf16, #tpu.memory_space<vmem>>, vector<64x144xbf16>,
    %c0_22 = arith.constant 0 : index
    %c127 = arith.constant 127 : index
    %23 = vector.load %arg20[%c0_22, %c127] : memref<64x400xbf16, #tpu.memory_space<vmem>>, vector<64x144xbf16>
    %c192 = arith.constant 192 : index
    %c0_23 = arith.constant 0 : index
    %24 = vector.load %arg21[%c192, %c0_23] : memref<576x144xbf16, #tpu.memory_space<vmem>>, vector<64x144xbf16>
    tpu.vector_store %arg21[%c192, %c0_23], %23 {strides = array<i32>} : memref<576x144xbf16, #tpu.memory_space<vmem>>, vector<64x144xbf16>,
    %c0_24 = arith.constant 0 : index
    %c128_25 = arith.constant 128 : index
    %25 = vector.load %arg20[%c0_24, %c128_25] : memref<64x400xbf16, #tpu.memory_space<vmem>>, vector<64x144xbf16>
    %c256 = arith.constant 256 : index
    %c0_26 = arith.constant 0 : index
    %26 = vector.load %arg21[%c256, %c0_26] : memref<576x144xbf16, #tpu.memory_space<vmem>>, vector<64x144xbf16>
    tpu.vector_store %arg21[%c256, %c0_26], %25 {strides = array<i32>} : memref<576x144xbf16, #tpu.memory_space<vmem>>, vector<64x144xbf16>,
    %c0_27 = arith.constant 0 : index
    %c129 = arith.constant 129 : index
    %27 = vector.load %arg20[%c0_27, %c129] : memref<64x400xbf16, #tpu.memory_space<vmem>>, vector<64x144xbf16>
    %c320 = arith.constant 320 : index
    %c0_28 = arith.constant 0 : index
    %28 = vector.load %arg21[%c320, %c0_28] : memref<576x144xbf16, #tpu.memory_space<vmem>>, vector<64x144xbf16>
    tpu.vector_store %arg21[%c320, %c0_28], %27 {strides = array<i32>} : memref<576x144xbf16, #tpu.memory_space<vmem>>, vector<64x144xbf16>,
    %c0_29 = arith.constant 0 : index
    %c136 = arith.constant 136 : index
    %29 = vector.load %arg20[%c0_29, %c136] : memref<64x400xbf16, #tpu.memory_space<vmem>>, vector<64x144xbf16>
    %c384 = arith.constant 384 : index
    %c0_30 = arith.constant 0 : index
    %30 = vector.load %arg21[%c384, %c0_30] : memref<576x144xbf16, #tpu.memory_space<vmem>>, vector<64x144xbf16>
    tpu.vector_store %arg21[%c384, %c0_30], %29 {strides = array<i32>} : memref<576x144xbf16, #tpu.memory_space<vmem>>, vector<64x144xbf16>,
    %c0_31 = arith.constant 0 : index
    %c137 = arith.constant 137 : index
    %31 = vector.load %arg20[%c0_31, %c137] : memref<64x400xbf16, #tpu.memory_space<vmem>>, vector<64x144xbf16>
    %c448 = arith.constant 448 : index
    %c0_32 = arith.constant 0 : index
    %32 = vector.load %arg21[%c448, %c0_32] : memref<576x144xbf16, #tpu.memory_space<vmem>>, vector<64x144xbf16>
    tpu.vector_store %arg21[%c448, %c0_32], %31 {strides = array<i32>} : memref<576x144xbf16, #tpu.memory_space<vmem>>, vector<64x144xbf16>,
    %c0_33 = arith.constant 0 : index
    %c138 = arith.constant 138 : index
    %33 = vector.load %arg20[%c0_33, %c138] : memref<64x400xbf16, #tpu.memory_space<vmem>>, vector<64x144xbf16>
    %c512 = arith.constant 512 : index
    %c0_34 = arith.constant 0 : index
    %34 = vector.load %arg21[%c512, %c0_34] : memref<576x144xbf16, #tpu.memory_space<vmem>>, vector<64x144xbf16>
    tpu.vector_store %arg21[%c512, %c0_34], %33 {strides = array<i32>} : memref<576x144xbf16, #tpu.memory_space<vmem>>, vector<64x144xbf16>,
    %c0_35 = arith.constant 0 : index
    %c0_36 = arith.constant 0 : index
    %35 = vector.load %arg5[%c0_35, %c0_36] : memref<64x576xbf16, #tpu.memory_space<vmem>>, vector<64x576xbf16>
    %c0_37 = arith.constant 0 : index
    %c0_38 = arith.constant 0 : index
    %36 = vector.load %arg21[%c0_37, %c0_38] : memref<576x144xbf16, #tpu.memory_space<vmem>>, vector<576x144xbf16>
    %cst_39 = arith.constant dense<0.000000e+00> : vector<64x144xf32>
    %37 = tpu.matmul %35, %36, %cst_39 {dimension_numbers = #tpu.dot_dimension_numbers<[1], [0], [0], [1], [0, 0, 1, 1], [], []>} : vector<64x576xbf16>, vector<576x144xbf16>, vector<64x144xf32> -> vector<64x144xf32>
    %c0_40 = arith.constant 0 : index
    %c0_41 = arith.constant 0 : index
    %38 = vector.load %arg6[%c0_40, %c0_41] : memref<64x1xf32, #tpu.memory_space<vmem>>, vector<64x1xf32>
    %39 = vector.broadcast %38 : vector<64x1xf32> to vector<64x144xf32>
    %40 = arith.addf %37, %39 : vector<64x144xf32>
    %cst_42 = arith.constant 0.000000e+00 : f32
    %41 = vector.broadcast %cst_42 : f32 to vector<64x144xf32>
    %42 = arith.maximumf %40, %41 : vector<64x144xf32>
    %43 = vector.broadcast %0 : vector<1x144xf32> to vector<64x144xf32>
    %44 = arith.mulf %42, %43 : vector<64x144xf32>
    %45 = arith.truncf %44 : vector<64x144xf32> to vector<64x144xbf16>
    %c0_43 = arith.constant 0 : index
    %c128_44 = arith.constant 128 : index
    %46 = vector.load %arg20[%c0_43, %c128_44] : memref<64x400xbf16, #tpu.memory_space<vmem>>, vector<64x144xbf16>
    tpu.vector_store %arg20[%c0_43, %c128_44], %45 {strides = array<i32>} : memref<64x400xbf16, #tpu.memory_space<vmem>>, vector<64x144xbf16>,
    %c0_45 = arith.constant 0 : index
    %c118_46 = arith.constant 118 : index
    %47 = vector.load %arg20[%c0_45, %c118_46] : memref<64x400xbf16, #tpu.memory_space<vmem>>, vector<64x144xbf16>
    %c0_47 = arith.constant 0 : index
    %c0_48 = arith.constant 0 : index
    %48 = vector.load %arg21[%c0_47, %c0_48] : memref<576x144xbf16, #tpu.memory_space<vmem>>, vector<64x144xbf16>
    tpu.vector_store %arg21[%c0_47, %c0_48], %47 {strides = array<i32>} : memref<576x144xbf16, #tpu.memory_space<vmem>>, vector<64x144xbf16>,
    %c0_49 = arith.constant 0 : index
    %c119_50 = arith.constant 119 : index
    %49 = vector.load %arg20[%c0_49, %c119_50] : memref<64x400xbf16, #tpu.memory_space<vmem>>, vector<64x144xbf16>
    %c64_51 = arith.constant 64 : index
    %c0_52 = arith.constant 0 : index
    %50 = vector.load %arg21[%c64_51, %c0_52] : memref<576x144xbf16, #tpu.memory_space<vmem>>, vector<64x144xbf16>
    tpu.vector_store %arg21[%c64_51, %c0_52], %49 {strides = array<i32>} : memref<576x144xbf16, #tpu.memory_space<vmem>>, vector<64x144xbf16>,
    %c0_53 = arith.constant 0 : index
    %c120_54 = arith.constant 120 : index
    %51 = vector.load %arg20[%c0_53, %c120_54] : memref<64x400xbf16, #tpu.memory_space<vmem>>, vector<64x144xbf16>
    %c128_55 = arith.constant 128 : index
    %c0_56 = arith.constant 0 : index
    %52 = vector.load %arg21[%c128_55, %c0_56] : memref<576x144xbf16, #tpu.memory_space<vmem>>, vector<64x144xbf16>
    tpu.vector_store %arg21[%c128_55, %c0_56], %51 {strides = array<i32>} : memref<576x144xbf16, #tpu.memory_space<vmem>>, vector<64x144xbf16>,
    %c0_57 = arith.constant 0 : index
    %c127_58 = arith.constant 127 : index
    %53 = vector.load %arg20[%c0_57, %c127_58] : memref<64x400xbf16, #tpu.memory_space<vmem>>, vector<64x144xbf16>
    %c192_59 = arith.constant 192 : index
    %c0_60 = arith.constant 0 : index
    %54 = vector.load %arg21[%c192_59, %c0_60] : memref<576x144xbf16, #tpu.memory_space<vmem>>, vector<64x144xbf16>
    tpu.vector_store %arg21[%c192_59, %c0_60], %53 {strides = array<i32>} : memref<576x144xbf16, #tpu.memory_space<vmem>>, vector<64x144xbf16>,
    %c0_61 = arith.constant 0 : index
    %c128_62 = arith.constant 128 : index
    %55 = vector.load %arg20[%c0_61, %c128_62] : memref<64x400xbf16, #tpu.memory_space<vmem>>, vector<64x144xbf16>
    %c256_63 = arith.constant 256 : index
    %c0_64 = arith.constant 0 : index
    %56 = vector.load %arg21[%c256_63, %c0_64] : memref<576x144xbf16, #tpu.memory_space<vmem>>, vector<64x144xbf16>
    tpu.vector_store %arg21[%c256_63, %c0_64], %55 {strides = array<i32>} : memref<576x144xbf16, #tpu.memory_space<vmem>>, vector<64x144xbf16>,
    %c0_65 = arith.constant 0 : index
    %c129_66 = arith.constant 129 : index
    %57 = vector.load %arg20[%c0_65, %c129_66] : memref<64x400xbf16, #tpu.memory_space<vmem>>, vector<64x144xbf16>
    %c320_67 = arith.constant 320 : index
    %c0_68 = arith.constant 0 : index
    %58 = vector.load %arg21[%c320_67, %c0_68] : memref<576x144xbf16, #tpu.memory_space<vmem>>, vector<64x144xbf16>
    tpu.vector_store %arg21[%c320_67, %c0_68], %57 {strides = array<i32>} : memref<576x144xbf16, #tpu.memory_space<vmem>>, vector<64x144xbf16>,
    %c0_69 = arith.constant 0 : index
    %c136_70 = arith.constant 136 : index
    %59 = vector.load %arg20[%c0_69, %c136_70] : memref<64x400xbf16, #tpu.memory_space<vmem>>, vector<64x144xbf16>
    %c384_71 = arith.constant 384 : index
    %c0_72 = arith.constant 0 : index
    %60 = vector.load %arg21[%c384_71, %c0_72] : memref<576x144xbf16, #tpu.memory_space<vmem>>, vector<64x144xbf16>
    tpu.vector_store %arg21[%c384_71, %c0_72], %59 {strides = array<i32>} : memref<576x144xbf16, #tpu.memory_space<vmem>>, vector<64x144xbf16>,
    %c0_73 = arith.constant 0 : index
    %c137_74 = arith.constant 137 : index
    %61 = vector.load %arg20[%c0_73, %c137_74] : memref<64x400xbf16, #tpu.memory_space<vmem>>, vector<64x144xbf16>
    %c448_75 = arith.constant 448 : index
    %c0_76 = arith.constant 0 : index
    %62 = vector.load %arg21[%c448_75, %c0_76] : memref<576x144xbf16, #tpu.memory_space<vmem>>, vector<64x144xbf16>
    tpu.vector_store %arg21[%c448_75, %c0_76], %61 {strides = array<i32>} : memref<576x144xbf16, #tpu.memory_space<vmem>>, vector<64x144xbf16>,
    %c0_77 = arith.constant 0 : index
    %c138_78 = arith.constant 138 : index
    %63 = vector.load %arg20[%c0_77, %c138_78] : memref<64x400xbf16, #tpu.memory_space<vmem>>, vector<64x144xbf16>
    %c512_79 = arith.constant 512 : index
    %c0_80 = arith.constant 0 : index
    %64 = vector.load %arg21[%c512_79, %c0_80] : memref<576x144xbf16, #tpu.memory_space<vmem>>, vector<64x144xbf16>
    tpu.vector_store %arg21[%c512_79, %c0_80], %63 {strides = array<i32>} : memref<576x144xbf16, #tpu.memory_space<vmem>>, vector<64x144xbf16>,
    %c0_81 = arith.constant 0 : index
    %c0_82 = arith.constant 0 : index
    %65 = vector.load %arg7[%c0_81, %c0_82] : memref<64x576xbf16, #tpu.memory_space<vmem>>, vector<64x576xbf16>
    %c0_83 = arith.constant 0 : index
    %c0_84 = arith.constant 0 : index
    %66 = vector.load %arg21[%c0_83, %c0_84] : memref<576x144xbf16, #tpu.memory_space<vmem>>, vector<576x144xbf16>
    %cst_85 = arith.constant dense<0.000000e+00> : vector<64x144xf32>
    %67 = tpu.matmul %65, %66, %cst_85 {dimension_numbers = #tpu.dot_dimension_numbers<[1], [0], [0], [1], [0, 0, 1, 1], [], []>} : vector<64x576xbf16>, vector<576x144xbf16>, vector<64x144xf32> -> vector<64x144xf32>
    %c0_86 = arith.constant 0 : index
    %c0_87 = arith.constant 0 : index
    %68 = vector.load %arg8[%c0_86, %c0_87] : memref<64x1xf32, #tpu.memory_space<vmem>>, vector<64x1xf32>
    %69 = vector.broadcast %68 : vector<64x1xf32> to vector<64x144xf32>
    %70 = arith.addf %67, %69 : vector<64x144xf32>
    %cst_88 = arith.constant 0.000000e+00 : f32
    %71 = vector.broadcast %cst_88 : f32 to vector<64x144xf32>
    %72 = arith.maximumf %70, %71 : vector<64x144xf32>
    %73 = vector.broadcast %0 : vector<1x144xf32> to vector<64x144xf32>
    %74 = arith.mulf %72, %73 : vector<64x144xf32>
    %75 = arith.truncf %74 : vector<64x144xf32> to vector<64x144xbf16>
    %c0_89 = arith.constant 0 : index
    %c128_90 = arith.constant 128 : index
    %76 = vector.load %arg20[%c0_89, %c128_90] : memref<64x400xbf16, #tpu.memory_space<vmem>>, vector<64x144xbf16>
    tpu.vector_store %arg20[%c0_89, %c128_90], %75 {strides = array<i32>} : memref<64x400xbf16, #tpu.memory_space<vmem>>, vector<64x144xbf16>,
    %c0_91 = arith.constant 0 : index
    %c128_92 = arith.constant 128 : index
    %77 = vector.load %arg20[%c0_91, %c128_92] : memref<64x400xbf16, #tpu.memory_space<vmem>>, vector<64x144xbf16>
    %c0_93 = arith.constant 0 : index
    %c0_94 = arith.constant 0 : index
    %78 = vector.load %arg9[%c0_93, %c0_94] : memref<3x64xbf16, #tpu.memory_space<vmem>>, vector<3x64xbf16>
    %cst_95 = arith.constant dense<0.000000e+00> : vector<3x144xf32>
    %79 = tpu.matmul %78, %77, %cst_95 {dimension_numbers = #tpu.dot_dimension_numbers<[1], [0], [0], [1], [0, 0, 1, 1], [], []>} : vector<3x64xbf16>, vector<64x144xbf16>, vector<3x144xf32> -> vector<3x144xf32>
    %c0_96 = arith.constant 0 : index
    %c0_97 = arith.constant 0 : index
    %80 = vector.load %arg10[%c0_96, %c0_97] : memref<3x1xf32, #tpu.memory_space<vmem>>, vector<3x1xf32>
    %81 = vector.broadcast %80 : vector<3x1xf32> to vector<3x144xf32>
    %82 = arith.addf %79, %81 : vector<3x144xf32>
    %cst_98 = arith.constant 0.000000e+00 : f32
    %83 = vector.broadcast %cst_98 : f32 to vector<3x144xf32>
    %84 = arith.maximumf %82, %83 : vector<3x144xf32>
    %c0_99 = arith.constant 0 : index
    %c0_100 = arith.constant 0 : index
    %85 = vector.load %arg18[%c0_99, %c0_100] : memref<144x2xbf16, #tpu.memory_space<vmem>>, vector<144x2xbf16>
    %86 = vector.extract_strided_slice %84 {offsets = [0, 0], sizes = [1, 144], strides = [1, 1]} : vector<3x144xf32> to vector<1x144xf32>
    %c0_101 = arith.constant 0 : index
    %c0_102 = arith.constant 0 : index
    %87 = vector.load %arg11[%c0_101, %c0_102] : memref<7x144xbf16, #tpu.memory_space<vmem>>, vector<7x144xbf16>
    %88 = arith.extf %87 : vector<7x144xbf16> to vector<7x144xf32>
    %89 = vector.broadcast %86 : vector<1x144xf32> to vector<7x144xf32>
    %90 = arith.mulf %89, %88 : vector<7x144xf32>
    %91 = vector.extract_strided_slice %84 {offsets = [1, 0], sizes = [1, 144], strides = [1, 1]} : vector<3x144xf32> to vector<1x144xf32>
    %c0_103 = arith.constant 0 : index
    %c0_104 = arith.constant 0 : index
    %92 = vector.load %arg12[%c0_103, %c0_104] : memref<7x144xbf16, #tpu.memory_space<vmem>>, vector<7x144xbf16>
    %93 = arith.extf %92 : vector<7x144xbf16> to vector<7x144xf32>
    %94 = vector.broadcast %91 : vector<1x144xf32> to vector<7x144xf32>
    %95 = arith.mulf %94, %93 : vector<7x144xf32>
    %96 = arith.addf %90, %95 : vector<7x144xf32>
    %97 = arith.truncf %96 : vector<7x144xf32> to vector<7x144xbf16>
    %98 = vector.extract_strided_slice %84 {offsets = [2, 0], sizes = [1, 144], strides = [1, 1]} : vector<3x144xf32> to vector<1x144xf32>
    %c0_105 = arith.constant 0 : index
    %c0_106 = arith.constant 0 : index
    %99 = vector.load %arg14[%c0_105, %c0_106] : memref<64x144xbf16, #tpu.memory_space<vmem>>, vector<64x144xbf16>
    %100 = arith.extf %99 : vector<64x144xbf16> to vector<64x144xf32>
    %101 = vector.broadcast %98 : vector<1x144xf32> to vector<64x144xf32>
    %102 = arith.mulf %101, %100 : vector<64x144xf32>
    %103 = arith.truncf %102 : vector<64x144xf32> to vector<64x144xbf16>
    %cst_107 = arith.constant dense<0.000000e+00> : vector<7x2xf32>
    %104 = tpu.matmul %97, %85, %cst_107 {dimension_numbers = #tpu.dot_dimension_numbers<[1], [0], [0], [1], [0, 0, 1, 1], [], []>} : vector<7x144xbf16>, vector<144x2xbf16>, vector<7x2xf32> -> vector<7x2xf32>
    %c0_108 = arith.constant 0 : index
    %c0_109 = arith.constant 0 : index
    %105 = vector.load %arg13[%c0_108, %c0_109] : memref<7x1xf32, #tpu.memory_space<vmem>>, vector<7x1xf32>
    %106 = vector.broadcast %105 : vector<7x1xf32> to vector<7x2xf32>
    %107 = arith.addf %104, %106 : vector<7x2xf32>
    %cst_110 = arith.constant dense<0xFF800000> : vector<2xf32>
    %108 = vector.multi_reduction <maximumf>, %107, %cst_110 [0] : vector<7x2xf32> to vector<2xf32>
    %109 = vector.shape_cast %108 : vector<2xf32> to vector<1x2xf32>
    %110 = vector.broadcast %109 : vector<1x2xf32> to vector<7x2xf32>
    %111 = arith.subf %107, %110 : vector<7x2xf32>
    %112 = math.exp %111 : vector<7x2xf32>
    %cst_111 = arith.constant dense<0.000000e+00> : vector<2xf32>
    %113 = vector.multi_reduction <add>, %112, %cst_111 [0] : vector<7x2xf32> to vector<2xf32>
    %114 = vector.shape_cast %113 : vector<2xf32> to vector<1x2xf32>
    %115 = math.log %114 : vector<1x2xf32>
    %116 = vector.broadcast %115 : vector<1x2xf32> to vector<7x2xf32>
    %117 = arith.subf %111, %116 : vector<7x2xf32>
    %cst_112 = arith.constant dense<0.000000e+00> : vector<64x2xf32>
    %118 = tpu.matmul %103, %85, %cst_112 {dimension_numbers = #tpu.dot_dimension_numbers<[1], [0], [0], [1], [0, 0, 1, 1], [], []>} : vector<64x144xbf16>, vector<144x2xbf16>, vector<64x2xf32> -> vector<64x2xf32>
    %c0_113 = arith.constant 0 : index
    %c0_114 = arith.constant 0 : index
    %119 = vector.load %arg15[%c0_113, %c0_114] : memref<64x1xf32, #tpu.memory_space<vmem>>, vector<64x1xf32>
    %120 = vector.broadcast %119 : vector<64x1xf32> to vector<64x2xf32>
    %121 = arith.addf %118, %120 : vector<64x2xf32>
    %cst_115 = arith.constant 0.000000e+00 : f32
    %122 = vector.broadcast %cst_115 : f32 to vector<64x2xf32>
    %123 = arith.maximumf %121, %122 : vector<64x2xf32>
    %c0_116 = arith.constant 0 : index
    %c0_117 = arith.constant 0 : index
    %124 = vector.load %arg16[%c0_116, %c0_117] : memref<1x64xbf16, #tpu.memory_space<vmem>>, vector<1x64xbf16>
    %125 = arith.truncf %123 : vector<64x2xf32> to vector<64x2xbf16>
    %cst_118 = arith.constant dense<0.000000e+00> : vector<1x2xf32>
    %126 = tpu.matmul %124, %125, %cst_118 {dimension_numbers = #tpu.dot_dimension_numbers<[1], [0], [0], [1], [0, 0, 1, 1], [], []>} : vector<1x64xbf16>, vector<64x2xbf16>, vector<1x2xf32> -> vector<1x2xf32>
    %c0_119 = arith.constant 0 : index
    %c0_120 = arith.constant 0 : index
    %127 = vector.load %arg17[%c0_119, %c0_120] : memref<1x1xf32, #tpu.memory_space<vmem>>, vector<1x1xf32>
    %128 = vector.broadcast %127 : vector<1x1xf32> to vector<1x2xf32>
    %129 = arith.addf %126, %128 : vector<1x2xf32>
    %130 = math.tanh %129 : vector<1x2xf32>
    %c0_121 = arith.constant 0 : index
    %c0_122 = arith.constant 0 : index
    %c0_123 = arith.constant 0 : index
    %131 = vector.load %arg19[%c0_121, %c0_122, %c0_123] : memref<1x8x2xf32, #tpu.memory_space<vmem>>, vector<1x7x2xf32>
    %132 = vector.shape_cast %131 : vector<1x7x2xf32> to vector<7x2xf32>
    %133 = vector.shape_cast %117 : vector<7x2xf32> to vector<1x7x2xf32>
    tpu.vector_store %arg19[%c0_121, %c0_122, %c0_123], %133 {strides = array<i32>} : memref<1x8x2xf32, #tpu.memory_space<vmem>>, vector<1x7x2xf32>,
    %c0_124 = arith.constant 0 : index
    %c7 = arith.constant 7 : index
    %c0_125 = arith.constant 0 : index
    %134 = vector.load %arg19[%c0_124, %c7, %c0_125] : memref<1x8x2xf32, #tpu.memory_space<vmem>>, vector<1x1x2xf32>
    %135 = vector.shape_cast %134 : vector<1x1x2xf32> to vector<1x2xf32>
    %136 = vector.shape_cast %130 : vector<1x2xf32> to vector<1x1x2xf32>
    tpu.vector_store %arg19[%c0_124, %c7, %c0_125], %136 {strides = array<i32>} : memref<1x8x2xf32, #tpu.memory_space<vmem>>, vector<1x1x2xf32>,
    return
  }
  func.func @transform_0(%arg0: i32) -> (i32, i32, i32) {
    %c0_i32 = arith.constant 0 : i32
    %c0_i32_0 = arith.constant 0 : i32
    %c0_i32_1 = arith.constant 0 : i32
    return %arg0, %c0_i32, %c0_i32_0 : i32, i32, i32
  }
  func.func @transform_1(%arg0: i32) -> (i32, i32) {
    %c0_i32 = arith.constant 0 : i32
    %c0_i32_0 = arith.constant 0 : i32
    %c0_i32_1 = arith.constant 0 : i32
    return %c0_i32, %c0_i32_0 : i32, i32
  }
  func.func @transform_2(%arg0: i32) -> (i32, i32) {
    %c0_i32 = arith.constant 0 : i32
    %c0_i32_0 = arith.constant 0 : i32
    %c0_i32_1 = arith.constant 0 : i32
    return %c0_i32, %c0_i32_0 : i32, i32
  }
  func.func @transform_3(%arg0: i32) -> (i32, i32) {
    %c0_i32 = arith.constant 0 : i32
    %c0_i32_0 = arith.constant 0 : i32
    %c0_i32_1 = arith.constant 0 : i32
    return %c0_i32, %c0_i32_0 : i32, i32
  }
  func.func @transform_4(%arg0: i32) -> (i32, i32) {
    %c0_i32 = arith.constant 0 : i32
    %c0_i32_0 = arith.constant 0 : i32
    %c0_i32_1 = arith.constant 0 : i32
    return %c0_i32, %c0_i32_0 : i32, i32
  }
  func.func @transform_5(%arg0: i32) -> (i32, i32) {
    %c0_i32 = arith.constant 0 : i32
    %c0_i32_0 = arith.constant 0 : i32
    %c0_i32_1 = arith.constant 0 : i32
    return %c0_i32, %c0_i32_0 : i32, i32
  }
  func.func @transform_6(%arg0: i32) -> (i32, i32) {
    %c0_i32 = arith.constant 0 : i32
    %c0_i32_0 = arith.constant 0 : i32
    %c0_i32_1 = arith.constant 0 : i32
    return %c0_i32, %c0_i32_0 : i32, i32
  }
  func.func @transform_7(%arg0: i32) -> (i32, i32) {
    %c0_i32 = arith.constant 0 : i32
    %c0_i32_0 = arith.constant 0 : i32
    %c0_i32_1 = arith.constant 0 : i32
    return %c0_i32, %c0_i32_0 : i32, i32
  }
  func.func @transform_8(%arg0: i32) -> (i32, i32) {
    %c0_i32 = arith.constant 0 : i32
    %c0_i32_0 = arith.constant 0 : i32
    %c0_i32_1 = arith.constant 0 : i32
    return %c0_i32, %c0_i32_0 : i32, i32
  }
  func.func @transform_9(%arg0: i32) -> (i32, i32) {
    %c0_i32 = arith.constant 0 : i32
    %c0_i32_0 = arith.constant 0 : i32
    %c0_i32_1 = arith.constant 0 : i32
    return %c0_i32, %c0_i32_0 : i32, i32
  }
  func.func @transform_10(%arg0: i32) -> (i32, i32) {
    %c0_i32 = arith.constant 0 : i32
    %c0_i32_0 = arith.constant 0 : i32
    %c0_i32_1 = arith.constant 0 : i32
    return %c0_i32, %c0_i32_0 : i32, i32
  }
  func.func @transform_11(%arg0: i32) -> (i32, i32) {
    %c0_i32 = arith.constant 0 : i32
    %c0_i32_0 = arith.constant 0 : i32
    %c0_i32_1 = arith.constant 0 : i32
    return %c0_i32, %c0_i32_0 : i32, i32
  }
  func.func @transform_12(%arg0: i32) -> (i32, i32) {
    %c0_i32 = arith.constant 0 : i32
    %c0_i32_0 = arith.constant 0 : i32
    %c0_i32_1 = arith.constant 0 : i32
    return %c0_i32, %c0_i32_0 : i32, i32
  }
  func.func @transform_13(%arg0: i32) -> (i32, i32) {
    %c0_i32 = arith.constant 0 : i32
    %c0_i32_0 = arith.constant 0 : i32
    %c0_i32_1 = arith.constant 0 : i32
    return %c0_i32, %c0_i32_0 : i32, i32
  }
  func.func @transform_14(%arg0: i32) -> (i32, i32) {
    %c0_i32 = arith.constant 0 : i32
    %c0_i32_0 = arith.constant 0 : i32
    %c0_i32_1 = arith.constant 0 : i32
    return %c0_i32, %c0_i32_0 : i32, i32
  }
  func.func @transform_15(%arg0: i32) -> (i32, i32) {
    %c0_i32 = arith.constant 0 : i32
    %c0_i32_0 = arith.constant 0 : i32
    %c0_i32_1 = arith.constant 0 : i32
    return %c0_i32, %c0_i32_0 : i32, i32
  }
  func.func @transform_16(%arg0: i32) -> (i32, i32) {
    %c0_i32 = arith.constant 0 : i32
    %c0_i32_0 = arith.constant 0 : i32
    %c0_i32_1 = arith.constant 0 : i32
    return %c0_i32, %c0_i32_0 : i32, i32
  }
  func.func @transform_17(%arg0: i32) -> (i32, i32) {
    %c0_i32 = arith.constant 0 : i32
    %c0_i32_0 = arith.constant 0 : i32
    %c0_i32_1 = arith.constant 0 : i32
    return %c0_i32, %c0_i32_0 : i32, i32
  }
  func.func @transform_18(%arg0: i32) -> (i32, i32, i32) {
    %c0_i32 = arith.constant 0 : i32
    %c0_i32_0 = arith.constant 0 : i32
    %c0_i32_1 = arith.constant 0 : i32
    return %arg0, %c0_i32, %c0_i32_0 : i32, i32, i32
  }
}

</mosaic_0001>

<bundles_post_ra>
// kernel: alphazero_forward.1
= control target key start
LH: loop header
LB: loop body
LE: loop exit
PB: predicated region body
PF: predicated region fallthrough
CT: control target
= control target key end

     0   :  { %v5207_v0 = vmov 0   ;;  %vm189_vm0 = vcmask 1040384   ;;  %vm176_vm1 = vcmask 146432   ;;  %vm71_vm2 = vcmask 1043584   ;;  %s5210_s23 = smov 10   ;;  %s5211_s24 = smov 8   ;;  %s7098_s3 = inlined_call_operand.vmem [shape: f32[64,1], index: 3, kind: input, shape index: {}]   ;;  %s7099_s0 = inlined_call_operand.vmem [shape: bf16[1,18,144], index: 0, kind: input, shape index: {}]   ;;  %s7100_s2 = inlined_call_operand.vmem [shape: bf16[64,18], index: 2, kind: input, shape index: {}]   ;;  %s7101_s1 = inlined_call_operand.vmem [shape: f32[1,144], index: 1, kind: input, shape index: {}]   ;;  %s7102_s5 = inlined_call_operand.vmem [shape: f32[64,1], index: 5, kind: input, shape index: {}]   ;;  %s7103_s4 = inlined_call_operand.vmem [shape: bf16[64,576], index: 4, kind: input, shape index: {}]   ;;  %s7104_s7 = inlined_call_operand.vmem [shape: f32[64,1], index: 7, kind: input, shape index: {}]   ;;  %s7105_s16 = inlined_call_operand.<no memory space> [shape: f32[1,1], index: 16, kind: input, shape index: {}]   ;;  %s7106_s9 = inlined_call_operand.vmem [shape: f32[3,1], index: 9, kind: input, shape index: {}]   ;;  %s7107_s14 = inlined_call_operand.vmem [shape: f32[64,1], index: 14, kind: input, shape index: {}]   ;;  %s7108_s6 = inlined_call_operand.vmem [shape: bf16[64,576], index: 6, kind: input, shape index: {}]   ;;  %s7109_s12 = inlined_call_operand.vmem [shape: f32[7,1], index: 12, kind: input, shape index: {}]   ;;  %s7110_s17 = inlined_call_operand.vmem [shape: bf16[144,2], index: 17, kind: input, shape index: {}]   ;;  %s7111_s8 = inlined_call_operand.vmem [shape: bf16[3,64], index: 8, kind: input, shape index: {}]   ;;  %s7112_s10 = inlined_call_operand.vmem [shape: bf16[7,144], index: 10, kind: input, shape index: {}]   ;;  %s7113_s11 = inlined_call_operand.vmem [shape: bf16[7,144], index: 11, kind: input, shape index: {}]   ;;  %s7114_s13 = inlined_call_operand.vmem [shape: bf16[64,144], index: 13, kind: input, shape index: {}]   ;;  %s7115_s18 = inlined_call_operand.vmem [shape: f32[1,8,2], index: 18, kind: output, shape index: {}]   ;;  %s7116_s15 = inlined_call_operand.vmem [shape: bf16[1,64], index: 15, kind: input, shape index: {}]  }
   0x1   :  { %7120 = sst [smem:[#allocation5_spill]] %s7098_s3  ;;  %5198 = vset.pattern.permute.xlu0 %v5207_v0  ;;  %63 = vst [vmem:[#allocation2] sm:$0xf] %v5207_v0  ;;  %5199 = vset.pattern.permute.xlu1 %v5207_v0  ;;  %vm72_vm3 = vcmask 130052   ;;  %v62_v30 = vld [vmem:[%s7101_s1] sm:$0x3] }
   0x2   :  { %7121 = sst [smem:[#allocation6_spill]] %s7099_s0  ;;  %64 = vst [vmem:[#allocation2 + $0x10] sm:$0xf] %v5207_v0  ;;  %5200 = vset.pattern.permute.xlu2 %v5207_v0  ;;  %vm73_vm4 = vmor %vm72_vm3, %vm71_vm2  ;;  %v5401_v34 = vperm.slane %v62_v30, 0  ;;  %v5403_v37 = vperm.slane %v62_v30, 1  ;;  %vm299_vm5 = vcmask 1043456  }
   0x3   :  { %7122 = sst [smem:[#allocation7_spill]] %s7100_s2  ;;  %65 = vst [vmem:[#allocation2 + $0x20] sm:$0xf] %v5207_v0  ;;  %vm5409_vm6 = vmor %vm72_vm3, %vm299_vm5  ;;  %s5208_s1 = smov 1   ;;  %vm504_vm7 = vcmask 72704   ;;  %vm730_vm8 = vcmask 7168  }
   0x4   :  { %s7123_s29 = sld [smem:[#allocation5_spill]]  ;;  %66 = vst [vmem:[#allocation2 + $0x30] sm:$0xf] %v5207_v0  ;;  %s5209_s2 = smov 9   ;;  %vm391_vm9 = vcmask 80896   ;;  %vm617_vm10 = vcmask 64512  }
   0x5   :  { %s7124_s19 = sld [smem:[#allocation6_spill]]  ;;  %67 = vst [vmem:[#allocation2 + $0x40] sm:$0xf] %v5207_v0  ;;  %s5212_s25 = smov 127   ;;  %vm948_vm11 = vcmask 973824   ;;  %vm818_vm12 = vcmask 1039360  }
   0x6   :  { %68 = vst [vmem:[#allocation2 + $0x50] sm:$0xf] %v5207_v0  ;;  %s7125_s21 = sld [smem:[#allocation7_spill]]  ;;  %s5213_s26 = smov 119   ;;  %vm1013_vm13 = vcmask 965632   ;;  %vm883_vm14 = vcmask 982016  }
   0x7   :  { %69 = vst [vmem:[#allocation2 + $0x60] sm:$0xf] %v5207_v0  ;;  %s5214_s27 = smov 118   ;;  %s5215_s28 = smov 120   ;;  %vm1642_vm15 = vcmask 523264   ;;  %vm4106_vm2 = vcmask 8192  }
   0x8   :  { %70 = vst [vmem:[#allocation2 + $0x70] sm:$0xf] %v5207_v0 }
   0x9   :  { %74 = vst.msk [vmem:[#allocation2 + $0x8] sm:$0xff] %vm73_vm4, %v5207_v0 }
   0xa   :  { %v99_v1 = vld [vmem:[%s7123_s29 + $0x30] sm:$0xff]  ;;  %v97_v3 = vld [vmem:[%s7123_s29 + $0x20] sm:$0xff]  ;;  %v100_v14 = vld [vmem:[%s7123_s29 + $0x38] sm:$0xff]  ;;  %75 = vst.msk [vmem:[#allocation2 + $0x18] sm:$0xff] %vm73_vm4, %v5207_v0 }
   0xb   :  { %v92_v2 = vld [vmem:[%s7124_s19 + $0x10] sm:$0x11]  ;;  %133 = vperm.xlu0 %5198, %v99_v1   ;;  %123 = vperm.xlu1 %5199, %v97_v3   ;;  %v4130_v8 = vld [vmem:[%s7124_s19] sm:$0xf]  ;;  %v4977_v9 = vld [vmem:[%s7124_s19 + $0x4] sm:$0xf0] }
   0xc   :  { %v168_v4 = vunpack.c.l.b16 %v92_v2  ;;  %v169_v5 = vunpack.c.h.b16 %v92_v2  ;;  %v4976_v10 = vld [vmem:[%s7124_s19 + $0x4] sm:$0xf]  ;;  %v4132_v11 = vld [vmem:[%s7124_s19 + $0x8] sm:$0xf0]  ;;  %v4131_v15 = vor.u32 %v4977_v9, %v4130_v8  ;;  %v4974_v19 = vld [vmem:[%s7125_s21 + $0x10] sm:$0xff]  ;;  %76 = vst.msk [vmem:[#allocation2 + $0x28] sm:$0xff] %vm73_vm4, %v5207_v0 }
   0xd   :  { %v98_v16 = vld [vmem:[%s7123_s29 + $0x28] sm:$0xff]  ;;  %v4135_v17 = vor.u32 %v4976_v10, %v4132_v11  ;;  %v4972_v18 = vld [vmem:[%s7125_s21] sm:$0xff]  ;;  %v4975_v22 = vld [vmem:[%s7125_s21 + $0x18] sm:$0xff]  ;;  %77 = vst.msk [vmem:[#allocation2 + $0x38] sm:$0xff] %vm73_vm4, %v5207_v0 }
   0xe   :  { %v172_v6 = vpack.c.b16 %v168_v4, %v168_v4  ;;  %v173_v7 = vpack.c.b16 %v169_v5, %v169_v5  ;;  %v93_v20 = vld [vmem:[%s7123_s29] sm:$0xff]  ;;  %v94_v21 = vld [vmem:[%s7123_s29 + $0x8] sm:$0xff]  ;;  %v95_v24 = vld [vmem:[%s7123_s29 + $0x10] sm:$0xff]  ;;  %78 = vst.msk [vmem:[#allocation2 + $0x48] sm:$0xff] %vm73_vm4, %v5207_v0 }
   0xf   :  { %v4973_v23 = vld [vmem:[%s7125_s21 + $0x8] sm:$0xff]  ;;  %113 = vperm.xlu2 %5200, %v95_v24   ;;  %v96_v25 = vld [vmem:[%s7123_s29 + $0x18] sm:$0xff]  ;;  %79 = vst.msk [vmem:[#allocation2 + $0x58] sm:$0xff] %vm73_vm4, %v5207_v0 }
  0x10   :  { %v191_v12 = vsel %vm189_vm0, %v172_v6, 0  ;;  %v194_v13 = vsel %vm189_vm0, %v173_v7, 0  ;;  %80 = vst.msk [vmem:[#allocation2 + $0x68] sm:$0xff] %vm73_vm4, %v5207_v0  ;;  %vm3899_vm0 = vcmask 130048  }
  0x11   :  { %202 = vmatpush.bf16.msra.mxu0 %v191_v12  ;;  %5179 = vmatpush.bf16.msra.mxu2 %v191_v12  ;;  %81 = vst.msk [vmem:[#allocation2 + $0x78] sm:$0xff] %vm73_vm4, %v5207_v0 }
  0x12   :  { %231 = vmatpush.bf16.msra.mxu1 %v194_v13 }
  0x13   :  { %138 = vperm.xlu0 %5198, %v100_v14   ;;  %128 = vperm.xlu1 %5199, %v98_v16  }
  0x15   :  { %203 = vmatpush.bf16.msra.mxu0 %v4131_v15  ;;  %5180 = vmatpush.bf16.msra.mxu2 %v4131_v15 }
  0x16   :  { %232 = vmatpush.bf16.msra.mxu1 %v4135_v17 }
  0x17   :  { %118 = vperm.xlu2 %5200, %v96_v25  }
  0x18   :  { %4136 = vmatmul.msk.bf16.vlgmr.msra.gmra.mxu0 %vm176_vm1, %v4972_v18  ;;  %4138 = vmatmul.msk.bf16.vlgmr.msra.gmra.mxu2 %vm176_vm1, %v4974_v19 }
  0x19   :  { %4140 = vmatmul.msk.bf16.vlgmr.msra.gmra.mxu1 %vm176_vm1, %v4972_v18 }
  0x1b   :  { %103 = vperm.xlu0 %5198, %v93_v20   ;;  %108 = vperm.xlu1 %5199, %v94_v21  }
  0x28   :  { %4139 = vmatmul.msk.bf16.gmra.mxu2 %vm176_vm1, %v4975_v22  ;;  %4137 = vmatmul.msk.bf16.gmra.mxu0 %vm176_vm1, %v4973_v23 }
  0x29   :  { %4141 = vmatmul.msk.bf16.gmra.mxu1 %vm176_vm1, %v4973_v23 }
  0x39   :  { %4142 = vmatmul.msk.bf16.gmra.mxu1 %vm176_vm1, %v4974_v19 }
  0x49   :  { %4143 = vmatmul.msk.bf16.gmra.mxu1 %vm176_vm1, %v4975_v22  ;;  %vm3929_vm1 = vcmask 14336  }
  0x69   :  { %v114_v51 = vpop.permute.xlu2 %113 }
  0x71   :  { %v119_v4 = vpop.permute.xlu2 %118 }
  0x7d   :  { %v5387_v26 = vpop.permute.xlu0 %133  ;;  %v5392_v27 = vpop.permute.xlu1 %123 }
  0x85   :  { %v5394_v28 = vpop.permute.xlu0 %138  ;;  %v5396_v29 = vpop.permute.xlu1 %128 }
  0x8d   :  { %v104_v31 = vpop.permute.xlu0 %103  ;;  %v109_v43 = vpop.permute.xlu1 %108 }
  0x95   :  { %v205_v32 = vpop.f32.mrf.mxu0 }
  0x96   :  { %v206_v33 = vadd.f32 %v205_v32, %v104_v31  ;;  %v234_v35 = vpop.f32.mrf.mxu1 }
  0x97   :  { %v235_v36 = vadd.f32 %v234_v35, %v104_v31 }
  0x98   :  { %v254_v38 = vmax.f32 %v206_v33, 0.0 }
  0x99   :  { %v255_v39 = vmax.f32 %v235_v36, 0.0 }
  0x9a   :  { %v275_v40 = vmul.f32 %v5401_v34, %v254_v38 }
  0x9b   :  { %v276_v41 = vmul.f32 %v5403_v37, %v255_v39  ;;  %v215_v1 = vpop.f32.mrf.mxu2 }
  0x9c   :  { %v216_v15 = vadd.f32 %v215_v1, %v5392_v27 }
  0x9d   :  { %v291_v44 = vpack.c.bf16 %v276_v41, %v275_v40  ;;  %v207_v45 = vpop.f32.mrf.mxu0 }
  0x9e   :  { %v208_v46 = vadd.f32 %v207_v45, %v109_v43  ;;  %v236_v47 = vpop.f32.mrf.mxu1  ;;  %v262_v22 = vmax.f32 %v216_v15, 0.0 }
  0x9f   :  { %301 = vst.msk [vmem:[#allocation2 + $0x4] sm:$0xff] %vm5409_vm6, %v291_v44  ;;  %v237_v48 = vadd.f32 %v236_v47, %v109_v43 }
  0xa0   :  { %v256_v49 = vmax.f32 %v208_v46, 0.0  ;;  %v283_v30 = vmul.f32 %v5401_v34, %v262_v22 }
  0xa1   :  { %v257_v50 = vmax.f32 %v237_v48, 0.0 }
  0xa2   :  { %v277_v52 = vmul.f32 %v5401_v34, %v256_v49 }
  0xa3   :  { %v278_v53 = vmul.f32 %v5403_v37, %v257_v50  ;;  %v217_v17 = vpop.f32.mrf.mxu2 }
  0xa5   :  { %v292_v54 = vpack.c.bf16 %v278_v53, %v277_v52  ;;  %v210_v55 = vpop.f32.mrf.mxu0 }
  0xa6   :  { %v239_v56 = vpop.f32.mrf.mxu1  ;;  %v650_v57 = vld [vmem:[#allocation2 + $0x8] sm:$0xf]  ;;  %v423_v59 = vld [vmem:[#allocation2] sm:$0xff]  ;;  %v211_v60 = vadd.f32 %v210_v55, %v114_v51 }
  0xa7   :  { %v424_v58 = vld [vmem:[#allocation2 + $0x8] sm:$0xf]  ;;  %302 = vst.msk [vmem:[#allocation2 + $0x14] sm:$0xff] %vm5409_vm6, %v292_v54  ;;  %683 = vrot.lane.b32.xlu1 %v650_v57, %s5208_s1  ;;  %v240_v61 = vadd.f32 %v239_v56, %v114_v51  ;;  %455 = vrot.lane.b32.xlu2 %v423_v59, %s5209_s2 }
  0xa8   :  { %457 = vrot.lane.b32.xlu0 %v424_v58, %s5209_s2  ;;  %v5421_v62 = vld [vmem:[#allocation2 + $0x4] sm:$0xff]  ;;  %v258_v63 = vmax.f32 %v211_v60, 0.0 }
  0xa9   :  { %770 = vst.msk [vmem:[#allocation3 + $0x100] sm:$0xff] %vm5409_vm6, %v5421_v62  ;;  %v259_v0 = vmax.f32 %v240_v61, 0.0  ;;  %v310_v9 = vld [vmem:[#allocation2 + $0x8] sm:$0xf] }
  0xaa   :  { %v279_v2 = vmul.f32 %v5401_v34, %v258_v63  ;;  %v537_v20 = vld [vmem:[#allocation2 + $0x8] sm:$0xf] }
  0xab   :  { %v280_v3 = vmul.f32 %v5403_v37, %v259_v0  ;;  %v220_v33 = vpop.f32.mrf.mxu2 }
  0xac   :  { %v221_v46 = vadd.f32 %v220_v33, %v5387_v26 }
  0xad   :  { %v293_v5 = vpack.c.bf16 %v280_v3, %v279_v2  ;;  %v212_v6 = vpop.f32.mrf.mxu0 }
  0xae   :  { %v241_v7 = vpop.f32.mrf.mxu1  ;;  %v213_v8 = vadd.f32 %v212_v6, %v119_v4  ;;  %v5433_v11 = vld [vmem:[#allocation2 + $0x14] sm:$0xff]  ;;  %v266_v49 = vmax.f32 %v221_v46, 0.0 }
  0xaf   :  { %341 = vrot.lane.b32.xlu1 %v423_v59, %s5210_s23  ;;  %303 = vst.msk [vmem:[#allocation2 + $0x24] sm:$0xff] %vm5409_vm6, %v293_v5  ;;  %v242_v10 = vadd.f32 %v241_v7, %v119_v4  ;;  %343 = vrot.lane.b32.xlu2 %v310_v9, %s5210_s23  ;;  %v425_v21 = vld [vmem:[#allocation2 + $0x10] sm:$0xff]  ;;  %v652_v36 = vld [vmem:[#allocation2 + $0x18] sm:$0xf] }
  0xb0   :  { %681 = vrot.lane.b32.xlu0 %v423_v59, %s5208_s1  ;;  %v260_v12 = vmax.f32 %v213_v8, 0.0  ;;  %771 = vst.msk [vmem:[#allocation3 + $0x108] sm:$0xff] %vm5409_vm6, %v5433_v11  ;;  %v312_v38 = vld [vmem:[#allocation2 + $0x18] sm:$0xf]  ;;  %v287_v54 = vmul.f32 %v5401_v34, %v266_v49 }
  0xb1   :  { %v261_v13 = vmax.f32 %v242_v10, 0.0  ;;  %v426_v41 = vld [vmem:[#allocation2 + $0x18] sm:$0xf] }
  0xb2   :  { %v281_v14 = vmul.f32 %v5401_v34, %v260_v12 }
  0xb3   :  { %v282_v16 = vmul.f32 %v5403_v37, %v261_v13  ;;  %v222_v52 = vpop.f32.mrf.mxu2 }
  0xb4   :  { %v223_v55 = vadd.f32 %v222_v52, %v5394_v28 }
  0xb5   :  { %v294_v18 = vpack.c.bf16 %v282_v16, %v281_v14 }
  0xb6   :  { %v244_v19 = vpop.f32.mrf.mxu1  ;;  %v5447_v24 = vld [vmem:[#allocation2 + $0x24] sm:$0xff]  ;;  %v268_v61 = vmax.f32 %v223_v55, 0.0 }
  0xb7   :  { %v245_v23 = vadd.f32 %v244_v19, %v5392_v27  ;;  %459 = vrot.lane.b32.xlu1 %v425_v21, %s5209_s2  ;;  %304 = vst.msk [vmem:[#allocation2 + $0x34] sm:$0xff] %vm5409_vm6, %v294_v18  ;;  %568 = vrot.lane.b32.xlu2 %v423_v59, %s5211_s24  ;;  %v218_v27 = vadd.f32 %v217_v17, %v5396_v29  ;;  %v427_v56 = vld [vmem:[#allocation2 + $0x20] sm:$0xff]  ;;  %v428_v57 = vld [vmem:[#allocation2 + $0x28] sm:$0xf] }
  0xb8   :  { %570 = vrot.lane.b32.xlu0 %v537_v20, %s5211_s24  ;;  %772 = vst.msk [vmem:[#allocation3 + $0x110] sm:$0xff] %vm5409_vm6, %v5447_v24  ;;  %v654_v59 = vld [vmem:[#allocation2 + $0x28] sm:$0xf]  ;;  %v289_v2 = vmul.f32 %v5401_v34, %v268_v61 }
  0xb9   :  { %v263_v25 = vmax.f32 %v245_v23, 0.0  ;;  %v264_v39 = vmax.f32 %v218_v27, 0.0  ;;  %v314_v5 = vld [vmem:[#allocation2 + $0x28] sm:$0xf] }
  0xba   :  { %v541_v6 = vld [vmem:[#allocation2 + $0x28] sm:$0xf] }
  0xbb   :  { %v284_v31 = vmul.f32 %v5403_v37, %v263_v25  ;;  %v285_v45 = vmul.f32 %v5401_v34, %v264_v39 }
  0xbd   :  { %v295_v32 = vpack.c.bf16 %v284_v31, %v283_v30 }
  0xbe   :  { %v246_v35 = vpop.f32.mrf.mxu1  ;;  %v5461_v43 = vld [vmem:[#allocation2 + $0x34] sm:$0xff] }
  0xbf   :  { %305 = vst.msk [vmem:[#allocation2 + $0x44] sm:$0xff] %vm5409_vm6, %v295_v32  ;;  %v247_v40 = vadd.f32 %v246_v35, %v5396_v29  ;;  %347 = vrot.lane.b32.xlu1 %v312_v38, %s5210_s23  ;;  %461 = vrot.lane.b32.xlu2 %v426_v41, %s5209_s2  ;;  %v429_v7 = vld [vmem:[#allocation2 + $0x30] sm:$0xff]  ;;  %v430_v9 = vld [vmem:[#allocation2 + $0x38] sm:$0xf] }
  0xc0   :  { %687 = vrot.lane.b32.xlu0 %v652_v36, %s5208_s1  ;;  %773 = vst.msk [vmem:[#allocation3 + $0x118] sm:$0xff] %vm5409_vm6, %v5461_v43  ;;  %v656_v10 = vld [vmem:[#allocation2 + $0x38] sm:$0xf] }
  0xc1   :  { %v265_v44 = vmax.f32 %v247_v40, 0.0  ;;  %v316_v12 = vld [vmem:[#allocation2 + $0x38] sm:$0xf] }
  0xc2   :  { %v543_v13 = vld [vmem:[#allocation2 + $0x38] sm:$0xf] }
  0xc3   :  { %v286_v29 = vmul.f32 %v5403_v37, %v265_v44 }
  0xc5   :  { %v296_v47 = vpack.c.bf16 %v286_v29, %v285_v45 }
  0xc6   :  { %v249_v48 = vpop.f32.mrf.mxu1  ;;  %v5475_v51 = vld [vmem:[#allocation2 + $0x44] sm:$0xff] }
  0xc7   :  { %306 = vst.msk [vmem:[#allocation2 + $0x54] sm:$0xff] %vm5409_vm6, %v296_v47  ;;  %v250_v50 = vadd.f32 %v249_v48, %v5387_v26  ;;  %572 = vrot.lane.b32.xlu1 %v425_v21, %s5211_s24  ;;  %685 = vrot.lane.b32.xlu2 %v425_v21, %s5208_s1  ;;  %v431_v14 = vld [vmem:[#allocation2 + $0x40] sm:$0xff]  ;;  %v432_v15 = vld [vmem:[#allocation2 + $0x48] sm:$0xf] }
  0xc8   :  { %345 = vrot.lane.b32.xlu0 %v425_v21, %s5210_s23  ;;  %774 = vst.msk [vmem:[#allocation3 + $0x120] sm:$0xff] %vm5409_vm6, %v5475_v51  ;;  %v658_v16 = vld [vmem:[#allocation2 + $0x48] sm:$0xf] }
  0xc9   :  { %v267_v53 = vmax.f32 %v250_v50, 0.0  ;;  %v318_v17 = vld [vmem:[#allocation2 + $0x48] sm:$0xf] }
  0xca   :  { %v545_v19 = vld [vmem:[#allocation2 + $0x48] sm:$0xf] }
  0xcb   :  { %v288_v26 = vmul.f32 %v5403_v37, %v267_v53 }
  0xcd   :  { %v297_v58 = vpack.c.bf16 %v288_v26, %v287_v54 }
  0xce   :  { %v251_v60 = vpop.f32.mrf.mxu1  ;;  %v5490_v0 = vld [vmem:[#allocation2 + $0x54] sm:$0xff] }
  0xcf   :  { %307 = vst.msk [vmem:[#allocation2 + $0x64] sm:$0xff] %vm5409_vm6, %v297_v58  ;;  %v252_v63 = vadd.f32 %v251_v60, %v5394_v28  ;;  %465 = vrot.lane.b32.xlu1 %v428_v57, %s5209_s2  ;;  %691 = vrot.lane.b32.xlu2 %v654_v59, %s5208_s1  ;;  %v433_v21 = vld [vmem:[#allocation2 + $0x50] sm:$0xff]  ;;  %v434_v22 = vld [vmem:[#allocation2 + $0x58] sm:$0xf] }
  0xd0   :  { %463 = vrot.lane.b32.xlu0 %v427_v56, %s5209_s2  ;;  %775 = vst.msk [vmem:[#allocation3 + $0x128] sm:$0xff] %vm5409_vm6, %v5490_v0  ;;  %v660_v23 = vld [vmem:[#allocation2 + $0x58] sm:$0xf] }
  0xd1   :  { %v269_v1 = vmax.f32 %v252_v63, 0.0  ;;  %v320_v30 = vld [vmem:[#allocation2 + $0x58] sm:$0xf] }
  0xd2   :  { %v547_v39 = vld [vmem:[#allocation2 + $0x58] sm:$0xf] }
  0xd3   :  { %v290_v3 = vmul.f32 %v5403_v37, %v269_v1 }
  0xd5   :  { %v298_v4 = vpack.c.bf16 %v290_v3, %v289_v2 }
  0xd6   :  { %v5501_v28 = vld [vmem:[#allocation2 + $0x64] sm:$0xff] }
  0xd7   :  { %308 = vst.msk [vmem:[#allocation2 + $0x74] sm:$0xff] %vm5409_vm6, %v298_v4  ;;  %689 = vrot.lane.b32.xlu1 %v427_v56, %s5208_s1  ;;  %349 = vrot.lane.b32.xlu2 %v427_v56, %s5210_s23  ;;  %v435_v40 = vld [vmem:[#allocation2 + $0x60] sm:$0xff]  ;;  %v436_v54 = vld [vmem:[#allocation2 + $0x68] sm:$0xf] }
  0xd8   :  { %351 = vrot.lane.b32.xlu0 %v314_v5, %s5210_s23  ;;  %776 = vst.msk [vmem:[#allocation3 + $0x130] sm:$0xff] %vm5409_vm6, %v5501_v28  ;;  %v662_v55 = vld [vmem:[#allocation2 + $0x68] sm:$0xf] }
  0xd9   :  { %v322_v26 = vld [vmem:[#allocation2 + $0x68] sm:$0xf] }
  0xde   :  { %v5509_v8 = vld [vmem:[#allocation2 + $0x74] sm:$0xff] }
  0xdf   :  { %578 = vrot.lane.b32.xlu1 %v541_v6, %s5211_s24  ;;  %467 = vrot.lane.b32.xlu2 %v429_v7, %s5209_s2  ;;  %777 = vst.msk [vmem:[#allocation3 + $0x138] sm:$0xff] %vm5409_vm6, %v5509_v8 }
  0xe0   :  { %576 = vrot.lane.b32.xlu0 %v427_v56, %s5211_s24 }
  0xe7   :  { %695 = vrot.lane.b32.xlu1 %v656_v10, %s5208_s1  ;;  %355 = vrot.lane.b32.xlu2 %v316_v12, %s5210_s23 }
  0xe8   :  { %469 = vrot.lane.b32.xlu0 %v430_v9, %s5209_s2 }
  0xef   :  { %353 = vrot.lane.b32.xlu1 %v429_v7, %s5210_s23  ;;  %580 = vrot.lane.b32.xlu2 %v429_v7, %s5211_s24 }
  0xf0   :  { %693 = vrot.lane.b32.xlu0 %v429_v7, %s5208_s1 }
  0xf7   :  { %471 = vrot.lane.b32.xlu1 %v431_v14, %s5209_s2  ;;  %473 = vrot.lane.b32.xlu2 %v432_v15, %s5209_s2  ;;  %v437_v15 = vld [vmem:[#allocation2 + $0x70] sm:$0xff] }
  0xf8   :  { %582 = vrot.lane.b32.xlu0 %v543_v13, %s5211_s24 }
  0xff   :  { %359 = vrot.lane.b32.xlu1 %v318_v17, %s5210_s23  ;;  %697 = vrot.lane.b32.xlu2 %v431_v14, %s5208_s1 }
 0x100   :  { %699 = vrot.lane.b32.xlu0 %v658_v16, %s5208_s1  ;;  %v438_v16 = vld [vmem:[#allocation2 + $0x78] sm:$0xf] }
 0x101   :  { %v456_v18 = vpop.permute.xlu2 %455 }
 0x102   :  { %v487_v32 = vrot.slane %v456_v18, 4 }
 0x107   :  { %584 = vrot.lane.b32.xlu1 %v431_v14, %s5211_s24  ;;  %586 = vrot.lane.b32.xlu2 %v545_v19, %s5211_s24 }
 0x108   :  { %357 = vrot.lane.b32.xlu0 %v431_v14, %s5210_s23  ;;  %v549_v14 = vld [vmem:[#allocation2 + $0x68] sm:$0xf] }
 0x109   :  { %v344_v20 = vpop.permute.xlu2 %343 }
 0x10a   :  { %v374_v45 = vrot.slane %v344_v20, 4 }
 0x10f   :  { %477 = vrot.lane.b32.xlu1 %v434_v22, %s5209_s2  ;;  %703 = vrot.lane.b32.xlu2 %v660_v23, %s5208_s1 }
 0x110   :  { %475 = vrot.lane.b32.xlu0 %v433_v21, %s5209_s2 }
 0x111   :  { %v569_v25 = vpop.permute.xlu2 %568 }
 0x112   :  { %v600_v58 = vrot.slane %v569_v25, 4 }
 0x117   :  { %701 = vrot.lane.b32.xlu1 %v433_v21, %s5208_s1  ;;  %361 = vrot.lane.b32.xlu2 %v433_v21, %s5210_s23 }
 0x118   :  { %363 = vrot.lane.b32.xlu0 %v320_v30, %s5210_s23  ;;  %v324_v30 = vld [vmem:[#allocation2 + $0x78] sm:$0xf] }
 0x119   :  { %v684_v27 = vpop.permute.xlu1 %683  ;;  %v462_v35 = vpop.permute.xlu2 %461 }
 0x11a   :  { %v458_v31 = vpop.permute.xlu0 %457  ;;  %v714_v46 = vrot.slane %v684_v27, 4  ;;  %v490_v59 = vrot.slane %v462_v35, 4 }
 0x11b   :  { %v488_v33 = vrot.slane %v458_v31, 4 }
 0x11d   :  { %v503_v36 = vsel %vm299_vm5, %v487_v32, %v488_v33 }
 0x11e   :  { %v505_v38 = vsel %vm504_vm7, %v456_v18, %v503_v36 }
 0x11f   :  { %528 = vst.msk [vmem:[#allocation3 + $0x40] sm:$0xff] %vm5409_vm6, %v505_v38  ;;  %590 = vrot.lane.b32.xlu1 %v547_v39, %s5211_s24  ;;  %479 = vrot.lane.b32.xlu2 %v435_v40, %s5209_s2  ;;  %v539_v39 = vld [vmem:[#allocation2 + $0x18] sm:$0xf] }
 0x120   :  { %588 = vrot.lane.b32.xlu0 %v433_v21, %s5211_s24 }
 0x121   :  { %v342_v44 = vpop.permute.xlu1 %341  ;;  %v686_v47 = vpop.permute.xlu2 %685 }
 0x122   :  { %v682_v41 = vpop.permute.xlu0 %681  ;;  %v373_v48 = vrot.slane %v342_v44, 4  ;;  %v715_v7 = vrot.slane %v686_v47, 4 }
 0x123   :  { %v713_v29 = vrot.slane %v682_v41, 4 }
 0x124   :  { %v390_v50 = vsel %vm299_vm5, %v373_v48, %v374_v45 }
 0x125   :  { %v729_v49 = vsel %vm299_vm5, %v713_v29, %v714_v46  ;;  %v392_v53 = vsel %vm391_vm9, %v342_v44, %v390_v50 }
 0x126   :  { %v731_v52 = vsel %vm730_vm8, %v682_v41, %v729_v49  ;;  %415 = vst.msk [vmem:[#allocation3] sm:$0xff] %vm5409_vm6, %v392_v53  ;;  %v551_v53 = vld [vmem:[#allocation2 + $0x78] sm:$0xf] }
 0x127   :  { %754 = vst.msk [vmem:[#allocation3 + $0xc0] sm:$0xff] %vm5409_vm6, %v731_v52  ;;  %707 = vrot.lane.b32.xlu1 %v662_v55, %s5208_s1  ;;  %367 = vrot.lane.b32.xlu2 %v322_v26, %s5210_s23 }
 0x128   :  { %481 = vrot.lane.b32.xlu0 %v436_v54, %s5209_s2 }
 0x129   :  { %v460_v57 = vpop.permute.xlu1 %459  ;;  %v692_v61 = vpop.permute.xlu2 %691 }
 0x12a   :  { %v571_v56 = vpop.permute.xlu0 %570  ;;  %v489_v63 = vrot.slane %v460_v57, 4  ;;  %v718_v44 = vrot.slane %v692_v61, 4 }
 0x12b   :  { %v601_v60 = vrot.slane %v571_v56, 4 }
 0x12c   :  { %v506_v2 = vsel %vm299_vm5, %v489_v63, %v490_v59 }
 0x12d   :  { %v616_v1 = vsel %vm299_vm5, %v600_v58, %v601_v60  ;;  %v507_v4 = vsel %vm504_vm7, %v460_v57, %v506_v2 }
 0x12e   :  { %v618_v3 = vsel %vm617_vm10, %v569_v25, %v616_v1  ;;  %529 = vst.msk [vmem:[#allocation3 + $0x48] sm:$0xff] %vm5409_vm6, %v507_v4  ;;  %v664_v25 = vld [vmem:[#allocation2 + $0x78] sm:$0xf] }
 0x12f   :  { %641 = vst.msk [vmem:[#allocation3 + $0x80] sm:$0xff] %vm5409_vm6, %v618_v3  ;;  %365 = vrot.lane.b32.xlu1 %v435_v40, %s5210_s23  ;;  %592 = vrot.lane.b32.xlu2 %v435_v40, %s5211_s24 }
 0x130   :  { %705 = vrot.lane.b32.xlu0 %v435_v40, %s5208_s1 }
 0x131   :  { %v348_v6 = vpop.permute.xlu1 %347  ;;  %v350_v10 = vpop.permute.xlu2 %349 }
 0x132   :  { %v688_v5 = vpop.permute.xlu0 %687  ;;  %v376_v19 = vrot.slane %v348_v6, 4  ;;  %v377_v45 = vrot.slane %v350_v10, 4 }
 0x133   :  { %v716_v9 = vrot.slane %v688_v5, 4 }
 0x135   :  { %v732_v12 = vsel %vm299_vm5, %v715_v7, %v716_v9 }
 0x136   :  { %v733_v13 = vsel %vm730_vm8, %v686_v47, %v732_v12 }
 0x137   :  { %755 = vst.msk [vmem:[#allocation3 + $0xc8] sm:$0xff] %vm5409_vm6, %v733_v13  ;;  %483 = vrot.lane.b32.xlu1 %v437_v15, %s5209_s2  ;;  %485 = vrot.lane.b32.xlu2 %v438_v16, %s5209_s2 }
 0x138   :  { %594 = vrot.lane.b32.xlu0 %v549_v14, %s5211_s24 }
 0x139   :  { %v5572_v18 = vpop.permute.xlu1 %572  ;;  %v468_v21 = vpop.permute.xlu2 %467 }
 0x13a   :  { %v346_v17 = vpop.permute.xlu0 %345  ;;  %v493_v63 = vrot.slane %v468_v21, 4 }
 0x13b   :  { %v375_v20 = vrot.slane %v346_v17, 4 }
 0x13d   :  { %v393_v22 = vsel %vm299_vm5, %v375_v20, %v376_v19 }
 0x13e   :  { %v394_v23 = vsel %vm391_vm9, %v346_v17, %v393_v22 }
 0x13f   :  { %416 = vst.msk [vmem:[#allocation3 + $0x8] sm:$0xff] %vm5409_vm6, %v394_v23  ;;  %371 = vrot.lane.b32.xlu1 %v324_v30, %s5210_s23  ;;  %709 = vrot.lane.b32.xlu2 %v437_v15, %s5208_s1 }
 0x140   :  { %711 = vrot.lane.b32.xlu0 %v664_v25, %s5208_s1 }
 0x141   :  { %v466_v31 = vpop.permute.xlu1 %465  ;;  %v356_v33 = vpop.permute.xlu2 %355 }
 0x142   :  { %v464_v27 = vpop.permute.xlu0 %463  ;;  %v492_v35 = vrot.slane %v466_v31, 4  ;;  %v380_v7 = vrot.slane %v356_v33, 4 }
 0x143   :  { %v491_v32 = vrot.slane %v464_v27, 4 }
 0x145   :  { %v508_v36 = vsel %vm299_vm5, %v491_v32, %v492_v35 }
 0x146   :  { %v509_v38 = vsel %vm504_vm7, %v464_v27, %v508_v36 }
 0x147   :  { %530 = vst.msk [vmem:[#allocation3 + $0x50] sm:$0xff] %vm5409_vm6, %v509_v38  ;;  %596 = vrot.lane.b32.xlu1 %v437_v15, %s5211_s24  ;;  %574 = vrot.lane.b32.xlu2 %v539_v39, %s5211_s24 }
 0x148   :  { %369 = vrot.lane.b32.xlu0 %v437_v15, %s5210_s23 }
 0x149   :  { %v690_v41 = vpop.permute.xlu1 %689  ;;  %v581_v29 = vpop.permute.xlu2 %580 }
 0x14a   :  { %v352_v40 = vpop.permute.xlu0 %351  ;;  %v717_v47 = vrot.slane %v690_v41, 4 }
 0x14b   :  { %v378_v46 = vrot.slane %v352_v40, 4 }
 0x14c   :  { %v734_v49 = vsel %vm299_vm5, %v717_v47, %v718_v44 }
 0x14d   :  { %v395_v48 = vsel %vm299_vm5, %v377_v45, %v378_v46  ;;  %v735_v52 = vsel %vm730_vm8, %v690_v41, %v734_v49 }
 0x14e   :  { %v396_v50 = vsel %vm391_vm9, %v350_v10, %v395_v48  ;;  %756 = vst.msk [vmem:[#allocation3 + $0xd0] sm:$0xff] %vm5409_vm6, %v735_v52 }
 0x14f   :  { %417 = vst.msk [vmem:[#allocation3 + $0x10] sm:$0xff] %vm5409_vm6, %v396_v50  ;;  %802 = vrot.lane.b32.xlu1 %v5475_v51, %s5212_s25  ;;  %598 = vrot.lane.b32.xlu2 %v551_v53, %s5211_s24 }
 0x150   :  { %806 = vrot.lane.b32.xlu0 %v5501_v28, %s5212_s25 }
 0x151   :  { %v579_v55 = vpop.permute.xlu1 %578  ;;  %v474_v56 = vpop.permute.xlu2 %473 }
 0x152   :  { %v577_v54 = vpop.permute.xlu0 %576  ;;  %v605_v57 = vrot.slane %v579_v55, 4  ;;  %v496_v22 = vrot.slane %v474_v56, 4 }
 0x153   :  { %v604_v26 = vrot.slane %v577_v54, 4 }
 0x155   :  { %v621_v58 = vsel %vm299_vm5, %v604_v26, %v605_v57 }
 0x156   :  { %v622_v59 = vsel %vm617_vm10, %v577_v54, %v621_v58 }
 0x157   :  { %643 = vst.msk [vmem:[#allocation3 + $0x90] sm:$0xff] %vm5409_vm6, %v622_v59  ;;  %934 = vrot.lane.b32.xlu1 %v5490_v0, %s5213_s26  ;;  %936 = vrot.lane.b32.xlu2 %v5501_v28, %s5213_s26 }
 0x158   :  { %932 = vrot.lane.b32.xlu0 %v5475_v51, %s5213_s26 }
 0x159   :  { %v696_v61 = vpop.permute.xlu1 %695  ;;  %v698_v2 = vpop.permute.xlu2 %697 }
 0x15a   :  { %v470_v60 = vpop.permute.xlu0 %469  ;;  %v720_v9 = vrot.slane %v696_v61, 4  ;;  %v721_v38 = vrot.slane %v698_v2, 4 }
 0x15b   :  { %v494_v1 = vrot.slane %v470_v60, 4 }
 0x15d   :  { %v510_v3 = vsel %vm299_vm5, %v493_v63, %v494_v1 }
 0x15e   :  { %v511_v4 = vsel %vm504_vm7, %v468_v21, %v510_v3  ;;  %v606_v21 = vrot.slane %v581_v29, 4 }
 0x15f   :  { %531 = vst.msk [vmem:[#allocation3 + $0x58] sm:$0xff] %vm5409_vm6, %v511_v4  ;;  %808 = vrot.lane.b32.xlu1 %v5509_v8, %s5212_s25  ;;  %804 = vrot.lane.b32.xlu2 %v5490_v0, %s5212_s25 }
 0x160   :  { %938 = vrot.lane.b32.xlu0 %v5509_v8, %s5213_s26 }
 0x161   :  { %v354_v6 = vpop.permute.xlu1 %353  ;;  %v587_v12 = vpop.permute.xlu2 %586 }
 0x162   :  { %v694_v5 = vpop.permute.xlu0 %693  ;;  %v379_v13 = vrot.slane %v354_v6, 4 }
 0x163   :  { %v719_v10 = vrot.slane %v694_v5, 4 }
 0x164   :  { %v397_v15 = vsel %vm299_vm5, %v379_v13, %v380_v7 }
 0x165   :  { %v736_v14 = vsel %vm299_vm5, %v719_v10, %v720_v9  ;;  %v398_v17 = vsel %vm391_vm9, %v354_v6, %v397_v15 }
 0x166   :  { %v737_v16 = vsel %vm730_vm8, %v694_v5, %v736_v14  ;;  %418 = vst.msk [vmem:[#allocation3 + $0x18] sm:$0xff] %vm5409_vm6, %v398_v17 }
 0x167   :  { %757 = vst.msk [vmem:[#allocation3 + $0xd8] sm:$0xff] %vm5409_vm6, %v737_v16  ;;  %928 = vrot.lane.b32.xlu1 %v5447_v24, %s5213_s26  ;;  %798 = vrot.lane.b32.xlu2 %v5447_v24, %s5212_s25 }
 0x168   :  { %800 = vrot.lane.b32.xlu0 %v5461_v43, %s5212_s25 }
 0x169   :  { %v472_v20 = vpop.permute.xlu1 %471  ;;  %v704_v25 = vpop.permute.xlu2 %703 }
 0x16a   :  { %v583_v19 = vpop.permute.xlu0 %582  ;;  %v495_v30 = vrot.slane %v472_v20, 4  ;;  %v724_v63 = vrot.slane %v704_v25, 4 }
 0x16b   :  { %v607_v23 = vrot.slane %v583_v19, 4 }
 0x16c   :  { %v512_v31 = vsel %vm299_vm5, %v495_v30, %v496_v22 }
 0x16d   :  { %v623_v27 = vsel %vm299_vm5, %v606_v21, %v607_v23  ;;  %v513_v33 = vsel %vm504_vm7, %v472_v20, %v512_v31 }
 0x16e   :  { %v624_v32 = vsel %vm617_vm10, %v581_v29, %v623_v27  ;;  %532 = vst.msk [vmem:[#allocation3 + $0x60] sm:$0xff] %vm5409_vm6, %v513_v33  ;;  %v609_v29 = vrot.slane %v587_v12, 4  ;;  %v602_v33 = vrot.slane %v5572_v18, 4 }
 0x16f   :  { %644 = vst.msk [vmem:[#allocation3 + $0x98] sm:$0xff] %vm5409_vm6, %v624_v32  ;;  %796 = vrot.lane.b32.xlu1 %v5433_v11, %s5212_s25  ;;  %930 = vrot.lane.b32.xlu2 %v5461_v43, %s5213_s26 }
 0x170   :  { %794 = vrot.lane.b32.xlu0 %v5421_v62, %s5212_s25 }
 0x171   :  { %v360_v36 = vpop.permute.xlu1 %359  ;;  %v362_v40 = vpop.permute.xlu2 %361 }
 0x172   :  { %v700_v35 = vpop.permute.xlu0 %699  ;;  %v382_v47 = vrot.slane %v360_v36, 4  ;;  %v383_v1 = vrot.slane %v362_v40, 4 }
 0x173   :  { %v722_v39 = vrot.slane %v700_v35, 4 }
 0x175   :  { %v738_v41 = vsel %vm299_vm5, %v721_v38, %v722_v39  ;;  %v1141_v38 = vld [vmem:[%s7102_s5 + $0x38] sm:$0xff] }
 0x176   :  { %v739_v44 = vsel %vm730_vm8, %v698_v2, %v738_v41 }
 0x177   :  { %758 = vst.msk [vmem:[#allocation3 + $0xe0] sm:$0xff] %vm5409_vm6, %v739_v44  ;;  %1001 = vrot.lane.b32.xlu1 %v5501_v28, %s5214_s27  ;;  %924 = vrot.lane.b32.xlu2 %v5421_v62, %s5213_s26  ;;  %v1140_v44 = vld [vmem:[%s7102_s5 + $0x30] sm:$0xff] }
 0x178   :  { %926 = vrot.lane.b32.xlu0 %v5433_v11, %s5213_s26 }
 0x179   :  { %v585_v46 = vpop.permute.xlu1 %584  ;;  %v480_v49 = vpop.permute.xlu2 %479 }
 0x17a   :  { %v358_v45 = vpop.permute.xlu0 %357  ;;  %v608_v50 = vrot.slane %v585_v46, 4  ;;  %v499_v19 = vrot.slane %v480_v49, 4 }
 0x17b   :  { %v381_v48 = vrot.slane %v358_v45, 4 }
 0x17c   :  { %v625_v53 = vsel %vm299_vm5, %v608_v50, %v609_v29 }
 0x17d   :  { %v399_v52 = vsel %vm299_vm5, %v381_v48, %v382_v47  ;;  %v626_v55 = vsel %vm617_vm10, %v585_v46, %v625_v53 }
 0x17e   :  { %v400_v54 = vsel %vm391_vm9, %v358_v45, %v399_v52  ;;  %645 = vst.msk [vmem:[#allocation3 + $0xa0] sm:$0xff] %vm5409_vm6, %v626_v55  ;;  %v1137_v55 = vld [vmem:[%s7102_s5 + $0x18] sm:$0xff] }
 0x17f   :  { %419 = vst.msk [vmem:[#allocation3 + $0x20] sm:$0xff] %vm5409_vm6, %v400_v54  ;;  %873 = vrot.lane.b32.xlu1 %v5509_v8, %s5215_s28  ;;  %1003 = vrot.lane.b32.xlu2 %v5509_v8, %s5214_s27  ;;  %v1136_v54 = vld [vmem:[%s7102_s5 + $0x10] sm:$0xff] }
 0x180   :  { %871 = vrot.lane.b32.xlu0 %v5501_v28, %s5215_s28 }
 0x181   :  { %v478_v56 = vpop.permute.xlu1 %477  ;;  %v368_v58 = vpop.permute.xlu2 %367 }
 0x182   :  { %v476_v26 = vpop.permute.xlu0 %475  ;;  %v498_v59 = vrot.slane %v478_v56, 4  ;;  %v386_v25 = vrot.slane %v368_v58, 4 }
 0x183   :  { %v497_v57 = vrot.slane %v476_v26, 4 }
 0x185   :  { %v514_v60 = vsel %vm299_vm5, %v497_v57, %v498_v59  ;;  %v1139_v57 = vld [vmem:[%s7102_s5 + $0x28] sm:$0xff] }
 0x186   :  { %v515_v61 = vsel %vm504_vm7, %v476_v26, %v514_v60 }
 0x187   :  { %533 = vst.msk [vmem:[#allocation3 + $0x68] sm:$0xff] %vm5409_vm6, %v515_v61  ;;  %867 = vrot.lane.b32.xlu1 %v5475_v51, %s5215_s28  ;;  %997 = vrot.lane.b32.xlu2 %v5475_v51, %s5214_s27 }
 0x188   :  { %999 = vrot.lane.b32.xlu0 %v5490_v0, %s5214_s27 }
 0x189   :  { %v702_v8 = vpop.permute.xlu1 %701  ;;  %v5683_v3 = vpop.permute.xlu2 %592 }
 0x18a   :  { %v364_v28 = vpop.permute.xlu0 %363  ;;  %v723_v4 = vrot.slane %v702_v8, 4  ;;  %v612_v47 = vrot.slane %v5683_v3, 4 }
 0x18b   :  { %v384_v2 = vrot.slane %v364_v28, 4 }
 0x18c   :  { %v740_v6 = vsel %vm299_vm5, %v723_v4, %v724_v63  ;;  %v1134_v4 = vld [vmem:[%s7102_s5] sm:$0xff] }
 0x18d   :  { %v401_v5 = vsel %vm299_vm5, %v383_v1, %v384_v2  ;;  %v741_v9 = vsel %vm730_vm8, %v702_v8, %v740_v6  ;;  %v1135_v1 = vld [vmem:[%s7102_s5 + $0x8] sm:$0xff] }
 0x18e   :  { %v402_v7 = vsel %vm391_vm9, %v362_v40, %v401_v5  ;;  %759 = vst.msk [vmem:[#allocation3 + $0xe8] sm:$0xff] %vm5409_vm6, %v741_v9  ;;  %v5011_v9 = vld [vmem:[#allocation3 + $0x64] sm:$0xf0] }
 0x18f   :  { %420 = vst.msk [vmem:[#allocation3 + $0x28] sm:$0xff] %vm5409_vm6, %v402_v7  ;;  %995 = vrot.lane.b32.xlu1 %v5461_v43, %s5214_s27  ;;  %869 = vrot.lane.b32.xlu2 %v5490_v0, %s5215_s28 }
 0x190   :  { %993 = vrot.lane.b32.xlu0 %v5447_v24, %s5214_s27 }
 0x191   :  { %v591_v10 = vpop.permute.xlu1 %590  ;;  %v486_v13 = vpop.permute.xlu2 %485 }
 0x192   :  { %v589_v51 = vpop.permute.xlu0 %588  ;;  %v611_v14 = vrot.slane %v591_v10, 4  ;;  %v502_v48 = vrot.slane %v486_v13, 4 }
 0x193   :  { %v610_v12 = vrot.slane %v589_v51, 4 }
 0x195   :  { %v627_v15 = vsel %vm299_vm5, %v610_v12, %v611_v14 }
 0x196   :  { %v628_v16 = vsel %vm617_vm10, %v589_v51, %v627_v15 }
 0x197   :  { %646 = vst.msk [vmem:[#allocation3 + $0xa8] sm:$0xff] %vm5409_vm6, %v628_v16  ;;  %989 = vrot.lane.b32.xlu1 %v5421_v62, %s5214_s27  ;;  %863 = vrot.lane.b32.xlu2 %v5447_v24, %s5215_s28 }
 0x198   :  { %865 = vrot.lane.b32.xlu0 %v5461_v43, %s5215_s28 }
 0x199   :  { %v708_v17 = vpop.permute.xlu1 %707  ;;  %v710_v21 = vpop.permute.xlu2 %709 }
 0x19a   :  { %v482_v0 = vpop.permute.xlu0 %481  ;;  %v726_v30 = vrot.slane %v708_v17, 4  ;;  %v727_v60 = vrot.slane %v710_v21, 4 }
 0x19b   :  { %v500_v20 = vrot.slane %v482_v0, 4  ;;  %v4274_v0 = vld [vmem:[#allocation3 + $0x60] sm:$0xf] }
 0x19d   :  { %v516_v22 = vsel %vm299_vm5, %v499_v19, %v500_v20  ;;  %v4275_v19 = vor.u32 %v5011_v9, %v4274_v0  ;;  %v4234_v9 = vld [vmem:[#allocation3 + $0x10] sm:$0xf]  ;;  %v4146_v0 = vld [vmem:[%s7103_s4] sm:$0xf] }
 0x19e   :  { %v517_v23 = vsel %vm504_vm7, %v480_v49, %v516_v22  ;;  %v5009_v22 = vld [vmem:[#allocation3 + $0x54] sm:$0xf0] }
 0x19f   :  { %534 = vst.msk [vmem:[#allocation3 + $0x70] sm:$0xff] %vm5409_vm6, %v517_v23  ;;  %861 = vrot.lane.b32.xlu1 %v5433_v11, %s5215_s28  ;;  %991 = vrot.lane.b32.xlu2 %v5433_v11, %s5214_s27  ;;  %v1138_v11 = vld [vmem:[%s7102_s5 + $0x20] sm:$0xff] }
 0x1a0   :  { %859 = vrot.lane.b32.xlu0 %v5421_v62, %s5215_s28 }
 0x1a1   :  { %v366_v43 = vpop.permute.xlu1 %365  ;;  %v575_v31 = vpop.permute.xlu2 %574 }
 0x1a2   :  { %v706_v24 = vpop.permute.xlu0 %705  ;;  %v385_v32 = vrot.slane %v366_v43, 4  ;;  %v603_v35 = vrot.slane %v575_v31, 4 }
 0x1a3   :  { %v725_v27 = vrot.slane %v706_v24, 4 }
 0x1a4   :  { %v403_v62 = vsel %vm299_vm5, %v385_v32, %v386_v25  ;;  %v619_v40 = vsel %vm299_vm5, %v602_v33, %v603_v35  ;;  %v5027_v33 = vld [vmem:[#allocation3 + $0xe4] sm:$0xf0] }
 0x1a5   :  { %v742_v36 = vsel %vm299_vm5, %v725_v27, %v726_v30  ;;  %v404_v41 = vsel %vm391_vm9, %v366_v43, %v403_v62  ;;  %v620_v45 = vsel %vm617_vm10, %v5572_v18, %v619_v40  ;;  %v4266_v27 = vld [vmem:[#allocation3 + $0x50] sm:$0xf]  ;;  %v5007_v35 = vld [vmem:[#allocation3 + $0x44] sm:$0xf0] }
 0x1a6   :  { %v743_v39 = vsel %vm730_vm8, %v706_v24, %v742_v36  ;;  %642 = vst.msk [vmem:[#allocation3 + $0x88] sm:$0xff] %vm5409_vm6, %v620_v45  ;;  %v4282_v5 = vld [vmem:[#allocation3 + $0x70] sm:$0xf]  ;;  %v4267_v32 = vor.u32 %v5009_v22, %v4266_v27  ;;  %v4226_v22 = vld [vmem:[#allocation3] sm:$0xf] }
 0x1a7   :  { %760 = vst.msk [vmem:[#allocation3 + $0xf0] sm:$0xff] %vm5409_vm6, %v743_v39  ;;  %1164 = vperm.xlu1 %5199, %v1138_v11   ;;  %1174 = vperm.xlu2 %5200, %v1140_v44  }
 0x1a8   :  { %1179 = vperm.xlu0 %5198, %v1141_v38   ;;  %421 = vst.msk [vmem:[#allocation3 + $0x30] sm:$0xff] %vm5409_vm6, %v404_v41  ;;  %v4338_v38 = vld [vmem:[#allocation3 + $0xe0] sm:$0xf] }
 0x1a9   :  { %v484_v29 = vpop.permute.xlu1 %483  ;;  %v599_v50 = vpop.permute.xlu2 %598  ;;  %v4258_v41 = vld [vmem:[#allocation3 + $0x40] sm:$0xf]  ;;  %v4339_v44 = vor.u32 %v5027_v33, %v4338_v38  ;;  %v4298_v33 = vld [vmem:[#allocation3 + $0x90] sm:$0xf]  ;;  %v4978_v38 = vld [vmem:[%s7103_s4 + $0x4] sm:$0xf] }
 0x1aa   :  { %v595_v46 = vpop.permute.xlu0 %594  ;;  %v501_v52 = vrot.slane %v484_v29, 4  ;;  %v615_v12 = vrot.slane %v599_v50, 4 }
 0x1ab   :  { %v613_v49 = vrot.slane %v595_v46, 4  ;;  %v4259_v46 = vor.u32 %v5007_v35, %v4258_v41  ;;  %v4290_v41 = vld [vmem:[#allocation3 + $0x80] sm:$0xf] }
 0x1ac   :  { %v518_v18 = vsel %vm299_vm5, %v501_v52, %v502_v48 }
 0x1ad   :  { %v629_v53 = vsel %vm299_vm5, %v612_v47, %v613_v49  ;;  %v519_v56 = vsel %vm504_vm7, %v484_v29, %v518_v18  ;;  %v5025_v29 = vld [vmem:[#allocation3 + $0xd4] sm:$0xf0]  ;;  %v4330_v49 = vld [vmem:[#allocation3 + $0xd0] sm:$0xf] }
 0x1ae   :  { %v630_v26 = vsel %vm617_vm10, %v5683_v3, %v629_v53  ;;  %535 = vst.msk [vmem:[#allocation3 + $0x78] sm:$0xff] %vm5409_vm6, %v519_v56  ;;  %v4346_v25 = vld [vmem:[#allocation3 + $0xf0] sm:$0xf] }
 0x1af   :  { %647 = vst.msk [vmem:[#allocation3 + $0xb0] sm:$0xff] %vm5409_vm6, %v630_v26  ;;  %1159 = vperm.xlu1 %5199, %v1137_v55   ;;  %1169 = vperm.xlu2 %5200, %v1139_v57   ;;  %v4250_v52 = vld [vmem:[#allocation3 + $0x30] sm:$0xf]  ;;  %v5023_v55 = vld [vmem:[#allocation3 + $0xc4] sm:$0xf0] }
 0x1b0   :  { %1154 = vperm.xlu0 %5198, %v1136_v54   ;;  %v4331_v54 = vor.u32 %v5025_v29, %v4330_v49  ;;  %v5003_v26 = vld [vmem:[#allocation3 + $0x24] sm:$0xf0] }
 0x1b1   :  { %v372_v59 = vpop.permute.xlu1 %371  ;;  %v937_v28 = vpop.permute.xlu2 %936 }
 0x1b2   :  { %v712_v58 = vpop.permute.xlu0 %711  ;;  %v946_v8 = vrot.slane %v937_v28, 4  ;;  %v388_v13 = vrot.slane %v372_v59, 4 }
 0x1b3   :  { %v728_v61 = vrot.slane %v712_v58, 4  ;;  %v4322_v58 = vld [vmem:[#allocation3 + $0xc0] sm:$0xf] }
 0x1b4   :  { %v955_v3 = vsel %vm948_vm11, %v937_v28, %v946_v8  ;;  %v4242_v28 = vld [vmem:[#allocation3 + $0x20] sm:$0xf]  ;;  %v4323_v8 = vor.u32 %v5023_v55, %v4322_v58  ;;  %v5010_v55 = vld [vmem:[#allocation3 + $0x64] sm:$0xf] }
 0x1b5   :  { %v744_v63 = vsel %vm299_vm5, %v727_v60, %v728_v61  ;;  %v5013_v6 = vld [vmem:[#allocation3 + $0x74] sm:$0xf0]  ;;  %971 = vst.msk [vmem:[#allocation3 + $0x1f0] sm:$0xff] %vm5409_vm6, %v955_v3 }
 0x1b6   :  { %v745_v2 = vsel %vm730_vm8, %v710_v21, %v744_v63  ;;  %v4283_v7 = vor.u32 %v5013_v6, %v4282_v5  ;;  %v5001_v5 = vld [vmem:[#allocation3 + $0x14] sm:$0xf0] }
 0x1b7   :  { %761 = vst.msk [vmem:[#allocation3 + $0xf8] sm:$0xff] %vm5409_vm6, %v745_v2  ;;  %1144 = vperm.xlu2 %5200, %v1134_v4  }
 0x1b8   :  { %1149 = vperm.xlu0 %5198, %v1135_v1   ;;  %1655 = vmatpush.bf16.msrb.mxu2 %v4283_v7  ;;  %v4243_v1 = vor.u32 %v5003_v26, %v4242_v28  ;;  %v4314_v7 = vld [vmem:[#allocation3 + $0xb0] sm:$0xf]  ;;  %v4276_v26 = vld [vmem:[#allocation3 + $0x68] sm:$0xf0] }
 0x1b9   :  { %v597_v10 = vpop.permute.xlu1 %596  ;;  %v805_v15 = vpop.permute.xlu2 %804 }
 0x1ba   :  { %v370_v51 = vpop.permute.xlu0 %369  ;;  %v614_v16 = vrot.slane %v597_v10, 4  ;;  %v815_v17 = vrot.slane %v805_v15, 4 }
 0x1bb   :  { %v387_v14 = vrot.slane %v370_v51, 4 }
 0x1bc   :  { %v631_v21 = vsel %vm299_vm5, %v614_v16, %v615_v12  ;;  %v824_v24 = vsel %vm818_vm12, %v805_v15, %v815_v17  ;;  %1656 = vmatpush.bf16.msrb.mxu2 %v4275_v19  ;;  %v5019_v12 = vld [vmem:[#allocation3 + $0xa4] sm:$0xf0]  ;;  %v4306_v16 = vld [vmem:[#allocation3 + $0xa0] sm:$0xf]  ;;  %v4980_v17 = vld [vmem:[%s7103_s4 + $0x10] sm:$0xf0] }
 0x1bd   :  { %v405_v20 = vsel %vm299_vm5, %v387_v14, %v388_v13  ;;  %v632_v43 = vsel %vm617_vm10, %v597_v10, %v631_v21  ;;  %840 = vst.msk [vmem:[#allocation3 + $0x168] sm:$0xff] %vm5409_vm6, %v824_v24  ;;  %v4235_v10 = vor.u32 %v5001_v5, %v4234_v9  ;;  %v4999_v13 = vld [vmem:[#allocation3 + $0x4] sm:$0xf0] }
 0x1be   :  { %v406_v23 = vsel %vm391_vm9, %v370_v51, %v405_v20  ;;  %v5029_v30 = vld [vmem:[#allocation3 + $0xf4] sm:$0xf0]  ;;  %648 = vst.msk [vmem:[#allocation3 + $0xb8] sm:$0xff] %vm5409_vm6, %v632_v43  ;;  %v4227_v43 = vor.u32 %v4999_v13, %v4226_v22  ;;  %v4166_v5 = vld [vmem:[%s7103_s4 + $0x28] sm:$0xf] }
 0x1bf   :  { %422 = vst.msk [vmem:[#allocation3 + $0x38] sm:$0xff] %vm5409_vm6, %v406_v23  ;;  %v4347_v31 = vor.u32 %v5029_v30, %v4346_v25  ;;  %v4307_v23 = vor.u32 %v5019_v12, %v4306_v16  ;;  %v5017_v25 = vld [vmem:[#allocation3 + $0x94] sm:$0xf0]  ;;  %v5008_v12 = vld [vmem:[#allocation3 + $0x54] sm:$0xf] }
 0x1c0   :  { %1657 = vmatpush.bf16.msrb.mxu2 %v4267_v32  ;;  %v4299_v35 = vor.u32 %v5017_v25, %v4298_v33  ;;  %v4168_v33 = vld [vmem:[%s7103_s4 + $0x3c] sm:$0xf0] }
 0x1c1   :  { %1684 = vmatpush.bf16.msra.mxu3 %v4347_v31  ;;  %v803_v62 = vpop.permute.xlu1 %802  ;;  %v799_v39 = vpop.permute.xlu2 %798  ;;  %v5811_v31 = vor.u32 %v4980_v17, %v4146_v0 }
 0x1c2   :  { %v807_v36 = vpop.permute.xlu0 %806  ;;  %v814_v40 = vrot.slane %v803_v62, 4  ;;  %v812_v45 = vrot.slane %v799_v39, 4 }
 0x1c3   :  { %v816_v11 = vrot.slane %v807_v36, 4 }
 0x1c4   :  { %v823_v48 = vsel %vm818_vm12, %v803_v62, %v814_v40  ;;  %v821_v50 = vsel %vm818_vm12, %v799_v39, %v812_v45  ;;  %1658 = vmatpush.bf16.msrb.mxu2 %v4259_v46  ;;  %v4284_v62 = vld [vmem:[#allocation3 + $0x78] sm:$0xf0] }
 0x1c5   :  { %v825_v47 = vsel %vm818_vm12, %v807_v36, %v816_v11  ;;  %1685 = vmatpush.bf16.msra.mxu3 %v4339_v44  ;;  %837 = vst.msk [vmem:[#allocation3 + $0x150] sm:$0xff] %vm5409_vm6, %v821_v50  ;;  %v5021_v2 = vld [vmem:[#allocation3 + $0xb4] sm:$0xf0]  ;;  %v5015_v36 = vld [vmem:[#allocation3 + $0x84] sm:$0xf0] }
 0x1c6   :  { %841 = vst.msk [vmem:[#allocation3 + $0x170] sm:$0xff] %vm5409_vm6, %v825_v47  ;;  %v5005_v53 = vld [vmem:[#allocation3 + $0x34] sm:$0xf0]  ;;  %v4315_v51 = vor.u32 %v5021_v2, %v4314_v7  ;;  %v4291_v29 = vor.u32 %v5015_v36, %v4290_v41  ;;  %v5012_v47 = vld [vmem:[#allocation3 + $0x74] sm:$0xf] }
 0x1c7   :  { %v4251_v18 = vor.u32 %v5005_v53, %v4250_v52  ;;  %839 = vst.msk [vmem:[#allocation3 + $0x160] sm:$0xff] %vm5409_vm6, %v823_v48  ;;  %v4148_v11 = vld [vmem:[%s7103_s4 + $0x14] sm:$0xf0]  ;;  %v4287_v49 = vor.u32 %v5012_v47, %v4284_v62  ;;  %v4252_v62 = vld [vmem:[#allocation3 + $0x38] sm:$0xf0] }
 0x1c8   :  { %v5827_v50 = vor.u32 %v4978_v38, %v4148_v11  ;;  %v5004_v41 = vld [vmem:[#allocation3 + $0x34] sm:$0xf] }
 0x1c9   :  { %1686 = vmatpush.bf16.msra.mxu3 %v4331_v54  ;;  %1659 = vmatpush.bf16.msrb.mxu2 %v4251_v18  ;;  %v935_v57 = vpop.permute.xlu1 %934  ;;  %v931_v60 = vpop.permute.xlu2 %930  ;;  %v4474_v18 = vld [vmem:[#allocation3 + $0x1f0] sm:$0xf] }
 0x1ca   :  { %v933_v56 = vpop.permute.xlu0 %932  ;;  %v945_v61 = vrot.slane %v935_v57, 4  ;;  %v943_v63 = vrot.slane %v931_v60, 4 }
 0x1cb   :  { %v944_v59 = vrot.slane %v933_v56, 4 }
 0x1cc   :  { %v954_v4 = vsel %vm948_vm11, %v935_v57, %v945_v61  ;;  %v952_v6 = vsel %vm948_vm11, %v931_v60, %v943_v63 }
 0x1cd   :  { %v953_v3 = vsel %vm948_vm11, %v933_v56, %v944_v59  ;;  %1687 = vmatpush.bf16.msra.mxu3 %v4323_v8  ;;  %1660 = vmatpush.bf16.msrb.mxu2 %v4243_v1  ;;  %968 = vst.msk [vmem:[#allocation3 + $0x1d8] sm:$0xff] %vm5409_vm6, %v952_v6  ;;  %v4410_v57 = vld [vmem:[#allocation3 + $0x170] sm:$0xf]  ;;  %v4279_v8 = vor.u32 %v5010_v55, %v4276_v26  ;;  %v4268_v1 = vld [vmem:[#allocation3 + $0x58] sm:$0xf0] }
 0x1ce   :  { %969 = vst.msk [vmem:[#allocation3 + $0x1e0] sm:$0xff] %vm5409_vm6, %v953_v3  ;;  %v4402_v63 = vld [vmem:[#allocation3 + $0x160] sm:$0xf]  ;;  %v4985_v6 = vld [vmem:[%s7103_s4 + $0x38] sm:$0xf0] }
 0x1cf   :  { %970 = vst.msk [vmem:[#allocation3 + $0x1e8] sm:$0xff] %vm5409_vm6, %v954_v4  ;;  %v5847_v17 = vor.u32 %v4985_v6, %v4166_v5  ;;  %v5037_v55 = vld [vmem:[#allocation3 + $0x134] sm:$0xf0] }
 0x1d1   :  { %1688 = vmatpush.bf16.msra.mxu3 %v4315_v51  ;;  %1661 = vmatpush.bf16.msrb.mxu2 %v4235_v10  ;;  %v809_v15 = vpop.permute.xlu1 %808  ;;  %v925_v20 = vpop.permute.xlu2 %924  ;;  %v5043_v10 = vld [vmem:[#allocation3 + $0x164] sm:$0xf0] }
 0x1d2   :  { %v939_v14 = vpop.permute.xlu0 %938  ;;  %v817_v21 = vrot.slane %v809_v15, 4  ;;  %v940_v24 = vrot.slane %v925_v20, 4 }
 0x1d3   :  { %v947_v19 = vrot.slane %v939_v14, 4 }
 0x1d4   :  { %v826_v27 = vsel %vm818_vm12, %v809_v15, %v817_v21  ;;  %v949_v32 = vsel %vm948_vm11, %v925_v20, %v940_v24  ;;  %v4271_v15 = vor.u32 %v5008_v12, %v4268_v1 }
 0x1d5   :  { %v956_v30 = vsel %vm948_vm11, %v939_v14, %v947_v19  ;;  %1689 = vmatpush.bf16.msra.mxu3 %v4307_v23  ;;  %1662 = vmatpush.bf16.msrb.mxu2 %v4227_v43  ;;  %965 = vst.msk [vmem:[#allocation3 + $0x1c0] sm:$0xff] %vm5409_vm6, %v949_v32  ;;  %v4466_v59 = vld [vmem:[#allocation3 + $0x1e0] sm:$0xf]  ;;  %v4403_v14 = vor.u32 %v5043_v10, %v4402_v63  ;;  %v4394_v19 = vld [vmem:[#allocation3 + $0x150] sm:$0xf] }
 0x1d6   :  { %972 = vst.msk [vmem:[#allocation3 + $0x1f8] sm:$0xff] %vm5409_vm6, %v956_v30  ;;  %v5059_v61 = vld [vmem:[#allocation3 + $0x1e4] sm:$0xf0]  ;;  %v4260_v23 = vld [vmem:[#allocation3 + $0x48] sm:$0xf0] }
 0x1d7   :  { %842 = vst.msk [vmem:[#allocation3 + $0x178] sm:$0xff] %vm5409_vm6, %v826_v27  ;;  %v4467_v4 = vor.u32 %v5059_v61, %v4466_v59  ;;  %v5057_v43 = vld [vmem:[#allocation3 + $0x1d4] sm:$0xf0]  ;;  %v5006_v30 = vld [vmem:[#allocation3 + $0x44] sm:$0xf] }
 0x1d8   :  { %1663 = vmatmul.bf16.vlgmr.msrb.gmra.mxu2 %v5811_v31  ;;  %v4263_v27 = vor.u32 %v5006_v30, %v4260_v23  ;;  %v4983_v32 = vld [vmem:[%s7103_s4 + $0x2c] sm:$0xf]  ;;  %v4990_v59 = vld [vmem:[%s7103_s4 + $0x60] sm:$0xf0]  ;;  %v5033_v23 = vld [vmem:[#allocation3 + $0x114] sm:$0xf0] }
 0x1d9   :  { %1690 = vmatpush.bf16.msra.mxu3 %v4299_v35  ;;  %v929_v40 = vpop.permute.xlu1 %928  ;;  %v1004_v45 = vpop.permute.xlu2 %1003  ;;  %v4188_v30 = vld [vmem:[%s7103_s4 + $0x64] sm:$0xf0] }
 0x1da   :  { %v801_v39 = vpop.permute.xlu0 %800  ;;  %v942_v46 = vrot.slane %v929_v40, 4  ;;  %v1012_v48 = vrot.slane %v1004_v45, 4 }
 0x1db   :  { %v813_v44 = vrot.slane %v801_v39, 4 }
 0x1dc   :  { %v951_v53 = vsel %vm948_vm11, %v929_v40, %v942_v46  ;;  %v1021_v56 = vsel %vm1013_vm13, %v1004_v45, %v1012_v48 }
 0x1dd   :  { %v822_v52 = vsel %vm818_vm12, %v801_v39, %v813_v44  ;;  %1691 = vmatpush.bf16.msra.mxu3 %v4291_v29  ;;  %v5061_v54 = vld [vmem:[#allocation3 + $0x1f4] sm:$0xf0]  ;;  %1037 = vst.msk [vmem:[#allocation3 + $0x238] sm:$0xff] %vm5409_vm6, %v1021_v56  ;;  %v5863_v44 = vor.u32 %v4983_v32, %v4168_v33  ;;  %v4255_v29 = vor.u32 %v5004_v41, %v4252_v62 }
 0x1de   :  { %838 = vst.msk [vmem:[#allocation3 + $0x158] sm:$0xff] %vm5409_vm6, %v822_v52  ;;  %v4475_v58 = vor.u32 %v5061_v54, %v4474_v18  ;;  %v5045_v60 = vld [vmem:[#allocation3 + $0x174] sm:$0xf0]  ;;  %v5002_v18 = vld [vmem:[#allocation3 + $0x24] sm:$0xf] }
 0x1df   :  { %967 = vst.msk [vmem:[#allocation3 + $0x1d0] sm:$0xff] %vm5409_vm6, %v951_v53  ;;  %v4411_v28 = vor.u32 %v5045_v60, %v4410_v57  ;;  %v4236_v57 = vld [vmem:[#allocation3 + $0x18] sm:$0xf0] }
 0x1e0   :  { %1692 = vmatmul.bf16.vlgmr.msra.gmra.mxu3 %v5827_v50  ;;  %1742 = vmatpush.bf16.msrb.mxu1 %v4475_v58  ;;  %v4186_v58 = vld [vmem:[%s7103_s4 + $0x50] sm:$0xf] }
 0x1e1   :  { %1800 = vmatpush.bf16.msrb.mxu3 %v4287_v49  ;;  %1713 = vmatpush.bf16.msrb.mxu0 %v4411_v28  ;;  %v797_v3 = vpop.permute.xlu1 %796  ;;  %v998_v9 = vpop.permute.xlu2 %997  ;;  %v4244_v49 = vld [vmem:[#allocation3 + $0x28] sm:$0xf0]  ;;  %v5883_v6 = vor.u32 %v4990_v59, %v4186_v58 }
 0x1e2   :  { %v795_v2 = vpop.permute.xlu0 %794  ;;  %v811_v51 = vrot.slane %v797_v3, 4  ;;  %v1009_v13 = vrot.slane %v998_v9, 4  ;;  %v4247_v54 = vor.u32 %v5002_v18, %v4244_v49  ;;  %v4981_v49 = vld [vmem:[%s7103_s4 + $0x18] sm:$0xf0]  ;;  %v4340_v59 = vld [vmem:[#allocation3 + $0xe8] sm:$0xf0] }
 0x1e3   :  { %v810_v7 = vrot.slane %v795_v2, 4 }
 0x1e4   :  { %1743 = vmatpush.bf16.msrb.mxu1 %v4467_v4  ;;  %v820_v0 = vsel %vm818_vm12, %v797_v3, %v811_v51  ;;  %v1018_v21 = vsel %vm1013_vm13, %v998_v9, %v1009_v13  ;;  %v5035_v9 = vld [vmem:[#allocation3 + $0x124] sm:$0xf0]  ;;  %v4450_v51 = vld [vmem:[#allocation3 + $0x1c0] sm:$0xf] }
 0x1e5   :  { %1801 = vmatpush.bf16.msrb.mxu3 %v4279_v8  ;;  %v819_v16 = vsel %vm818_vm12, %v795_v2, %v810_v7  ;;  %v5041_v20 = vld [vmem:[#allocation3 + $0x154] sm:$0xf0]  ;;  %1714 = vmatpush.bf16.msrb.mxu0 %v4403_v14  ;;  %1034 = vst.msk [vmem:[#allocation3 + $0x220] sm:$0xff] %vm5409_vm6, %v1018_v21  ;;  %v4378_v8 = vld [vmem:[#allocation3 + $0x130] sm:$0xf] }
 0x1e6   :  { %835 = vst.msk [vmem:[#allocation3 + $0x140] sm:$0xff] %vm5409_vm6, %v819_v16  ;;  %v4395_v22 = vor.u32 %v5041_v20, %v4394_v19  ;;  %v4458_v24 = vld [vmem:[#allocation3 + $0x1d0] sm:$0xf]  ;;  %v4379_v1 = vor.u32 %v5037_v55, %v4378_v8  ;;  %v5000_v2 = vld [vmem:[#allocation3 + $0x14] sm:$0xf] }
 0x1e7   :  { %836 = vst.msk [vmem:[#allocation3 + $0x148] sm:$0xff] %vm5409_vm6, %v820_v0  ;;  %v4459_v25 = vor.u32 %v5057_v43, %v4458_v24  ;;  %v4239_v5 = vor.u32 %v5000_v2, %v4236_v57  ;;  %v4370_v7 = vld [vmem:[#allocation3 + $0x120] sm:$0xf]  ;;  %v5069_v14 = vld [vmem:[#allocation3 + $0x234] sm:$0xf0] }
 0x1e8   :  { %1668 = vmatmul.bf16.gmra.mxu2 %v5847_v17  ;;  %v4362_v19 = vld [vmem:[#allocation3 + $0x110] sm:$0xf]  ;;  %v4371_v20 = vor.u32 %v5035_v9, %v4370_v7  ;;  %v4508_v43 = vld [vmem:[#allocation3 + $0x238] sm:$0xf0]  ;;  %v5028_v55 = vld [vmem:[#allocation3 + $0xf4] sm:$0xf] }
 0x1e9   :  { %1802 = vmatpush.bf16.msrb.mxu3 %v4271_v15  ;;  %1715 = vmatpush.bf16.msrb.mxu0 %v4395_v22  ;;  %v1002_v36 = vpop.permute.xlu1 %1001  ;;  %v870_v11 = vpop.permute.xlu2 %869  ;;  %v4228_v15 = vld [vmem:[#allocation3 + $0x8] sm:$0xf0]  ;;  %v4998_v22 = vld [vmem:[#allocation3 + $0x4] sm:$0xf] }
 0x1ea   :  { %1744 = vmatpush.bf16.msrb.mxu1 %v4459_v25  ;;  %v927_v35 = vpop.permute.xlu0 %926  ;;  %v1011_v39 = vrot.slane %v1002_v36, 4  ;;  %v880_v40 = vrot.slane %v870_v11, 4  ;;  %v4231_v24 = vor.u32 %v4998_v22, %v4228_v15  ;;  %v4988_v25 = vld [vmem:[%s7103_s4 + $0x54] sm:$0xf] }
 0x1eb   :  { %v941_v38 = vrot.slane %v927_v35, 4 }
 0x1ec   :  { %v1020_v46 = vsel %vm1013_vm13, %v1002_v36, %v1011_v39  ;;  %v889_v48 = vsel %vm883_vm14, %v870_v11, %v880_v40  ;;  %v4363_v11 = vor.u32 %v5033_v23, %v4362_v19  ;;  %v5899_v39 = vor.u32 %v4988_v25, %v4188_v30  ;;  %v5066_v9 = vld [vmem:[#allocation3 + $0x224] sm:$0xf] }
 0x1ed   :  { %1803 = vmatpush.bf16.msrb.mxu3 %v4263_v27  ;;  %v950_v45 = vsel %vm948_vm11, %v927_v35, %v941_v38  ;;  %v4386_v47 = vld [vmem:[#allocation3 + $0x140] sm:$0xf]  ;;  %905 = vst.msk [vmem:[#allocation3 + $0x1a8] sm:$0xff] %vm5409_vm6, %v889_v48  ;;  %v4154_v48 = vld [vmem:[%s7103_s4 + $0x8] sm:$0xf] }
 0x1ee   :  { %966 = vst.msk [vmem:[#allocation3 + $0x1c8] sm:$0xff] %vm5409_vm6, %v950_v45  ;;  %v5039_v52 = vld [vmem:[#allocation3 + $0x144] sm:$0xf0]  ;;  %v5022_v30 = vld [vmem:[#allocation3 + $0xc4] sm:$0xf] }
 0x1ef   :  { %1036 = vst.msk [vmem:[#allocation3 + $0x230] sm:$0xff] %vm5409_vm6, %v1020_v46  ;;  %v4387_v53 = vor.u32 %v5039_v52, %v4386_v47  ;;  %v5031_v45 = vld [vmem:[#allocation3 + $0x104] sm:$0xf0]  ;;  %v4354_v52 = vld [vmem:[#allocation3 + $0x100] sm:$0xf] }
 0x1f0   :  { %1697 = vmatmul.bf16.gmra.mxu3 %v5863_v44  ;;  %v4355_v18 = vor.u32 %v5031_v45, %v4354_v52 }
 0x1f1   :  { %1804 = vmatpush.bf16.msrb.mxu3 %v4255_v29  ;;  %1716 = vmatpush.bf16.msrb.mxu0 %v4387_v53  ;;  %v874_v56 = vpop.permute.xlu1 %873  ;;  %v864_v61 = vpop.permute.xlu2 %863  ;;  %v4348_v29 = vld [vmem:[#allocation3 + $0xf8] sm:$0xf0] }
 0x1f2   :  { %v872_v26 = vpop.permute.xlu0 %871  ;;  %v882_v28 = vrot.slane %v874_v56, 4  ;;  %v877_v63 = vrot.slane %v864_v61, 4 }
 0x1f3   :  { %v881_v60 = vrot.slane %v872_v26, 4 }
 0x1f4   :  { %v891_v4 = vsel %vm883_vm14, %v874_v56, %v882_v28  ;;  %v886_v12 = vsel %vm883_vm14, %v864_v61, %v877_v63  ;;  %v5917_v56 = vor.u32 %v4981_v49, %v4154_v48  ;;  %v4995_v61 = vld [vmem:[%s7103_s4 + $0x88] sm:$0xf0]  ;;  %v5026_v63 = vld [vmem:[#allocation3 + $0xe4] sm:$0xf]  ;;  %v5051_v15 = vld [vmem:[#allocation3 + $0x1a4] sm:$0xf0] }
 0x1f5   :  { %1805 = vmatpush.bf16.msrb.mxu3 %v4247_v54  ;;  %v890_v3 = vsel %vm883_vm14, %v872_v26, %v881_v60  ;;  %v5055_v10 = vld [vmem:[#allocation3 + $0x1c4] sm:$0xf0]  ;;  %1717 = vmatpush.bf16.msrb.mxu0 %v4379_v1  ;;  %902 = vst.msk [vmem:[#allocation3 + $0x190] sm:$0xff] %vm5409_vm6, %v886_v12  ;;  %v4351_v26 = vor.u32 %v5028_v55, %v4348_v29  ;;  %v4206_v60 = vld [vmem:[%s7103_s4 + $0x78] sm:$0xf] }
 0x1f6   :  { %906 = vst.msk [vmem:[#allocation3 + $0x1b0] sm:$0xff] %vm5409_vm6, %v890_v3  ;;  %v4451_v13 = vor.u32 %v5055_v10, %v4450_v51  ;;  %v4506_v16 = vld [vmem:[#allocation3 + $0x230] sm:$0xf]  ;;  %v5068_v0 = vld [vmem:[#allocation3 + $0x234] sm:$0xf] }
 0x1f7   :  { %907 = vst.msk [vmem:[#allocation3 + $0x1b8] sm:$0xff] %vm5409_vm6, %v891_v4  ;;  %v4507_v21 = vor.u32 %v5069_v14, %v4506_v16  ;;  %v4511_v33 = vor.u32 %v5068_v0, %v4508_v43  ;;  %v4498_v1 = vld [vmem:[#allocation3 + $0x220] sm:$0xf]  ;;  %v4343_v4 = vor.u32 %v5026_v63, %v4340_v59  ;;  %v5024_v0 = vld [vmem:[#allocation3 + $0xd4] sm:$0xf] }
 0x1f8   :  { %1745 = vmatpush.bf16.msrb.mxu1 %v4451_v13  ;;  %1673 = vmatmul.bf16.gmra.mxu2 %v5883_v6  ;;  %v4332_v13 = vld [vmem:[#allocation3 + $0xd8] sm:$0xf0] }
 0x1f9   :  { %1806 = vmatpush.bf16.msrb.mxu3 %v4239_v5  ;;  %1718 = vmatpush.bf16.msrb.mxu0 %v4371_v20  ;;  %v868_v32 = vpop.permute.xlu1 %867  ;;  %v992_v36 = vpop.permute.xlu2 %991  ;;  %v5928_v5 = vor.u32 %v4995_v61, %v4206_v60  ;;  %v4335_v19 = vor.u32 %v5024_v0, %v4332_v13  ;;  %v4993_v20 = vld [vmem:[%s7103_s4 + $0x7c] sm:$0xf]  ;;  %v4162_v60 = vld [vmem:[%s7103_s4 + $0x10] sm:$0xf]  ;;  %v4982_v61 = vld [vmem:[%s7103_s4 + $0x20] sm:$0xf0] }
 0x1fa   :  { %1775 = vmatpush.bf16.msra.mxu2 %v4507_v21  ;;  %v1000_v27 = vpop.permute.xlu0 %999  ;;  %v879_v62 = vrot.slane %v868_v32, 4  ;;  %v1006_v38 = vrot.slane %v992_v36, 4  ;;  %v4208_v21 = vld [vmem:[%s7103_s4 + $0x8c] sm:$0xf0]  ;;  %v4300_v59 = vld [vmem:[#allocation3 + $0x98] sm:$0xf0] }
 0x1fb   :  { %v1010_v35 = vrot.slane %v1000_v27, 4  ;;  %v5016_v13 = vld [vmem:[#allocation3 + $0x94] sm:$0xf]  ;;  %v5058_v0 = vld [vmem:[#allocation3 + $0x1e4] sm:$0xf] }
 0x1fc   :  { %v888_v41 = vsel %vm883_vm14, %v868_v32, %v879_v62  ;;  %v1015_v47 = vsel %vm1013_vm13, %v992_v36, %v1006_v38  ;;  %v4316_v32 = vld [vmem:[#allocation3 + $0xb8] sm:$0xf0] }
 0x1fd   :  { %1807 = vmatpush.bf16.msrb.mxu3 %v4231_v24  ;;  %v1019_v40 = vsel %vm1013_vm13, %v1000_v27, %v1010_v35  ;;  %v4442_v46 = vld [vmem:[#allocation3 + $0x1b0] sm:$0xf]  ;;  %1719 = vmatpush.bf16.msrb.mxu0 %v4363_v11  ;;  %1031 = vst.msk [vmem:[#allocation3 + $0x208] sm:$0xff] %vm5409_vm6, %v1015_v47  ;;  %v4324_v24 = vld [vmem:[#allocation3 + $0xc8] sm:$0xf0]  ;;  %v5941_v27 = vor.u32 %v4993_v20, %v4208_v21 }
 0x1fe   :  { %1035 = vst.msk [vmem:[#allocation3 + $0x228] sm:$0xff] %vm5409_vm6, %v1019_v40  ;;  %v5053_v53 = vld [vmem:[#allocation3 + $0x1b4] sm:$0xf0]  ;;  %v4327_v62 = vor.u32 %v5022_v30, %v4324_v24  ;;  %v4986_v40 = vld [vmem:[%s7103_s4 + $0x40] sm:$0xf0] }
 0x1ff   :  { %904 = vst.msk [vmem:[#allocation3 + $0x1a0] sm:$0xff] %vm5409_vm6, %v888_v41  ;;  %v4443_v54 = vor.u32 %v5053_v53, %v4442_v46  ;;  %v5020_v47 = vld [vmem:[#allocation3 + $0xb4] sm:$0xf]  ;;  %v4292_v20 = vld [vmem:[#allocation3 + $0x88] sm:$0xf0] }
 0x200   :  { %1702 = vmatmul.bf16.gmra.mxu3 %v5899_v39  ;;  %v4319_v48 = vor.u32 %v5020_v47, %v4316_v32  ;;  %v5014_v21 = vld [vmem:[#allocation3 + $0x84] sm:$0xf]  ;;  %v5056_v24 = vld [vmem:[#allocation3 + $0x1d4] sm:$0xf]  ;;  %v4979_v30 = vld [vmem:[%s7103_s4 + $0xc] sm:$0xf] }
 0x201   :  { %1920 = vmatpush.bf16.msra.mxu3 %v4511_v33  ;;  %1720 = vmatpush.bf16.msrb.mxu0 %v4355_v18  ;;  %v996_v58 = vpop.permute.xlu1 %995  ;;  %v4174_v33 = vld [vmem:[%s7103_s4 + $0x30] sm:$0xf]  ;;  %v4308_v18 = vld [vmem:[#allocation3 + $0xa8] sm:$0xf0]  ;;  %v4156_v32 = vld [vmem:[%s7103_s4 + $0x1c] sm:$0xf0] }
 0x202   :  { %1746 = vmatpush.bf16.msrb.mxu1 %v4443_v54  ;;  %v994_v57 = vpop.permute.xlu0 %993  ;;  %v1008_v8 = vrot.slane %v996_v58, 4  ;;  %v5956_v49 = vor.u32 %v4986_v40, %v4174_v33  ;;  %v4452_v47 = vld [vmem:[#allocation3 + $0x1c8] sm:$0xf0] }
 0x203   :  { %v1007_v28 = vrot.slane %v994_v57, 4 }
 0x204   :  { %v1017_v3 = vsel %vm1013_vm13, %v996_v58, %v1008_v8  ;;  %1721 = vmatmul.bf16.vlgmr.msrb.gmra.mxu0 %v5917_v56  ;;  %v4426_v58 = vld [vmem:[#allocation3 + $0x190] sm:$0xf] }
 0x205   :  { %1829 = vmatpush.bf16.msra.mxu0 %v4351_v26  ;;  %v1016_v2 = vsel %vm1013_vm13, %v994_v57, %v1007_v28  ;;  %v5067_v7 = vld [vmem:[#allocation3 + $0x224] sm:$0xf0]  ;;  %v4500_v51 = vld [vmem:[#allocation3 + $0x228] sm:$0xf0]  ;;  %1033 = vst.msk [vmem:[#allocation3 + $0x218] sm:$0xff] %vm5409_vm6, %v1017_v3 }
 0x206   :  { %1032 = vst.msk [vmem:[#allocation3 + $0x210] sm:$0xff] %vm5409_vm6, %v1016_v2  ;;  %v4499_v10 = vor.u32 %v5067_v7, %v4498_v1  ;;  %v4503_v12 = vor.u32 %v5066_v9, %v4500_v51  ;;  %v4434_v14 = vld [vmem:[#allocation3 + $0x1a0] sm:$0xf]  ;;  %v5018_v26 = vld [vmem:[#allocation3 + $0xa4] sm:$0xf] }
 0x207   :  { %v4435_v16 = vor.u32 %v5051_v15, %v4434_v14  ;;  %v4476_v57 = vld [vmem:[#allocation3 + $0x1f8] sm:$0xf0]  ;;  %v4311_v63 = vor.u32 %v5018_v26, %v4308_v18  ;;  %v5063_v2 = vld [vmem:[#allocation3 + $0x204] sm:$0xf0]  ;;  %v4484_v3 = vld [vmem:[#allocation3 + $0x208] sm:$0xf0]  ;;  %v5971_v15 = vor.u32 %v4982_v61, %v4162_v60 }
 0x208   :  { %1776 = vmatpush.bf16.msra.mxu2 %v4499_v10  ;;  %1921 = vmatpush.bf16.msra.mxu3 %v4503_v12  ;;  %v5060_v12 = vld [vmem:[#allocation3 + $0x1f4] sm:$0xf]  ;;  %v4182_v26 = vld [vmem:[%s7103_s4 + $0x38] sm:$0xf] }
 0x209   :  { %1830 = vmatpush.bf16.msra.mxu0 %v4343_v4  ;;  %1678 = vmatmul.bf16.gmra.mxu2 %v5928_v5  ;;  %v990_v23 = vpop.permute.xlu1 %989  ;;  %v4479_v14 = vor.u32 %v5060_v12, %v4476_v57  ;;  %v4987_v57 = vld [vmem:[%s7103_s4 + $0x48] sm:$0xf0]  ;;  %v4996_v12 = vld [vmem:[%s7103_s4 + $0x90] sm:$0xf0] }
 0x20a   :  { %1747 = vmatpush.bf16.msrb.mxu1 %v4435_v16  ;;  %v866_v22 = vpop.permute.xlu0 %865  ;;  %v1005_v25 = vrot.slane %v990_v23, 4  ;;  %v4303_v16 = vor.u32 %v5016_v13, %v4300_v59  ;;  %v6000_v61 = vor.u32 %v4987_v57, %v4182_v26  ;;  %v5036_v13 = vld [vmem:[#allocation3 + $0x134] sm:$0xf] }
 0x20b   :  { %v878_v43 = vrot.slane %v866_v22, 4 }
 0x20c   :  { %v1014_v36 = vsel %vm1013_vm13, %v990_v23, %v1005_v25  ;;  %v5065_v41 = vld [vmem:[#allocation3 + $0x214] sm:$0xf0]  ;;  %v4492_v45 = vld [vmem:[#allocation3 + $0x218] sm:$0xf0] }
 0x20d   :  { %1831 = vmatpush.bf16.msra.mxu0 %v4335_v19  ;;  %v887_v35 = vsel %vm883_vm14, %v866_v22, %v878_v43  ;;  %v4490_v38 = vld [vmem:[#allocation3 + $0x210] sm:$0xf]  ;;  %v5064_v11 = vld [vmem:[#allocation3 + $0x214] sm:$0xf]  ;;  %1030 = vst.msk [vmem:[#allocation3 + $0x200] sm:$0xff] %vm5409_vm6, %v1014_v36  ;;  %v4295_v43 = vor.u32 %v5014_v21, %v4292_v20 }
 0x20e   :  { %903 = vst.msk [vmem:[#allocation3 + $0x198] sm:$0xff] %vm5409_vm6, %v887_v35  ;;  %v4491_v46 = vor.u32 %v5065_v41, %v4490_v38  ;;  %v4495_v29 = vor.u32 %v5064_v11, %v4492_v45  ;;  %v4468_v19 = vld [vmem:[#allocation3 + $0x1e8] sm:$0xf0]  ;;  %v4412_v23 = vld [vmem:[#allocation3 + $0x178] sm:$0xf0]  ;;  %v5988_v45 = vor.u32 %v4979_v30, %v4156_v32 }
 0x20f   :  { %v4471_v22 = vor.u32 %v5058_v0, %v4468_v19  ;;  %v4194_v35 = vld [vmem:[%s7103_s4 + $0x58] sm:$0xf]  ;;  %v4991_v36 = vld [vmem:[%s7103_s4 + $0x68] sm:$0xf0]  ;;  %v5044_v38 = vld [vmem:[#allocation3 + $0x174] sm:$0xf] }
 0x210   :  { %1707 = vmatmul.bf16.gmra.mxu3 %v5941_v27  ;;  %1777 = vmatpush.bf16.msra.mxu2 %v4491_v46  ;;  %v4460_v11 = vld [vmem:[#allocation3 + $0x1d8] sm:$0xf0]  ;;  %v4415_v40 = vor.u32 %v5044_v38, %v4412_v23  ;;  %v5990_v46 = vor.u32 %v4991_v36, %v4194_v35  ;;  %v4372_v21 = vld [vmem:[#allocation3 + $0x128] sm:$0xf0]  ;;  %v5032_v30 = vld [vmem:[#allocation3 + $0x114] sm:$0xf] }
 0x211   :  { %1832 = vmatpush.bf16.msra.mxu0 %v4327_v62  ;;  %1922 = vmatpush.bf16.msra.mxu3 %v4495_v29  ;;  %v862_v53 = vpop.permute.xlu1 %861  ;;  %v4463_v41 = vor.u32 %v5056_v24, %v4460_v11  ;;  %v5042_v29 = vld [vmem:[#allocation3 + $0x164] sm:$0xf]  ;;  %v4364_v32 = vld [vmem:[#allocation3 + $0x118] sm:$0xf0] }
 0x212   :  { %v860_v52 = vpop.permute.xlu0 %859  ;;  %v876_v55 = vrot.slane %v862_v53, 4  ;;  %v5034_v24 = vld [vmem:[#allocation3 + $0x124] sm:$0xf]  ;;  %v4367_v35 = vor.u32 %v5032_v30, %v4364_v32 }
 0x213   :  { %v875_v54 = vrot.slane %v860_v52, 4  ;;  %v5030_v38 = vld [vmem:[#allocation3 + $0x104] sm:$0xf] }
 0x214   :  { %v885_v8 = vsel %vm883_vm14, %v862_v53, %v876_v55  ;;  %1726 = vmatmul.bf16.gmra.mxu0 %v5956_v49  ;;  %v4482_v7 = vld [vmem:[#allocation3 + $0x200] sm:$0xf]  ;;  %v5062_v9 = vld [vmem:[#allocation3 + $0x204] sm:$0xf]  ;;  %v5052_v55 = vld [vmem:[#allocation3 + $0x1b4] sm:$0xf] }
 0x215   :  { %1833 = vmatpush.bf16.msra.mxu0 %v4319_v48  ;;  %v884_v28 = vsel %vm883_vm14, %v860_v52, %v875_v54  ;;  %v5049_v1 = vld [vmem:[#allocation3 + $0x194] sm:$0xf0]  ;;  %901 = vst.msk [vmem:[#allocation3 + $0x188] sm:$0xff] %vm5409_vm6, %v885_v8  ;;  %v4483_v51 = vor.u32 %v5063_v2, %v4482_v7  ;;  %v4487_v10 = vor.u32 %v5062_v9, %v4484_v3  ;;  %v4404_v48 = vld [vmem:[#allocation3 + $0x168] sm:$0xf0] }
 0x216   :  { %900 = vst.msk [vmem:[#allocation3 + $0x180] sm:$0xff] %vm5409_vm6, %v884_v28  ;;  %v4427_v4 = vor.u32 %v5049_v1, %v4426_v58  ;;  %v5054_v52 = vld [vmem:[#allocation3 + $0x1c4] sm:$0xf]  ;;  %v4407_v53 = vor.u32 %v5042_v29, %v4404_v48  ;;  %v4396_v54 = vld [vmem:[#allocation3 + $0x158] sm:$0xf0] }
 0x217   :  { %1778 = vmatpush.bf16.msra.mxu2 %v4483_v51  ;;  %1923 = vmatpush.bf16.msra.mxu3 %v4487_v10  ;;  %v4455_v18 = vor.u32 %v5054_v52, %v4452_v47  ;;  %v5040_v58 = vld [vmem:[#allocation3 + $0x154] sm:$0xf]  ;;  %v5038_v28 = vld [vmem:[#allocation3 + $0x144] sm:$0xf]  ;;  %v4388_v8 = vld [vmem:[#allocation3 + $0x148] sm:$0xf0] }
 0x218   :  { %1748 = vmatpush.bf16.msrb.mxu1 %v4427_v4  ;;  %v4399_v59 = vor.u32 %v5040_v58, %v4396_v54  ;;  %v4436_v1 = vld [vmem:[#allocation3 + $0x1a8] sm:$0xf0]  ;;  %v4391_v2 = vor.u32 %v5038_v28, %v4388_v8  ;;  %v4380_v4 = vld [vmem:[#allocation3 + $0x138] sm:$0xf0]  ;;  %v4984_v9 = vld [vmem:[%s7103_s4 + $0x34] sm:$0xf] }
 0x219   :  { %1834 = vmatpush.bf16.msra.mxu0 %v4311_v63  ;;  %v5050_v63 = vld [vmem:[#allocation3 + $0x1a4] sm:$0xf]  ;;  %v4428_v7 = vld [vmem:[#allocation3 + $0x198] sm:$0xf0]  ;;  %v4176_v51 = vld [vmem:[%s7103_s4 + $0x44] sm:$0xf0] }
 0x21a   :  { %4512 = vmatmul.msk.bf16.vlgmr.msra.gmra.mxu2 %vm1642_vm15, %v5971_v15  ;;  %v4439_v3 = vor.u32 %v5050_v63, %v4436_v1  ;;  %v4214_v10 = vld [vmem:[%s7103_s4 + $0x80] sm:$0xf]  ;;  %v4179_v19 = vor.u32 %v4984_v9, %v4176_v51  ;;  %v4222_v47 = vld [vmem:[%s7103_s4 + $0x88] sm:$0xf]  ;;  %v4997_v48 = vld [vmem:[%s7103_s4 + $0x98] sm:$0xf0]  ;;  %v6080_v1 = vpop.permute.xlu1 %1164 }
 0x21b   :  { %1887 = vmatpush.bf16.msrb.mxu2 %v4479_v14  ;;  %v5048_v14 = vld [vmem:[#allocation3 + $0x194] sm:$0xf]  ;;  %v6017_v20 = vor.u32 %v4996_v12, %v4214_v10  ;;  %v4223_v52 = vor.u32 %v4997_v48, %v4222_v47 }
 0x21c   :  { %v5047_v33 = vld [vmem:[#allocation3 + $0x184] sm:$0xf0]  ;;  %v4431_v0 = vor.u32 %v5048_v14, %v4428_v7  ;;  %v4420_v23 = vld [vmem:[#allocation3 + $0x188] sm:$0xf0] }
 0x21d   :  { %1835 = vmatpush.bf16.msra.mxu0 %v4303_v16  ;;  %v4418_v25 = vld [vmem:[#allocation3 + $0x180] sm:$0xf]  ;;  %v4383_v16 = vor.u32 %v5036_v13, %v4380_v4 }
 0x21e   :  { %v4419_v62 = vor.u32 %v5047_v33, %v4418_v25  ;;  %v4992_v33 = vld [vmem:[%s7103_s4 + $0x70] sm:$0xf0] }
 0x21f   :  { %1888 = vmatpush.bf16.msrb.mxu2 %v4471_v22  ;;  %v5046_v22 = vld [vmem:[#allocation3 + $0x184] sm:$0xf] }
 0x220   :  { %1808 = vmatmul.bf16.vlgmr.msrb.gmra.mxu3 %v5811_v31  ;;  %1749 = vmatpush.bf16.msrb.mxu1 %v4419_v62  ;;  %v4444_v31 = vld [vmem:[#allocation3 + $0x1b8] sm:$0xf0]  ;;  %v4423_v25 = vor.u32 %v5046_v22, %v4420_v23  ;;  %v4356_v62 = vld [vmem:[#allocation3 + $0x108] sm:$0xf0] }
 0x221   :  { %1836 = vmatpush.bf16.msra.mxu0 %v4295_v43  ;;  %v4447_v60 = vor.u32 %v5052_v55, %v4444_v31  ;;  %v4375_v43 = vor.u32 %v5034_v24, %v4372_v21  ;;  %v4359_v11 = vor.u32 %v5030_v38, %v4356_v62 }
 0x223   :  { %1889 = vmatpush.bf16.msrb.mxu2 %v4463_v41  ;;  %1750 = vmatmul.bf16.vlgmr.msrb.gmra.mxu1 %v5988_v45  ;;  %v4196_v41 = vld [vmem:[%s7103_s4 + $0x6c] sm:$0xf0] }
 0x224   :  { %1858 = vmatpush.bf16.msra.mxu1 %v4415_v40  ;;  %1731 = vmatmul.bf16.gmra.mxu0 %v5990_v46  ;;  %v4989_v40 = vld [vmem:[%s7103_s4 + $0x5c] sm:$0xf] }
 0x225   :  { %v4199_v29 = vor.u32 %v4989_v40, %v4196_v41 }
 0x227   :  { %1890 = vmatpush.bf16.msrb.mxu2 %v4455_v18 }
 0x228   :  { %1859 = vmatpush.bf16.msra.mxu1 %v4407_v53  ;;  %v6042_v53 = vpop.permute.xlu2 %1174 }
 0x22a   :  { %4513 = vmatmul.msk.bf16.gmra.mxu2 %vm1642_vm15, %v6000_v61 }
 0x22b   :  { %1891 = vmatpush.bf16.msrb.mxu2 %v4447_v60 }
 0x22c   :  { %1860 = vmatpush.bf16.msra.mxu1 %v4399_v59 }
 0x22f   :  { %1892 = vmatpush.bf16.msrb.mxu2 %v4439_v3 }
 0x230   :  { %1861 = vmatpush.bf16.msra.mxu1 %v4391_v2  ;;  %1813 = vmatmul.bf16.gmra.mxu3 %v5847_v17  ;;  %v4202_v17 = vld [vmem:[%s7103_s4 + $0x60] sm:$0xf]  ;;  %v6052_v54 = vpop.permute.xlu2 %1169 }
 0x231   :  { %v4203_v36 = vor.u32 %v4992_v33, %v4202_v17 }
 0x233   :  { %1893 = vmatpush.bf16.msrb.mxu2 %v4431_v0  ;;  %1755 = vmatmul.bf16.gmra.mxu1 %v4179_v19 }
 0x234   :  { %1862 = vmatpush.bf16.msra.mxu1 %v4383_v16  ;;  %1736 = vmatmul.bf16.gmra.mxu0 %v6017_v20 }
 0x237   :  { %1894 = vmatpush.bf16.msrb.mxu2 %v4423_v25 }
 0x238   :  { %1863 = vmatpush.bf16.msra.mxu1 %v4375_v43  ;;  %v6057_v31 = vpop.permute.xlu2 %1144 }
 0x23a   :  { %4514 = vmatmul.msk.bf16.gmra.mxu2 %vm1642_vm15, %v4203_v36 }
 0x23c   :  { %1864 = vmatpush.bf16.msra.mxu1 %v4367_v35 }
 0x240   :  { %1865 = vmatpush.bf16.msra.mxu1 %v4359_v11  ;;  %1818 = vmatmul.bf16.gmra.mxu3 %v5883_v6  ;;  %v4994_v6 = vld [vmem:[%s7103_s4 + $0x84] sm:$0xf] }
 0x243   :  { %1760 = vmatmul.bf16.gmra.mxu1 %v4199_v29 }
 0x244   :  { %1837 = vmatmul.bf16.vlgmr.msra.gmra.mxu0 %v5827_v50  ;;  %v4216_v50 = vld [vmem:[%s7103_s4 + $0x94] sm:$0xf0] }
 0x245   :  { %v4219_v18 = vor.u32 %v4994_v6, %v4216_v50 }
 0x24a   :  { %4515 = vmatmul.msk.bf16.gmra.mxu2 %vm1642_vm15, %v4223_v52 }
 0x250   :  { %1823 = vmatmul.bf16.gmra.mxu3 %v5928_v5 }
 0x253   :  { %1765 = vmatmul.bf16.gmra.mxu1 %v4219_v18 }
 0x254   :  { %1842 = vmatmul.bf16.gmra.mxu0 %v5863_v44  ;;  %v6064_v44 = vpop.permute.xlu0 %1179 }
 0x25a   :  { %1895 = vmatmul.bf16.vlgmr.msrb.gmra.mxu2 %v5988_v45 }
 0x25b   :  { %v1664_v55 = vpop.f32.mrf.mxu2 }
 0x25c   :  { %v1665_v26 = vadd.f32 %v1664_v55, %v6057_v31 }
 0x260   :  { %4516 = vmatmul.msk.bf16.vlgmr.msra.gmra.mxu3 %vm1642_vm15, %v5971_v15  ;;  %v6070_v15 = vpop.permute.xlu0 %1154 }
 0x263   :  { %v1693_v57 = vpop.f32.mrf.mxu3  ;;  %v6060_v58 = vpop.f32.mrf.mxu2  ;;  %1866 = vmatmul.bf16.vlgmr.msra.gmra.mxu1 %v5917_v56 }
 0x264   :  { %v1694_v5 = vadd.f32 %v1693_v57, %v1665_v26  ;;  %1847 = vmatmul.bf16.gmra.mxu0 %v5899_v39 }
 0x26a   :  { %1900 = vmatmul.bf16.gmra.mxu2 %v4179_v19 }
 0x26b   :  { %v6066_v59 = vpop.f32.mrf.mxu3  ;;  %v1669_v45 = vpop.f32.mrf.mxu2 }
 0x26c   :  { %v1670_v60 = vadd.f32 %v1669_v45, %v6070_v15 }
 0x270   :  { %4517 = vmatmul.msk.bf16.gmra.mxu3 %vm1642_vm15, %v6000_v61 }
 0x273   :  { %v1698_v28 = vpop.f32.mrf.mxu3  ;;  %v6073_v8 = vpop.f32.mrf.mxu2  ;;  %1871 = vmatmul.bf16.gmra.mxu1 %v5956_v49 }
 0x274   :  { %v1699_v63 = vadd.f32 %v1698_v28, %v1670_v60  ;;  %1852 = vmatmul.bf16.gmra.mxu0 %v5941_v27 }
 0x27a   :  { %1905 = vmatmul.bf16.gmra.mxu2 %v4199_v29 }
 0x27b   :  { %v6077_v39 = vpop.f32.mrf.mxu3  ;;  %v1674_v56 = vpop.f32.mrf.mxu2 }
 0x27c   :  { %v1675_v61 = vadd.f32 %v1674_v56, %v6080_v1 }
 0x280   :  { %4518 = vmatmul.msk.bf16.gmra.mxu3 %vm1642_vm15, %v4203_v36 }
 0x281   :  { %v1722_v2 = vpop.f32.mrf.mxu0 }
 0x282   :  { %v1723_v3 = vadd.f32 %v1722_v2, %v1694_v5 }
 0x283   :  { %v1703_v4 = vpop.f32.mrf.mxu3  ;;  %v6083_v7 = vpop.f32.mrf.mxu2  ;;  %1876 = vmatmul.bf16.gmra.mxu1 %v5990_v46 }
 0x284   :  { %v1704_v9 = vadd.f32 %v1703_v4, %v1675_v61 }
 0x289   :  { %v6086_v49 = vpop.f32.mrf.mxu0 }
 0x28a   :  { %1910 = vmatmul.bf16.gmra.mxu2 %v4219_v18 }
 0x28b   :  { %v6088_v27 = vpop.f32.mrf.mxu3 }
 0x28c   :  { %v1679_v51 = vpop.f32.mrf.mxu2 }
 0x28d   :  { %v1680_v10 = vadd.f32 %v1679_v51, %v6042_v53 }
 0x290   :  { %4519 = vmatmul.msk.bf16.gmra.mxu3 %vm1642_vm15, %v4223_v52 }
 0x291   :  { %v1727_v12 = vpop.f32.mrf.mxu0 }
 0x292   :  { %v1728_v13 = vadd.f32 %v1727_v12, %v1699_v63  ;;  %v1150_v12 = vpop.permute.xlu0 %1149 }
 0x293   :  { %v1708_v14 = vpop.f32.mrf.mxu3  ;;  %1881 = vmatmul.bf16.gmra.mxu1 %v6017_v20 }
 0x294   :  { %v1709_v16 = vadd.f32 %v1708_v14, %v1680_v10  ;;  %v6093_v0 = vpop.f32.mrf.mxu2  ;;  %v1667_v14 = vadd.f32 %v6060_v58, %v1150_v12 }
 0x299   :  { %v6095_v19 = vpop.f32.mrf.mxu0 }
 0x29b   :  { %v6097_v46 = vpop.f32.mrf.mxu3 }
 0x29d   :  { %v1780_v21 = vpop.f32.mrf.mxu2 }
 0x2a0   :  { %v1751_v22 = vpop.f32.mrf.mxu1 }
 0x2a1   :  { %v1732_v23 = vpop.f32.mrf.mxu0  ;;  %v1752_v24 = vadd.f32 %v1751_v22, %v1723_v3  ;;  %v1696_v22 = vadd.f32 %v6066_v59, %v1667_v14 }
 0x2a2   :  { %v1733_v43 = vadd.f32 %v1732_v23, %v1704_v9 }
 0x2a3   :  { %v1809_v25 = vpop.f32.mrf.mxu3  ;;  %v1781_v30 = vadd.f32 %v1780_v21, %v1752_v24 }
 0x2a4   :  { %v1810_v10 = vadd.f32 %v1809_v25, %v6057_v31 }
 0x2a5   :  { %v1782_v32 = vpop.f32.mrf.mxu2 }
 0x2a8   :  { %v1753_v17 = vpop.f32.mrf.mxu1 }
 0x2a9   :  { %v6099_v33 = vpop.f32.mrf.mxu0 }
 0x2ab   :  { %v1811_v35 = vpop.f32.mrf.mxu3 }
 0x2ad   :  { %v1785_v36 = vpop.f32.mrf.mxu2 }
 0x2b0   :  { %v1756_v20 = vpop.f32.mrf.mxu1 }
 0x2b1   :  { %v1737_v62 = vpop.f32.mrf.mxu0  ;;  %v1757_v38 = vadd.f32 %v1756_v20, %v1728_v13 }
 0x2b2   :  { %v1738_v11 = vadd.f32 %v1737_v62, %v1709_v16  ;;  %v1945_v62 = vmax.f32 %v1781_v30, 0.0 }
 0x2b3   :  { %v1814_v40 = vpop.f32.mrf.mxu3  ;;  %v6101_v41 = vadd.f32 %v1785_v36, %v1757_v38  ;;  %v1725_v36 = vadd.f32 %v6086_v49, %v1696_v22 }
 0x2b4   :  { %v1961_v58 = vmul.f32 %v1945_v62, %v5401_v34  ;;  %v1815_v30 = vadd.f32 %v1814_v40, %v6070_v15 }
 0x2b5   :  { %v6103_v29 = vpop.f32.mrf.mxu2  ;;  %v1754_v38 = vadd.f32 %v1753_v17, %v1725_v36  ;;  %v1949_v62 = vmax.f32 %v6101_v41, 0.0 }
 0x2b8   :  { %v6105_v47 = vpop.f32.mrf.mxu1 }
 0x2b9   :  { %v6113_v26 = vpop.f32.mrf.mxu0 }
 0x2bb   :  { %v6107_v48 = vpop.f32.mrf.mxu3 }
 0x2bd   :  { %v1790_v52 = vpop.f32.mrf.mxu2 }
 0x2c0   :  { %v1761_v6 = vpop.f32.mrf.mxu1 }
 0x2c1   :  { %v1762_v50 = vadd.f32 %v1761_v6, %v1733_v43  ;;  %v1838_v60 = vpop.f32.mrf.mxu0 }
 0x2c2   :  { %v1839_v16 = vadd.f32 %v1838_v60, %v1810_v10  ;;  %v1783_v60 = vadd.f32 %v1782_v32, %v1754_v38 }
 0x2c3   :  { %v6109_v18 = vpop.f32.mrf.mxu3  ;;  %v6111_v55 = vadd.f32 %v1790_v52, %v1762_v50 }
 0x2c4   :  { %v1947_v49 = vmax.f32 %v1783_v60, 0.0 }
 0x2c5   :  { %v6115_v57 = vpop.f32.mrf.mxu2 }
 0x2c6   :  { %v1963_v22 = vmul.f32 %v1947_v49, %v5401_v34 }
 0x2c8   :  { %v6117_v5 = vpop.f32.mrf.mxu1 }
 0x2c9   :  { %v1840_v4 = vpop.f32.mrf.mxu0 }
 0x2cb   :  { %v6119_v45 = vpop.f32.mrf.mxu3 }
 0x2cd   :  { %v1795_v28 = vpop.f32.mrf.mxu2 }
 0x2d0   :  { %v1766_v63 = vpop.f32.mrf.mxu1 }
 0x2d1   :  { %v1767_v56 = vadd.f32 %v1766_v63, %v1738_v11  ;;  %v1843_v24 = vpop.f32.mrf.mxu0  ;;  %v1812_v11 = vadd.f32 %v1811_v35, %v1150_v12  ;;  %v1160_v35 = vpop.permute.xlu1 %1159 }
 0x2d2   :  { %v1672_v12 = vadd.f32 %v6073_v8, %v1160_v35 }
 0x2d3   :  { %v6121_v61 = vpop.f32.mrf.mxu3  ;;  %v6123_v2 = vadd.f32 %v1795_v28, %v1767_v56  ;;  %v1841_v31 = vadd.f32 %v1840_v4, %v1812_v11 }
 0x2d5   :  { %v6125_v3 = vpop.f32.mrf.mxu2 }
 0x2d8   :  { %v6127_v9 = vpop.f32.mrf.mxu1 }
 0x2d9   :  { %v1845_v14 = vpop.f32.mrf.mxu0 }
 0x2db   :  { %v6129_v51 = vpop.f32.mrf.mxu3 }
 0x2dd   :  { %v1896_v13 = vpop.f32.mrf.mxu2 }
 0x2e0   :  { %v1867_v21 = vpop.f32.mrf.mxu1 }
 0x2e1   :  { %v1868_v23 = vadd.f32 %v1867_v21, %v1839_v16  ;;  %v1701_v21 = vadd.f32 %v6077_v39, %v1672_v12  ;;  %v1817_v39 = vadd.f32 %v6107_v48, %v1160_v35  ;;  %v1965_v48 = vmul.f32 %v1949_v62, %v5401_v34 }
 0x2e3   :  { %v1925_v43 = vpop.f32.mrf.mxu3  ;;  %v1897_v20 = vadd.f32 %v1896_v13, %v1868_v23  ;;  %v1844_v13 = vadd.f32 %v1843_v24, %v1815_v30  ;;  %v1730_v15 = vadd.f32 %v6095_v19, %v1701_v21  ;;  %v1848_v19 = vpop.f32.mrf.mxu0 }
 0x2e5   :  { %v1926_v52 = vadd.f32 %v1925_v43, %v1897_v20  ;;  %v1898_v6 = vpop.f32.mrf.mxu2  ;;  %v1759_v24 = vadd.f32 %v6105_v47, %v1730_v15 }
 0x2e7   :  { %v1946_v25 = vmax.f32 %v1926_v52, 0.0 }
 0x2e8   :  { %v1869_v50 = vpop.f32.mrf.mxu1 }
 0x2e9   :  { %v1962_v28 = vmul.f32 %v1946_v25, %v5403_v37  ;;  %v1870_v59 = vadd.f32 %v1869_v50, %v1841_v31  ;;  %v1846_v31 = vadd.f32 %v1845_v14, %v1817_v39  ;;  %v1788_v50 = vadd.f32 %v6103_v29, %v1759_v24 }
 0x2ea   :  { %v1820_v14 = vadd.f32 %v6109_v18, %v6080_v1 }
 0x2eb   :  { %v1927_v63 = vpop.f32.mrf.mxu3  ;;  %v1977_v56 = vpack.c.bf16 %v1962_v28, %v1961_v58  ;;  %v1899_v10 = vadd.f32 %v1898_v6, %v1870_v59  ;;  %v1850_v1 = vpop.f32.mrf.mxu0 }
 0x2ec   :  { %v1849_v35 = vadd.f32 %v1848_v19, %v1820_v14 }
 0x2ed   :  { %1985 = vst.msk [vmem:[#allocation2 + $0x4] sm:$0xff] %vm5409_vm6, %v1977_v56  ;;  %v1928_v17 = vadd.f32 %v1927_v63, %v1899_v10  ;;  %v1901_v4 = vpop.f32.mrf.mxu2  ;;  %v1951_v10 = vmax.f32 %v1788_v50, 0.0 }
 0x2ef   :  { %v1948_v32 = vmax.f32 %v1928_v17, 0.0  ;;  %v1677_v17 = vadd.f32 %v6083_v7, %v6052_v54  ;;  %v1953_v7 = vmax.f32 %v6111_v55, 0.0 }
 0x2f0   :  { %v1872_v16 = vpop.f32.mrf.mxu1 }
 0x2f1   :  { %v1964_v23 = vmul.f32 %v1948_v32, %v5403_v37  ;;  %v1873_v43 = vadd.f32 %v1872_v16, %v1844_v13  ;;  %v1706_v12 = vadd.f32 %v6088_v27, %v1677_v17  ;;  %v1967_v13 = vmul.f32 %v1951_v10, %v5401_v34 }
 0x2f3   :  { %v1930_v36 = vpop.f32.mrf.mxu3  ;;  %v1978_v40 = vpack.c.bf16 %v1964_v23, %v1963_v22  ;;  %v1902_v20 = vadd.f32 %v1901_v4, %v1873_v43  ;;  %v1735_v22 = vadd.f32 %v6099_v33, %v1706_v12 }
 0x2f4   :  { %v2330_v38 = vld [vmem:[#allocation2 + $0x8] sm:$0xf]  ;;  %v6146_v11 = vld [vmem:[#allocation2] sm:$0xff] }
 0x2f5   :  { %v2106_v8 = vld [vmem:[#allocation2 + $0x8] sm:$0xf]  ;;  %1986 = vst.msk [vmem:[#allocation2 + $0x14] sm:$0xff] %vm5409_vm6, %v1978_v40  ;;  %v1931_v52 = vadd.f32 %v1930_v36, %v1902_v20  ;;  %2363 = vrot.lane.b32.xlu2 %v2330_v38, %s5208_s1  ;;  %2361 = vrot.lane.b32.xlu1 %v6146_v11, %s5208_s1  ;;  %v1903_v41 = vpop.f32.mrf.mxu2  ;;  %v1764_v40 = vadd.f32 %v6117_v5, %v1735_v22 }
 0x2f6   :  { %2139 = vrot.lane.b32.xlu0 %v2106_v8, %s5209_s2  ;;  %v2441_v6 = vld [vmem:[#allocation2 + $0x4] sm:$0xff]  ;;  %v1822_v20 = vadd.f32 %v6119_v45, %v6052_v54  ;;  %v1969_v45 = vmul.f32 %v1953_v7, %v5401_v34 }
 0x2f7   :  { %v1950_v25 = vmax.f32 %v1931_v52, 0.0  ;;  %2449 = vst.msk [vmem:[#allocation3 + $0x100] sm:$0xff] %vm5409_vm6, %v2441_v6  ;;  %v2218_v56 = vld [vmem:[#allocation2 + $0x8] sm:$0xf]  ;;  %v1793_v8 = vadd.f32 %v6115_v57, %v1764_v40  ;;  %v1853_v52 = vpop.f32.mrf.mxu0 }
 0x2f8   :  { %v1874_v47 = vpop.f32.mrf.mxu1  ;;  %v1851_v38 = vadd.f32 %v1850_v1, %v1822_v20 }
 0x2f9   :  { %v1966_v58 = vmul.f32 %v1950_v25, %v5403_v37  ;;  %v1875_v60 = vadd.f32 %v1874_v47, %v1846_v31  ;;  %v1955_v31 = vmax.f32 %v1793_v8, 0.0  ;;  %v1825_v25 = vadd.f32 %v6121_v61, %v6042_v53 }
 0x2fb   :  { %v1932_v28 = vpop.f32.mrf.mxu3  ;;  %v1979_v59 = vpack.c.bf16 %v1966_v58, %v1965_v48  ;;  %v1904_v63 = vadd.f32 %v1903_v41, %v1875_v60  ;;  %v1682_v58 = vadd.f32 %v6093_v0, %v6064_v44  ;;  %v1854_v60 = vadd.f32 %v1853_v52, %v1825_v25 }
 0x2fc   :  { %v2442_v30 = vld [vmem:[#allocation2 + $0x14] sm:$0xff]  ;;  %v1957_v0 = vmax.f32 %v6123_v2, 0.0 }
 0x2fd   :  { %1987 = vst.msk [vmem:[#allocation2 + $0x24] sm:$0xff] %vm5409_vm6, %v1979_v59  ;;  %v1933_v49 = vadd.f32 %v1932_v28, %v1904_v63  ;;  %2251 = vrot.lane.b32.xlu1 %v2218_v56, %s5211_s24  ;;  %2137 = vrot.lane.b32.xlu2 %v6146_v11, %s5209_s2  ;;  %v1906_v29 = vpop.f32.mrf.mxu2  ;;  %v2332_v36 = vld [vmem:[#allocation2 + $0x18] sm:$0xf]  ;;  %v6185_v62 = vld [vmem:[#allocation2 + $0x10] sm:$0xff]  ;;  %v1711_v28 = vadd.f32 %v6097_v46, %v1682_v58 }
 0x2fe   :  { %2249 = vrot.lane.b32.xlu0 %v6146_v11, %s5211_s24  ;;  %2450 = vst.msk [vmem:[#allocation3 + $0x108] sm:$0xff] %vm5409_vm6, %v2442_v30  ;;  %v2108_v15 = vld [vmem:[#allocation2 + $0x18] sm:$0xf]  ;;  %v1971_v59 = vmul.f32 %v1955_v31, %v5401_v34  ;;  %v1827_v46 = vadd.f32 %v6129_v51, %v6064_v44  ;;  %v1973_v44 = vmul.f32 %v1957_v0, %v5401_v34 }
 0x2ff   :  { %v1952_v4 = vmax.f32 %v1933_v49, 0.0  ;;  %v2220_v48 = vld [vmem:[#allocation2 + $0x18] sm:$0xf]  ;;  %v1740_v14 = vadd.f32 %v6113_v26, %v1711_v28  ;;  %v1855_v30 = vpop.f32.mrf.mxu0 }
 0x300   :  { %v1877_v18 = vpop.f32.mrf.mxu1  ;;  %v1856_v2 = vadd.f32 %v1855_v30, %v1827_v46 }
 0x301   :  { %v1968_v32 = vmul.f32 %v1952_v4, %v5403_v37  ;;  %v1878_v16 = vadd.f32 %v1877_v18, %v1849_v35  ;;  %v1769_v4 = vadd.f32 %v6127_v9, %v1740_v14 }
 0x303   :  { %v1935_v21 = vpop.f32.mrf.mxu3  ;;  %v1980_v23 = vpack.c.bf16 %v1968_v32, %v1967_v13  ;;  %v1907_v43 = vadd.f32 %v1906_v29, %v1878_v16  ;;  %v1798_v51 = vadd.f32 %v6125_v3, %v1769_v4 }
 0x304   :  { %v2443_v55 = vld [vmem:[#allocation2 + $0x24] sm:$0xff] }
 0x305   :  { %1988 = vst.msk [vmem:[#allocation2 + $0x34] sm:$0xff] %vm5409_vm6, %v1980_v23  ;;  %v1936_v27 = vadd.f32 %v1935_v21, %v1907_v43  ;;  %2367 = vrot.lane.b32.xlu1 %v2332_v36, %s5208_s1  ;;  %2143 = vrot.lane.b32.xlu2 %v2108_v15, %s5209_s2  ;;  %v1908_v33 = vpop.f32.mrf.mxu2  ;;  %v2334_v17 = vld [vmem:[#allocation2 + $0x28] sm:$0xf]  ;;  %v2333_v18 = vld [vmem:[#allocation2 + $0x20] sm:$0xff]  ;;  %v1959_v36 = vmax.f32 %v1798_v51, 0.0 }
 0x306   :  { %2365 = vrot.lane.b32.xlu0 %v6185_v62, %s5208_s1  ;;  %2451 = vst.msk [vmem:[#allocation3 + $0x110] sm:$0xff] %vm5409_vm6, %v2443_v55  ;;  %v2222_v35 = vld [vmem:[#allocation2 + $0x28] sm:$0xf] }
 0x307   :  { %v1954_v5 = vmax.f32 %v1936_v27, 0.0  ;;  %v2110_v43 = vld [vmem:[#allocation2 + $0x28] sm:$0xf]  ;;  %v1975_v20 = vmul.f32 %v1959_v36, %v5401_v34 }
 0x308   :  { %v1879_v54 = vpop.f32.mrf.mxu1 }
 0x309   :  { %v1970_v24 = vmul.f32 %v1954_v5, %v5403_v37  ;;  %v1880_v39 = vadd.f32 %v1879_v54, %v1851_v38  ;;  %v1998_v38 = vld [vmem:[#allocation2 + $0x28] sm:$0xf] }
 0x30b   :  { %v1937_v19 = vpop.f32.mrf.mxu3  ;;  %v1981_v41 = vpack.c.bf16 %v1970_v24, %v1969_v45  ;;  %v1909_v6 = vadd.f32 %v1908_v33, %v1880_v39 }
 0x30c   :  { %v2444_v50 = vld [vmem:[#allocation2 + $0x34] sm:$0xff] }
 0x30d   :  { %1989 = vst.msk [vmem:[#allocation2 + $0x44] sm:$0xff] %vm5409_vm6, %v1981_v41  ;;  %v1938_v47 = vadd.f32 %v1937_v19, %v1909_v6  ;;  %2141 = vrot.lane.b32.xlu1 %v6185_v62, %s5209_s2  ;;  %2253 = vrot.lane.b32.xlu2 %v6185_v62, %s5211_s24  ;;  %v1911_v57 = vpop.f32.mrf.mxu2  ;;  %v6226_v7 = vld [vmem:[#allocation2 + $0x30] sm:$0xff]  ;;  %v2336_v54 = vld [vmem:[#allocation2 + $0x38] sm:$0xf] }
 0x30e   :  { %2255 = vrot.lane.b32.xlu0 %v2220_v48, %s5211_s24  ;;  %2452 = vst.msk [vmem:[#allocation3 + $0x118] sm:$0xff] %vm5409_vm6, %v2444_v50  ;;  %v2224_v8 = vld [vmem:[#allocation2 + $0x38] sm:$0xf] }
 0x30f   :  { %v1956_v53 = vmax.f32 %v1938_v47, 0.0  ;;  %v2112_v39 = vld [vmem:[#allocation2 + $0x38] sm:$0xf] }
 0x310   :  { %v1882_v61 = vpop.f32.mrf.mxu1 }
 0x311   :  { %v1972_v63 = vmul.f32 %v1956_v53, %v5403_v37  ;;  %v1883_v56 = vadd.f32 %v1882_v61, %v1854_v60 }
 0x313   :  { %v1940_v10 = vpop.f32.mrf.mxu3  ;;  %v1982_v49 = vpack.c.bf16 %v1972_v63, %v1971_v59  ;;  %v1912_v29 = vadd.f32 %v1911_v57, %v1883_v56 }
 0x314   :  { %v2445_v26 = vld [vmem:[#allocation2 + $0x44] sm:$0xff] }
 0x315   :  { %1990 = vst.msk [vmem:[#allocation2 + $0x54] sm:$0xff] %vm5409_vm6, %v1982_v49  ;;  %v1941_v1 = vadd.f32 %v1940_v10, %v1912_v29  ;;  %2371 = vrot.lane.b32.xlu1 %v2334_v17, %s5208_s1  ;;  %2259 = vrot.lane.b32.xlu2 %v2222_v35, %s5211_s24  ;;  %v1913_v13 = vpop.f32.mrf.mxu2  ;;  %v2337_v5 = vld [vmem:[#allocation2 + $0x40] sm:$0xff]  ;;  %v2114_v24 = vld [vmem:[#allocation2 + $0x48] sm:$0xf] }
 0x316   :  { %2369 = vrot.lane.b32.xlu0 %v2333_v18, %s5208_s1  ;;  %2453 = vst.msk [vmem:[#allocation3 + $0x120] sm:$0xff] %vm5409_vm6, %v2445_v26  ;;  %v2338_v19 = vld [vmem:[#allocation2 + $0x48] sm:$0xf] }
 0x317   :  { %v1958_v12 = vmax.f32 %v1941_v1, 0.0  ;;  %v2226_v31 = vld [vmem:[#allocation2 + $0x48] sm:$0xf] }
 0x318   :  { %v1884_v9 = vpop.f32.mrf.mxu1  ;;  %v2002_v48 = vld [vmem:[#allocation2 + $0x48] sm:$0xf] }
 0x319   :  { %v1974_v32 = vmul.f32 %v1958_v12, %v5403_v37  ;;  %v1885_v16 = vadd.f32 %v1884_v9, %v1856_v2 }
 0x31b   :  { %v1942_v21 = vpop.f32.mrf.mxu3  ;;  %v1983_v22 = vpack.c.bf16 %v1974_v32, %v1973_v44  ;;  %v1914_v23 = vadd.f32 %v1913_v13, %v1885_v16 }
 0x31c   :  { %v2446_v3 = vld [vmem:[#allocation2 + $0x54] sm:$0xff] }
 0x31d   :  { %1991 = vst.msk [vmem:[#allocation2 + $0x64] sm:$0xff] %vm5409_vm6, %v1983_v22  ;;  %v1943_v15 = vadd.f32 %v1942_v21, %v1914_v23  ;;  %2147 = vrot.lane.b32.xlu1 %v2110_v43, %s5209_s2  ;;  %2373 = vrot.lane.b32.xlu2 %v6226_v7, %s5208_s1  ;;  %v2339_v52 = vld [vmem:[#allocation2 + $0x50] sm:$0xff]  ;;  %v2116_v41 = vld [vmem:[#allocation2 + $0x58] sm:$0xf] }
 0x31e   :  { %2145 = vrot.lane.b32.xlu0 %v2333_v18, %s5209_s2  ;;  %2454 = vst.msk [vmem:[#allocation3 + $0x128] sm:$0xff] %vm5409_vm6, %v2446_v3  ;;  %v2340_v6 = vld [vmem:[#allocation2 + $0x58] sm:$0xf] }
 0x31f   :  { %v1960_v40 = vmax.f32 %v1943_v15, 0.0  ;;  %v2228_v47 = vld [vmem:[#allocation2 + $0x58] sm:$0xf] }
 0x320   :  { %v2004_v50 = vld [vmem:[#allocation2 + $0x58] sm:$0xf] }
 0x321   :  { %v1976_v27 = vmul.f32 %v1960_v40, %v5403_v37  ;;  %v2000_v15 = vld [vmem:[#allocation2 + $0x38] sm:$0xf] }
 0x323   :  { %v1984_v33 = vpack.c.bf16 %v1976_v27, %v1975_v20 }
 0x324   :  { %v2447_v55 = vld [vmem:[#allocation2 + $0x64] sm:$0xff] }
 0x325   :  { %1992 = vst.msk [vmem:[#allocation2 + $0x74] sm:$0xff] %vm5409_vm6, %v1984_v33  ;;  %2257 = vrot.lane.b32.xlu1 %v2333_v18, %s5211_s24  ;;  %2149 = vrot.lane.b32.xlu2 %v6226_v7, %s5209_s2  ;;  %v2341_v60 = vld [vmem:[#allocation2 + $0x60] sm:$0xff]  ;;  %v2342_v53 = vld [vmem:[#allocation2 + $0x68] sm:$0xf] }
 0x326   :  { %2033 = vrot.lane.b32.xlu0 %v2333_v18, %s5210_s23  ;;  %2455 = vst.msk [vmem:[#allocation3 + $0x130] sm:$0xff] %vm5409_vm6, %v2447_v55  ;;  %v2118_v61 = vld [vmem:[#allocation2 + $0x68] sm:$0xf] }
 0x327   :  { %v2230_v35 = vld [vmem:[#allocation2 + $0x68] sm:$0xf] }
 0x328   :  { %v2006_v9 = vld [vmem:[#allocation2 + $0x68] sm:$0xf] }
 0x32c   :  { %v6248_v45 = vld [vmem:[#allocation2 + $0x74] sm:$0xff] }
 0x32d   :  { %2035 = vrot.lane.b32.xlu1 %v1998_v38, %s5210_s23  ;;  %2377 = vrot.lane.b32.xlu2 %v2337_v5, %s5208_s1  ;;  %2456 = vst.msk [vmem:[#allocation3 + $0x138] sm:$0xff] %vm5409_vm6, %v6248_v45  ;;  %v2343_v13 = vld [vmem:[#allocation2 + $0x70] sm:$0xff]  ;;  %v2344_v43 = vld [vmem:[#allocation2 + $0x78] sm:$0xf] }
 0x32e   :  { %2375 = vrot.lane.b32.xlu0 %v2336_v54, %s5208_s1  ;;  %v2120_v36 = vld [vmem:[#allocation2 + $0x78] sm:$0xf] }
 0x335   :  { %2263 = vrot.lane.b32.xlu1 %v2224_v8, %s5211_s24  ;;  %2155 = vrot.lane.b32.xlu2 %v2114_v24, %s5209_s2 }
 0x336   :  { %2151 = vrot.lane.b32.xlu0 %v2112_v39, %s5209_s2  ;;  %v2232_v39 = vld [vmem:[#allocation2 + $0x78] sm:$0xf] }
 0x33d   :  { %2153 = vrot.lane.b32.xlu1 %v2337_v5, %s5209_s2  ;;  %2265 = vrot.lane.b32.xlu2 %v2337_v5, %s5211_s24 }
 0x33e   :  { %2261 = vrot.lane.b32.xlu0 %v6226_v7, %s5211_s24 }
 0x345   :  { %2381 = vrot.lane.b32.xlu1 %v2339_v52, %s5208_s1  ;;  %2041 = vrot.lane.b32.xlu2 %v2337_v5, %s5210_s23 }
 0x346   :  { %2379 = vrot.lane.b32.xlu0 %v2338_v19, %s5208_s1 }
 0x34d   :  { %2159 = vrot.lane.b32.xlu1 %v2116_v41, %s5209_s2  ;;  %2383 = vrot.lane.b32.xlu2 %v2340_v6, %s5208_s1 }
 0x34e   :  { %2267 = vrot.lane.b32.xlu0 %v2226_v31, %s5211_s24 }
 0x34f   :  { %v2364_v25 = vpop.permute.xlu2 %2363 }
 0x350   :  { %v2394_v63 = vrot.slane %v2364_v25, 4 }
 0x355   :  { %2269 = vrot.lane.b32.xlu1 %v2339_v52, %s5211_s24  ;;  %2271 = vrot.lane.b32.xlu2 %v2228_v47, %s5211_s24 }
 0x356   :  { %2043 = vrot.lane.b32.xlu0 %v2002_v48, %s5210_s23 }
 0x357   :  { %v2138_v57 = vpop.permute.xlu2 %2137 }
 0x358   :  { %v2169_v14 = vrot.slane %v2138_v57, 4 }
 0x35d   :  { %2045 = vrot.lane.b32.xlu1 %v2339_v52, %s5210_s23  ;;  %2047 = vrot.lane.b32.xlu2 %v2004_v50, %s5210_s23 }
 0x35e   :  { %2157 = vrot.lane.b32.xlu0 %v2339_v52, %s5209_s2 }
 0x35f   :  { %v2144_v58 = vpop.permute.xlu2 %2143 }
 0x360   :  { %v2172_v20 = vrot.slane %v2144_v58, 4 }
 0x365   :  { %2385 = vrot.lane.b32.xlu1 %v2341_v60, %s5208_s1  ;;  %2387 = vrot.lane.b32.xlu2 %v2342_v53, %s5208_s1 }
 0x366   :  { %2163 = vrot.lane.b32.xlu0 %v2118_v61, %s5209_s2 }
 0x367   :  { %v2254_v28 = vpop.permute.xlu2 %2253  ;;  %v2362_v59 = vpop.permute.xlu1 %2361 }
 0x368   :  { %v2140_v56 = vpop.permute.xlu0 %2139  ;;  %v2393_v10 = vrot.slane %v2362_v59, 4  ;;  %v2283_v55 = vrot.slane %v2254_v28, 4 }
 0x369   :  { %v2170_v49 = vrot.slane %v2140_v56, 4 }
 0x36a   :  { %v2409_v29 = vsel %vm299_vm5, %v2393_v10, %v2394_v63 }
 0x36b   :  { %v2185_v0 = vsel %vm299_vm5, %v2169_v14, %v2170_v49  ;;  %v2410_v30 = vsel %vm730_vm8, %v2362_v59, %v2409_v29  ;;  %v1994_v59 = vld [vmem:[#allocation2 + $0x8] sm:$0xf]  ;;  %v1996_v49 = vld [vmem:[#allocation2 + $0x18] sm:$0xf] }
 0x36c   :  { %v2186_v17 = vsel %vm504_vm7, %v2138_v57, %v2185_v0  ;;  %2433 = vst.msk [vmem:[#allocation3 + $0xc0] sm:$0xff] %vm5409_vm6, %v2410_v30  ;;  %v6346_v29 = vld [vmem:[#allocation2 + $0x64] sm:$0xff] }
 0x36d   :  { %2209 = vst.msk [vmem:[#allocation3 + $0x40] sm:$0xff] %vm5409_vm6, %v2186_v17  ;;  %2275 = vrot.lane.b32.xlu1 %v2230_v35, %s5211_s24  ;;  %2161 = vrot.lane.b32.xlu2 %v2341_v60, %s5209_s2  ;;  %v6349_v0 = vld [vmem:[#allocation2 + $0x24] sm:$0xff] }
 0x36e   :  { %2273 = vrot.lane.b32.xlu0 %v2341_v60, %s5211_s24 }
 0x36f   :  { %v6287_v4 = vpop.permute.xlu2 %2259  ;;  %v2252_v46 = vpop.permute.xlu1 %2251 }
 0x370   :  { %v2250_v1 = vpop.permute.xlu0 %2249  ;;  %v2282_v18 = vrot.slane %v2252_v46, 4 }
 0x371   :  { %v2281_v26 = vrot.slane %v2250_v1, 4 }
 0x373   :  { %v2297_v2 = vsel %vm299_vm5, %v2281_v26, %v2282_v18 }
 0x374   :  { %v2298_v12 = vsel %vm617_vm10, %v2250_v1, %v2297_v2 }
 0x375   :  { %2321 = vst.msk [vmem:[#allocation3 + $0x80] sm:$0xff] %vm5409_vm6, %v2298_v12  ;;  %2049 = vrot.lane.b32.xlu1 %v2341_v60, %s5210_s23  ;;  %2051 = vrot.lane.b32.xlu2 %v2006_v9, %s5210_s23 }
 0x376   :  { %2389 = vrot.lane.b32.xlu0 %v2343_v13, %s5208_s1 }
 0x377   :  { %v6296_v44 = vpop.permute.xlu2 %2373  ;;  %v2368_v51 = vpop.permute.xlu1 %2367 }
 0x378   :  { %v2366_v32 = vpop.permute.xlu0 %2365  ;;  %v2396_v16 = vrot.slane %v2368_v51, 4  ;;  %v2399_v1 = vrot.slane %v6296_v44, 4  ;;  %v6365_v51 = vld [vmem:[#allocation2 + $0x54] sm:$0xff] }
 0x379   :  { %v2395_v21 = vrot.slane %v2366_v32, 4 }
 0x37b   :  { %v2411_v22 = vsel %vm299_vm5, %v2395_v21, %v2396_v16 }
 0x37c   :  { %v2412_v23 = vsel %vm730_vm8, %v2366_v32, %v2411_v22  ;;  %v6370_v32 = vld [vmem:[#allocation2 + $0x14] sm:$0xff] }
 0x37d   :  { %2434 = vst.msk [vmem:[#allocation3 + $0xc8] sm:$0xff] %vm5409_vm6, %v2412_v23  ;;  %2391 = vrot.lane.b32.xlu1 %v2344_v43, %s5208_s1  ;;  %2167 = vrot.lane.b32.xlu2 %v2120_v36, %s5209_s2 }
 0x37e   :  { %2039 = vrot.lane.b32.xlu0 %v2000_v15, %s5210_s23  ;;  %v6380_v15 = vld [vmem:[#allocation2 + $0x34] sm:$0xff] }
 0x37f   :  { %v6305_v3 = vpop.permute.xlu2 %2149  ;;  %v2142_v40 = vpop.permute.xlu1 %2141 }
 0x380   :  { %v2256_v27 = vpop.permute.xlu0 %2255  ;;  %v2171_v33 = vrot.slane %v2142_v40, 4  ;;  %v2175_v22 = vrot.slane %v6305_v3, 4 }
 0x381   :  { %v2284_v38 = vrot.slane %v2256_v27, 4 }
 0x382   :  { %v2187_v5 = vsel %vm299_vm5, %v2171_v33, %v2172_v20 }
 0x383   :  { %v2299_v54 = vsel %vm299_vm5, %v2283_v55, %v2284_v38  ;;  %v2188_v8 = vsel %vm504_vm7, %v2142_v40, %v2187_v5  ;;  %v6382_v40 = vld [vmem:[#allocation2 + $0x4] sm:$0xff] }
 0x384   :  { %v2300_v24 = vsel %vm617_vm10, %v2254_v28, %v2299_v54  ;;  %2210 = vst.msk [vmem:[#allocation3 + $0x48] sm:$0xff] %vm5409_vm6, %v2188_v8  ;;  %v2008_v28 = vld [vmem:[#allocation2 + $0x78] sm:$0xf] }
 0x385   :  { %2322 = vst.msk [vmem:[#allocation3 + $0x88] sm:$0xff] %vm5409_vm6, %v2300_v24  ;;  %2165 = vrot.lane.b32.xlu1 %v2343_v13, %s5209_s2  ;;  %2277 = vrot.lane.b32.xlu2 %v2343_v13, %s5211_s24 }
 0x386   :  { %2279 = vrot.lane.b32.xlu0 %v2232_v39, %s5211_s24 }
 0x387   :  { %v6318_v52 = vpop.permute.xlu2 %2377  ;;  %v2372_v19 = vpop.permute.xlu1 %2371 }
 0x388   :  { %v2370_v41 = vpop.permute.xlu0 %2369  ;;  %v2398_v6 = vrot.slane %v2372_v19, 4 }
 0x389   :  { %v2397_v31 = vrot.slane %v2370_v41, 4 }
 0x38b   :  { %v2413_v25 = vsel %vm299_vm5, %v2397_v31, %v2398_v6 }
 0x38c   :  { %v2414_v47 = vsel %vm730_vm8, %v2370_v41, %v2413_v25 }
 0x38d   :  { %2435 = vst.msk [vmem:[#allocation3 + $0xd0] sm:$0xff] %vm5409_vm6, %v2414_v47  ;;  %2025 = vrot.lane.b32.xlu1 %v6146_v11, %s5210_s23  ;;  %2037 = vrot.lane.b32.xlu2 %v6226_v7, %s5210_s23  ;;  %v2286_v7 = vrot.slane %v6287_v4, 4  ;;  %v2401_v47 = vrot.slane %v6318_v52, 4 }
 0x38e   :  { %2029 = vrot.lane.b32.xlu0 %v6185_v62, %s5210_s23 }
 0x38f   :  { %v6330_v48 = vpop.permute.xlu2 %2155  ;;  %v2148_v57 = vpop.permute.xlu1 %2147 }
 0x390   :  { %v2146_v50 = vpop.permute.xlu0 %2145  ;;  %v2174_v58 = vrot.slane %v2148_v57, 4  ;;  %v2178_v33 = vrot.slane %v6330_v48, 4 }
 0x391   :  { %v2173_v60 = vrot.slane %v2146_v50, 4 }
 0x393   :  { %v2189_v53 = vsel %vm299_vm5, %v2173_v60, %v2174_v58 }
 0x394   :  { %v2190_v61 = vsel %vm504_vm7, %v2146_v50, %v2189_v53 }
 0x395   :  { %2211 = vst.msk [vmem:[#allocation3 + $0x50] sm:$0xff] %vm5409_vm6, %v2190_v61  ;;  %2055 = vrot.lane.b32.xlu1 %v2008_v28, %s5210_s23  ;;  %2027 = vrot.lane.b32.xlu2 %v1994_v59, %s5210_s23 }
 0x396   :  { %2053 = vrot.lane.b32.xlu0 %v2343_v13, %s5210_s23  ;;  %v2461_v13 = vld [vmem:[#allocation2 + $0x44] sm:$0xff] }
 0x397   :  { %v6339_v11 = vpop.permute.xlu2 %2265  ;;  %v2258_v62 = vpop.permute.xlu1 %2257 }
 0x398   :  { %v2034_v63 = vpop.permute.xlu0 %2033  ;;  %v2285_v56 = vrot.slane %v2258_v62, 4  ;;  %v2289_v59 = vrot.slane %v6339_v11, 4 }
 0x399   :  { %v2061_v35 = vrot.slane %v2034_v63, 4 }
 0x39a   :  { %v2301_v10 = vsel %vm299_vm5, %v2285_v56, %v2286_v7 }
 0x39b   :  { %v2302_v14 = vsel %vm617_vm10, %v2258_v62, %v2301_v10 }
 0x39c   :  { %2323 = vst.msk [vmem:[#allocation3 + $0x90] sm:$0xff] %vm5409_vm6, %v2302_v14 }
 0x39d   :  { %2031 = vrot.lane.b32.xlu1 %v1996_v49, %s5210_s23  ;;  %2485 = vrot.lane.b32.xlu2 %v6346_v29, %s5212_s25 }
 0x39e   :  { %2477 = vrot.lane.b32.xlu0 %v6349_v0, %s5212_s25 }
 0x39f   :  { %v6355_v30 = vpop.permute.xlu2 %2041  ;;  %v2036_v17 = vpop.permute.xlu1 %2035 }
 0x3a0   :  { %v2376_v4 = vpop.permute.xlu0 %2375  ;;  %v2062_v46 = vrot.slane %v2036_v17, 4  ;;  %v2065_v17 = vrot.slane %v6355_v30, 4 }
 0x3a1   :  { %v2400_v18 = vrot.slane %v2376_v4, 4 }
 0x3a2   :  { %v2077_v26 = vsel %vm299_vm5, %v2061_v35, %v2062_v46 }
 0x3a3   :  { %v2415_v2 = vsel %vm299_vm5, %v2399_v1, %v2400_v18  ;;  %v2078_v12 = vsel %vm391_vm9, %v2034_v63, %v2077_v26 }
 0x3a4   :  { %v2416_v9 = vsel %vm730_vm8, %v6296_v44, %v2415_v2  ;;  %2099 = vst.msk [vmem:[#allocation3 + $0x10] sm:$0xff] %vm5409_vm6, %v2078_v12 }
 0x3a5   :  { %2436 = vst.msk [vmem:[#allocation3 + $0xd8] sm:$0xff] %vm5409_vm6, %v2416_v9  ;;  %2481 = vrot.lane.b32.xlu1 %v2461_v13, %s5212_s25  ;;  %2483 = vrot.lane.b32.xlu2 %v6365_v51, %s5212_s25 }
 0x3a6   :  { %2475 = vrot.lane.b32.xlu0 %v6370_v32, %s5212_s25 }
 0x3a7   :  { %v2384_v44 = vpop.permute.xlu2 %2383  ;;  %v2264_v16 = vpop.permute.xlu1 %2263 }
 0x3a8   :  { %v2152_v21 = vpop.permute.xlu0 %2151  ;;  %v2288_v38 = vrot.slane %v2264_v16, 4  ;;  %v2404_v6 = vrot.slane %v2384_v44, 4 }
 0x3a9   :  { %v2176_v23 = vrot.slane %v2152_v21, 4 }
 0x3ab   :  { %v2191_v43 = vsel %vm299_vm5, %v2175_v22, %v2176_v23 }
 0x3ac   :  { %v2192_v36 = vsel %vm504_vm7, %v6305_v3, %v2191_v43 }
 0x3ad   :  { %2212 = vst.msk [vmem:[#allocation3 + $0x58] sm:$0xff] %vm5409_vm6, %v2192_v36  ;;  %2479 = vrot.lane.b32.xlu1 %v6380_v15, %s5212_s25  ;;  %2473 = vrot.lane.b32.xlu2 %v6382_v40, %s5212_s25 }
 0x3ae   :  { %2609 = vrot.lane.b32.xlu0 %v2461_v13, %s5213_s26 }
 0x3af   :  { %v2272_v20 = vpop.permute.xlu2 %2271  ;;  %v2154_v27 = vpop.permute.xlu1 %2153 }
 0x3b0   :  { %v2262_v3 = vpop.permute.xlu0 %2261  ;;  %v2177_v55 = vrot.slane %v2154_v27, 4  ;;  %v2292_v10 = vrot.slane %v2272_v20, 4 }
 0x3b1   :  { %v2287_v5 = vrot.slane %v2262_v3, 4 }
 0x3b2   :  { %v2193_v54 = vsel %vm299_vm5, %v2177_v55, %v2178_v33 }
 0x3b3   :  { %v2303_v8 = vsel %vm299_vm5, %v2287_v5, %v2288_v38  ;;  %v2194_v24 = vsel %vm504_vm7, %v2154_v27, %v2193_v54 }
 0x3b4   :  { %v2304_v39 = vsel %vm617_vm10, %v2262_v3, %v2303_v8  ;;  %2213 = vst.msk [vmem:[#allocation3 + $0x60] sm:$0xff] %vm5409_vm6, %v2194_v24 }
 0x3b5   :  { %2324 = vst.msk [vmem:[#allocation3 + $0x98] sm:$0xff] %vm5409_vm6, %v2304_v39  ;;  %2613 = vrot.lane.b32.xlu1 %v6346_v29, %s5213_s26  ;;  %2605 = vrot.lane.b32.xlu2 %v6349_v0, %s5213_s26 }
 0x3b6   :  { %2607 = vrot.lane.b32.xlu0 %v6380_v15, %s5213_s26 }
 0x3b7   :  { %v2048_v19 = vpop.permute.xlu2 %2047  ;;  %v2382_v41 = vpop.permute.xlu1 %2381 }
 0x3b8   :  { %v2380_v31 = vpop.permute.xlu0 %2379  ;;  %v2403_v25 = vrot.slane %v2382_v41, 4  ;;  %v2068_v2 = vrot.slane %v2048_v19, 4 }
 0x3b9   :  { %v2402_v48 = vrot.slane %v2380_v31, 4 }
 0x3ba   :  { %v2419_v57 = vsel %vm299_vm5, %v2403_v25, %v2404_v6 }
 0x3bb   :  { %v2417_v50 = vsel %vm299_vm5, %v2401_v47, %v2402_v48  ;;  %v2420_v58 = vsel %vm730_vm8, %v2382_v41, %v2419_v57 }
 0x3bc   :  { %v2418_v60 = vsel %vm730_vm8, %v6318_v52, %v2417_v50  ;;  %2438 = vst.msk [vmem:[#allocation3 + $0xe8] sm:$0xff] %vm5409_vm6, %v2420_v58 }
 0x3bd   :  { %2437 = vst.msk [vmem:[#allocation3 + $0xe0] sm:$0xff] %vm5409_vm6, %v2418_v60  ;;  %2611 = vrot.lane.b32.xlu1 %v6365_v51, %s5213_s26  ;;  %2673 = vrot.lane.b32.xlu2 %v2461_v13, %s5214_s27 }
 0x3be   :  { %2487 = vrot.lane.b32.xlu0 %v6248_v45, %s5212_s25 }
 0x3bf   :  { %v2388_v53 = vpop.permute.xlu2 %2387  ;;  %v2160_v61 = vpop.permute.xlu1 %2159 }
 0x3c0   :  { %v2268_v28 = vpop.permute.xlu0 %2267  ;;  %v2180_v9 = vrot.slane %v2160_v61, 4  ;;  %v2406_v36 = vrot.slane %v2388_v53, 4 }
 0x3c1   :  { %v2290_v52 = vrot.slane %v2268_v28, 4 }
 0x3c3   :  { %v2305_v62 = vsel %vm299_vm5, %v2289_v59, %v2290_v52 }
 0x3c4   :  { %v2306_v7 = vsel %vm617_vm10, %v6339_v11, %v2305_v62  ;;  %v2813_v62 = vld [vmem:[%s7104_s7 + $0x20] sm:$0xff] }
 0x3c5   :  { %2325 = vst.msk [vmem:[#allocation3 + $0xa0] sm:$0xff] %vm5409_vm6, %v2306_v7  ;;  %2677 = vrot.lane.b32.xlu1 %v6346_v29, %s5214_s27  ;;  %2545 = vrot.lane.b32.xlu2 %v2461_v13, %s5215_s28 }
 0x3c6   :  { %2601 = vrot.lane.b32.xlu0 %v6382_v40, %s5213_s26 }
 0x3c7   :  { %v2162_v63 = vpop.permute.xlu2 %2161  ;;  %v2270_v56 = vpop.permute.xlu1 %2269 }
 0x3c8   :  { %v2044_v14 = vpop.permute.xlu0 %2043  ;;  %v2291_v49 = vrot.slane %v2270_v56, 4  ;;  %v2181_v33 = vrot.slane %v2162_v63, 4 }
 0x3c9   :  { %v2066_v35 = vrot.slane %v2044_v14, 4 }
 0x3ca   :  { %v2307_v11 = vsel %vm299_vm5, %v2291_v49, %v2292_v10 }
 0x3cb   :  { %v2081_v4 = vsel %vm299_vm5, %v2065_v17, %v2066_v35  ;;  %v2308_v46 = vsel %vm617_vm10, %v2270_v56, %v2307_v11 }
 0x3cc   :  { %v2082_v1 = vsel %vm391_vm9, %v6355_v30, %v2081_v4  ;;  %2326 = vst.msk [vmem:[#allocation3 + $0xa8] sm:$0xff] %vm5409_vm6, %v2308_v46 }
 0x3cd   :  { %2101 = vst.msk [vmem:[#allocation3 + $0x20] sm:$0xff] %vm5409_vm6, %v2082_v1  ;;  %2603 = vrot.lane.b32.xlu1 %v6370_v32, %s5213_s26  ;;  %2615 = vrot.lane.b32.xlu2 %v6248_v45, %s5213_s26  ;;  %v2814_v1 = vld [vmem:[%s7104_s7 + $0x28] sm:$0xff] }
 0x3ce   :  { %2675 = vrot.lane.b32.xlu0 %v6365_v51, %s5214_s27 }
 0x3cf   :  { %v2052_v18 = vpop.permute.xlu2 %2051  ;;  %v2046_v26 = vpop.permute.xlu1 %2045 }
 0x3d0   :  { %v2158_v12 = vpop.permute.xlu0 %2157  ;;  %v2067_v30 = vrot.slane %v2046_v26, 4  ;;  %v2070_v31 = vrot.slane %v2052_v18, 4  ;;  %v2811_v18 = vld [vmem:[%s7104_s7 + $0x10] sm:$0xff] }
 0x3d1   :  { %v2179_v13 = vrot.slane %v2158_v12, 4 }
 0x3d2   :  { %v2083_v44 = vsel %vm299_vm5, %v2067_v30, %v2068_v2 }
 0x3d3   :  { %v2195_v16 = vsel %vm299_vm5, %v2179_v13, %v2180_v9  ;;  %v2084_v21 = vsel %vm391_vm9, %v2046_v26, %v2083_v44 }
 0x3d4   :  { %v2196_v22 = vsel %vm504_vm7, %v2158_v12, %v2195_v16  ;;  %2102 = vst.msk [vmem:[#allocation3 + $0x28] sm:$0xff] %vm5409_vm6, %v2084_v21  ;;  %v2812_v12 = vld [vmem:[%s7104_s7 + $0x18] sm:$0xff]  ;;  %v4714_v16 = vld [vmem:[#allocation3 + $0xe0] sm:$0xf]  ;;  %v5119_v21 = vld [vmem:[#allocation3 + $0xe4] sm:$0xf0] }
 0x3d5   :  { %2214 = vst.msk [vmem:[#allocation3 + $0x68] sm:$0xff] %vm5409_vm6, %v2196_v22  ;;  %2549 = vrot.lane.b32.xlu1 %v6346_v29, %s5215_s28  ;;  %2679 = vrot.lane.b32.xlu2 %v6248_v45, %s5214_s27  ;;  %v23_v22 = vstv %s7105_s16 }
 0x3d6   :  { %2669 = vrot.lane.b32.xlu0 %v6349_v0, %s5214_s27  ;;  %24 = vst [vmem:[#allocation4] sm:$0x1] %v23_v22  ;;  %v5109_v22 = vld [vmem:[#allocation3 + $0x94] sm:$0xf0] }
 0x3d7   :  { %v6462_v23 = vpop.permute.xlu2 %2167  ;;  %v2386_v43 = vpop.permute.xlu1 %2385 }
 0x3d8   :  { %v2164_v20 = vpop.permute.xlu0 %2163  ;;  %v2405_v27 = vrot.slane %v2386_v43, 4  ;;  %v2184_v10 = vrot.slane %v6462_v23, 4 }
 0x3d9   :  { %v2182_v3 = vrot.slane %v2164_v20, 4 }
 0x3da   :  { %v2421_v55 = vsel %vm299_vm5, %v2405_v27, %v2406_v36 }
 0x3db   :  { %v2197_v38 = vsel %vm299_vm5, %v2181_v33, %v2182_v3  ;;  %v2422_v29 = vsel %vm730_vm8, %v2386_v43, %v2421_v55  ;;  %v4715_v3 = vor.u32 %v5119_v21, %v4714_v16  ;;  %v5117_v55 = vld [vmem:[#allocation3 + $0xd4] sm:$0xf0]  ;;  %v3955_v16 = vld [vmem:[%s7107_s14 + $0x28] sm:$0xff]  ;;  %v3952_v21 = vld [vmem:[%s7107_s14 + $0x10] sm:$0xff] }
 0x3dc   :  { %v2198_v5 = vsel %vm504_vm7, %v2162_v63, %v2197_v38  ;;  %2439 = vst.msk [vmem:[#allocation3 + $0xf0] sm:$0xff] %vm5409_vm6, %v2422_v29 }
 0x3dd   :  { %2215 = vst.msk [vmem:[#allocation3 + $0x70] sm:$0xff] %vm5409_vm6, %v2198_v5  ;;  %2671 = vrot.lane.b32.xlu1 %v6380_v15, %s5214_s27  ;;  %2551 = vrot.lane.b32.xlu2 %v6248_v45, %s5215_s28  ;;  %v2809_v5 = vld [vmem:[%s7104_s7] sm:$0xff] }
 0x3de   :  { %2547 = vrot.lane.b32.xlu0 %v6365_v51, %s5215_s28 }
 0x3df   :  { %v2278_v54 = vpop.permute.xlu2 %2277  ;;  %v2276_v8 = vpop.permute.xlu1 %2275 }
 0x3e0   :  { %v2274_v24 = vpop.permute.xlu0 %2273  ;;  %v2294_v39 = vrot.slane %v2276_v8, 4  ;;  %v2295_v35 = vrot.slane %v2278_v54, 4 }
 0x3e1   :  { %v2293_v19 = vrot.slane %v2274_v24, 4 }
 0x3e3   :  { %v2309_v41 = vsel %vm299_vm5, %v2293_v19, %v2294_v39  ;;  %v4722_v30 = vld [vmem:[#allocation3 + $0xf0] sm:$0xf]  ;;  %v3676_v39 = vld [vmem:[%s7106_s9] sm:$0x7] }
 0x3e4   :  { %v2310_v6 = vsel %vm617_vm10, %v2274_v24, %v2309_v41  ;;  %v4658_v8 = vld [vmem:[#allocation3 + $0x70] sm:$0xf] }
 0x3e5   :  { %2327 = vst.msk [vmem:[#allocation3 + $0xb0] sm:$0xff] %vm5409_vm6, %v2310_v6  ;;  %2665 = vrot.lane.b32.xlu1 %v6382_v40, %s5214_s27  ;;  %2667 = vrot.lane.b32.xlu2 %v6370_v32, %s5214_s27  ;;  %v4706_v6 = vld [vmem:[#allocation3 + $0xd0] sm:$0xf] }
 0x3e6   :  { %2541 = vrot.lane.b32.xlu0 %v6349_v0, %s5215_s28 }
 0x3e7   :  { %v2038_v45 = vpop.permute.xlu2 %2037  ;;  %v2050_v51 = vpop.permute.xlu1 %2049 }
 0x3e8   :  { %v2390_v25 = vpop.permute.xlu0 %2389  ;;  %v2069_v47 = vrot.slane %v2050_v51, 4  ;;  %v2063_v61 = vrot.slane %v2038_v45, 4 }
 0x3e9   :  { %v2407_v58 = vrot.slane %v2390_v25, 4 }
 0x3ea   :  { %v2085_v48 = vsel %vm299_vm5, %v2069_v47, %v2070_v31  ;;  %v5115_v31 = vld [vmem:[#allocation3 + $0xc4] sm:$0xf0] }
 0x3eb   :  { %v2086_v57 = vsel %vm391_vm9, %v2050_v51, %v2085_v48  ;;  %v5103_v51 = vld [vmem:[#allocation3 + $0x64] sm:$0xf0]  ;;  %v4650_v48 = vld [vmem:[#allocation3 + $0x60] sm:$0xf] }
 0x3ec   :  { %2103 = vst.msk [vmem:[#allocation3 + $0x30] sm:$0xff] %vm5409_vm6, %v2086_v57 }
 0x3ed   :  { %2543 = vrot.lane.b32.xlu1 %v6380_v15, %s5215_s28  ;;  %2537 = vrot.lane.b32.xlu2 %v6382_v40, %s5215_s28  ;;  %v2815_v15 = vld [vmem:[%s7104_s7 + $0x30] sm:$0xff]  ;;  %v2816_v40 = vld [vmem:[%s7104_s7 + $0x38] sm:$0xff] }
 0x3ee   :  { %2539 = vrot.lane.b32.xlu0 %v6370_v32, %s5215_s28 }
 0x3ef   :  { %v6498_v0 = vpop.permute.xlu2 %2027  ;;  %v2392_v50 = vpop.permute.xlu1 %2391 }
 0x3f0   :  { %v2040_v60 = vpop.permute.xlu0 %2039  ;;  %v2408_v53 = vrot.slane %v2392_v50, 4  ;;  %v2058_v36 = vrot.slane %v6498_v0, 4 }
 0x3f1   :  { %v2064_v28 = vrot.slane %v2040_v60, 4  ;;  %v4698_v60 = vld [vmem:[#allocation3 + $0xc0] sm:$0xf] }
 0x3f2   :  { %v2423_v59 = vsel %vm299_vm5, %v2407_v58, %v2408_v53  ;;  %v4651_v58 = vor.u32 %v5103_v51, %v4650_v48  ;;  %v4666_v51 = vld [vmem:[#allocation3 + $0x80] sm:$0xf]  ;;  %v5104_v48 = vld [vmem:[#allocation3 + $0x74] sm:$0xf] }
 0x3f3   :  { %v2079_v32 = vsel %vm299_vm5, %v2063_v61, %v2064_v28  ;;  %v2424_v52 = vsel %vm730_vm8, %v2390_v25, %v2423_v59  ;;  %v4699_v61 = vor.u32 %v5115_v31, %v4698_v60  ;;  %v5101_v28 = vld [vmem:[#allocation3 + $0x54] sm:$0xf0]  ;;  %v3951_v60 = vld [vmem:[%s7107_s14 + $0x8] sm:$0xff] }
 0x3f4   :  { %v2080_v7 = vsel %vm391_vm9, %v2038_v45, %v2079_v32  ;;  %2440 = vst.msk [vmem:[#allocation3 + $0xf8] sm:$0xff] %vm5409_vm6, %v2424_v52  ;;  %v4707_v45 = vor.u32 %v5117_v55, %v4706_v6 }
 0x3f5   :  { %2100 = vst.msk [vmem:[#allocation3 + $0x18] sm:$0xff] %vm5409_vm6, %v2080_v7  ;;  %2849 = vperm.xlu1 %5199, %v2815_v15   ;;  %2854 = vperm.xlu2 %5200, %v2816_v40   ;;  %v3956_v15 = vld [vmem:[%s7107_s14 + $0x30] sm:$0xff]  ;;  %v3957_v40 = vld [vmem:[%s7107_s14 + $0x38] sm:$0xff] }
 0x3f6   :  { %2839 = vperm.xlu0 %5198, %v2813_v62   ;;  %v3954_v62 = vld [vmem:[%s7107_s14 + $0x20] sm:$0xff]  ;;  %v4642_v7 = vld [vmem:[#allocation3 + $0x50] sm:$0xf] }
 0x3f7   :  { %v2486_v63 = vpop.permute.xlu2 %2485  ;;  %v2166_v56 = vpop.permute.xlu1 %2165 }
 0x3f8   :  { %v2280_v14 = vpop.permute.xlu0 %2279  ;;  %v2495_v49 = vrot.slane %v2486_v63, 4  ;;  %v2183_v17 = vrot.slane %v2166_v56, 4 }
 0x3f9   :  { %v2296_v11 = vrot.slane %v2280_v14, 4 }
 0x3fa   :  { %v2503_v4 = vsel %vm818_vm12, %v2486_v63, %v2495_v49  ;;  %v2199_v46 = vsel %vm299_vm5, %v2183_v17, %v2184_v10  ;;  %v4690_v10 = vld [vmem:[#allocation3 + $0xb0] sm:$0xf]  ;;  %v5099_v49 = vld [vmem:[#allocation3 + $0x44] sm:$0xf0] }
 0x3fb   :  { %v2311_v26 = vsel %vm299_vm5, %v2295_v35, %v2296_v11  ;;  %2519 = vst.msk [vmem:[#allocation3 + $0x170] sm:$0xff] %vm5409_vm6, %v2503_v4  ;;  %v2200_v2 = vsel %vm504_vm7, %v2166_v56, %v2199_v46  ;;  %v5121_v9 = vld [vmem:[#allocation3 + $0xf4] sm:$0xf0]  ;;  %v4643_v56 = vor.u32 %v5101_v28, %v4642_v7  ;;  %v5111_v17 = vld [vmem:[#allocation3 + $0xa4] sm:$0xf0] }
 0x3fc   :  { %v2312_v13 = vsel %vm617_vm10, %v2278_v54, %v2311_v26  ;;  %2216 = vst.msk [vmem:[#allocation3 + $0x78] sm:$0xff] %vm5409_vm6, %v2200_v2  ;;  %v4723_v44 = vor.u32 %v5121_v9, %v4722_v30  ;;  %v2810_v54 = vld [vmem:[%s7104_s7 + $0x8] sm:$0xff]  ;;  %v4634_v4 = vld [vmem:[#allocation3 + $0x40] sm:$0xf] }
 0x3fd   :  { %2328 = vst.msk [vmem:[#allocation3 + $0xb8] sm:$0xff] %vm5409_vm6, %v2312_v13  ;;  %2844 = vperm.xlu1 %5199, %v2814_v1   ;;  %2829 = vperm.xlu2 %5200, %v2811_v18   ;;  %v4635_v2 = vor.u32 %v5099_v49, %v4634_v4  ;;  %v5072_v49 = vld [vmem:[%s7108_s6 + $0x10] sm:$0xf0] }
 0x3fe   :  { %2834 = vperm.xlu0 %5198, %v2812_v12   ;;  %3358 = vmatpush.bf16.msrb.mxu1 %v4723_v44  ;;  %v4682_v12 = vld [vmem:[#allocation3 + $0xa0] sm:$0xf] }
 0x3ff   :  { %v2484_v23 = vpop.permute.xlu2 %2483  ;;  %v2026_v43 = vpop.permute.xlu1 %2025  ;;  %v4683_v9 = vor.u32 %v5111_v17, %v4682_v12 }
 0x400   :  { %v6542_v20 = vpop.permute.xlu0 %2029  ;;  %v2494_v27 = vrot.slane %v2484_v23, 4  ;;  %v2057_v33 = vrot.slane %v2026_v43, 4 }
 0x401   :  { %v2059_v46 = vrot.slane %v6542_v20, 4 }
 0x402   :  { %v2502_v38 = vsel %vm818_vm12, %v2484_v23, %v2494_v27  ;;  %v2073_v29 = vsel %vm299_vm5, %v2057_v33, %v2058_v36  ;;  %3359 = vmatpush.bf16.msrb.mxu1 %v4715_v3  ;;  %v3953_v36 = vld [vmem:[%s7107_s14 + $0x18] sm:$0xff]  ;;  %v4674_v27 = vld [vmem:[#allocation3 + $0x90] sm:$0xf] }
 0x403   :  { %2518 = vst.msk [vmem:[#allocation3 + $0x168] sm:$0xff] %vm5409_vm6, %v2502_v38  ;;  %v2074_v24 = vsel %vm391_vm9, %v2026_v43, %v2073_v29  ;;  %v5105_v19 = vld [vmem:[#allocation3 + $0x74] sm:$0xf0]  ;;  %v4626_v33 = vld [vmem:[#allocation3 + $0x30] sm:$0xf]  ;;  %v4675_v38 = vor.u32 %v5109_v22, %v4674_v27 }
 0x404   :  { %2097 = vst.msk [vmem:[#allocation3] sm:$0xff] %vm5409_vm6, %v2074_v24  ;;  %v4659_v41 = vor.u32 %v5105_v19, %v4658_v8  ;;  %v5113_v32 = vld [vmem:[#allocation3 + $0xb4] sm:$0xf0]  ;;  %v5107_v29 = vld [vmem:[#allocation3 + $0x84] sm:$0xf0] }
 0x405   :  { %2819 = vperm.xlu1 %5199, %v2809_v5   ;;  %2824 = vperm.xlu2 %5200, %v2810_v54   ;;  %v4691_v14 = vor.u32 %v5113_v32, %v4690_v10  ;;  %v4660_v8 = vld [vmem:[#allocation3 + $0x78] sm:$0xf0]  ;;  %v5070_v24 = vld [vmem:[%s7108_s6 + $0x4] sm:$0xf]  ;;  %v4544_v27 = vld [vmem:[%s7108_s6 + $0x3c] sm:$0xf0] }
 0x406   :  { %3679 = vperm.xlu0 %5198, %v3676_v39   ;;  %3329 = vmatpush.bf16.msrb.mxu0 %v4659_v41  ;;  %v4524_v39 = vld [vmem:[%s7108_s6 + $0x14] sm:$0xf0]  ;;  %v4644_v10 = vld [vmem:[#allocation3 + $0x58] sm:$0xf0] }
 0x407   :  { %3360 = vmatpush.bf16.msrb.mxu1 %v4707_v45  ;;  %v2474_v25 = vpop.permute.xlu2 %2473  ;;  %v2056_v47 = vpop.permute.xlu1 %2055  ;;  %v4618_v45 = vld [vmem:[#allocation3 + $0x20] sm:$0xf] }
 0x408   :  { %v2054_v57 = vpop.permute.xlu0 %2053  ;;  %v2489_v0 = vrot.slane %v2474_v25, 4  ;;  %v2072_v50 = vrot.slane %v2056_v47, 4  ;;  %v4667_v47 = vor.u32 %v5107_v29, %v4666_v51  ;;  %v4612_v51 = vld [vmem:[#allocation3 + $0x18] sm:$0xf0] }
 0x409   :  { %v2071_v53 = vrot.slane %v2054_v57, 4 }
 0x40a   :  { %v2497_v59 = vsel %vm818_vm12, %v2474_v25, %v2489_v0  ;;  %3330 = vmatpush.bf16.msrb.mxu0 %v4651_v58  ;;  %v3950_v58 = vld [vmem:[%s7107_s14] sm:$0xff] }
 0x40b   :  { %2513 = vst.msk [vmem:[#allocation3 + $0x140] sm:$0xff] %vm5409_vm6, %v2497_v59  ;;  %v2087_v52 = vsel %vm299_vm5, %v2071_v53, %v2072_v50  ;;  %3361 = vmatpush.bf16.msrb.mxu1 %v4699_v61  ;;  %v4663_v50 = vor.u32 %v5104_v48, %v4660_v8  ;;  %v6611_v53 = vor.u32 %v5070_v24, %v4524_v39  ;;  %v5093_v61 = vld [vmem:[#allocation3 + $0x14] sm:$0xf0]  ;;  %v3839_v59 = vld [vmem:[%s7109_s12] sm:$0x7f] }
 0x40c   :  { %v2088_v63 = vsel %vm391_vm9, %v2054_v57, %v2087_v52  ;;  %v5102_v52 = vld [vmem:[#allocation3 + $0x64] sm:$0xf]  ;;  %v4602_v4 = vld [vmem:[#allocation3] sm:$0xf]  ;;  %v4620_v39 = vld [vmem:[#allocation3 + $0x28] sm:$0xf0] }
 0x40d   :  { %2104 = vst.msk [vmem:[#allocation3 + $0x38] sm:$0xff] %vm5409_vm6, %v2088_v63  ;;  %3990 = vperm.xlu1 %5199, %v3956_v15   ;;  %3995 = vperm.xlu2 %5200, %v3957_v40   ;;  %v4652_v15 = vld [vmem:[#allocation3 + $0x68] sm:$0xf0]  ;;  %v4610_v40 = vld [vmem:[#allocation3 + $0x10] sm:$0xf] }
 0x40e   :  { %3980 = vperm.xlu0 %5198, %v3954_v62   ;;  %3331 = vmatpush.bf16.msrb.mxu0 %v4643_v56  ;;  %v4611_v32 = vor.u32 %v5093_v61, %v4610_v40  ;;  %v4655_v62 = vor.u32 %v5102_v52, %v4652_v15 }
 0x40f   :  { %3362 = vmatpush.bf16.msrb.mxu1 %v4691_v14  ;;  %v2606_v35 = vpop.permute.xlu2 %2605  ;;  %v2032_v11 = vpop.permute.xlu1 %2031  ;;  %v4522_v14 = vld [vmem:[%s7108_s6] sm:$0xf] }
 0x410   :  { %v2478_v1 = vpop.permute.xlu0 %2477  ;;  %v2619_v18 = vrot.slane %v2606_v35, 4  ;;  %v2060_v26 = vrot.slane %v2032_v11, 4 }
 0x411   :  { %v2491_v30 = vrot.slane %v2478_v1, 4 }
 0x412   :  { %v2627_v13 = vsel %vm948_vm11, %v2606_v35, %v2619_v18  ;;  %v2075_v44 = vsel %vm299_vm5, %v2059_v46, %v2060_v26  ;;  %3332 = vmatpush.bf16.msrb.mxu0 %v4635_v2  ;;  %v5100_v18 = vld [vmem:[#allocation3 + $0x54] sm:$0xf] }
 0x413   :  { %v2499_v23 = vsel %vm818_vm12, %v2478_v1, %v2491_v30  ;;  %2643 = vst.msk [vmem:[#allocation3 + $0x1d0] sm:$0xff] %vm5409_vm6, %v2627_v13  ;;  %v2076_v43 = vsel %vm391_vm9, %v6542_v20, %v2075_v44  ;;  %3363 = vmatpush.bf16.msrb.mxu1 %v4683_v9  ;;  %v5095_v20 = vld [vmem:[#allocation3 + $0x24] sm:$0xf0]  ;;  %v4647_v12 = vor.u32 %v5100_v18, %v4644_v10  ;;  %v4081_v30 = vld [vmem:[#allocation4] sm:$0x1] }
 0x414   :  { %2515 = vst.msk [vmem:[#allocation3 + $0x150] sm:$0xff] %vm5409_vm6, %v2499_v23  ;;  %v5097_v3 = vld [vmem:[#allocation3 + $0x34] sm:$0xf0]  ;;  %v4619_v25 = vor.u32 %v5095_v20, %v4618_v45  ;;  %v6632_v9 = vor.u32 %v5072_v49, %v4522_v14  ;;  %v4636_v44 = vld [vmem:[#allocation3 + $0x48] sm:$0xf0] }
 0x415   :  { %2098 = vst.msk [vmem:[#allocation3 + $0x8] sm:$0xff] %vm5409_vm6, %v2076_v43  ;;  %3985 = vperm.xlu1 %5199, %v3955_v16   ;;  %3970 = vperm.xlu2 %5200, %v3952_v21   ;;  %v4627_v55 = vor.u32 %v5097_v3, %v4626_v33  ;;  %v5098_v16 = vld [vmem:[#allocation3 + $0x44] sm:$0xf]  ;;  %v4628_v43 = vld [vmem:[#allocation3 + $0x38] sm:$0xf0] }
 0x416   :  { %3975 = vperm.xlu0 %5198, %v3953_v36   ;;  %v4639_v21 = vor.u32 %v5098_v16, %v4636_v44  ;;  %v5075_v36 = vld [vmem:[%s7108_s6 + $0x2c] sm:$0xf]  ;;  %v5096_v20 = vld [vmem:[#allocation3 + $0x34] sm:$0xf]  ;;  %v4564_v14 = vld [vmem:[%s7108_s6 + $0x64] sm:$0xf0] }
 0x417   :  { %3333 = vmatpush.bf16.msrb.mxu0 %v4627_v55  ;;  %3364 = vmatpush.bf16.msrb.mxu1 %v4675_v38  ;;  %v2674_v5 = vpop.permute.xlu2 %2673  ;;  %v2482_v54 = vpop.permute.xlu1 %2481  ;;  %v6650_v8 = vor.u32 %v5075_v36, %v4544_v27  ;;  %v5080_v10 = vld [vmem:[%s7108_s6 + $0x54] sm:$0xf]  ;;  %v4786_v18 = vld [vmem:[#allocation3 + $0x170] sm:$0xf] }
 0x418   :  { %v2476_v19 = vpop.permute.xlu0 %2475  ;;  %v2685_v41 = vrot.slane %v2674_v5, 4  ;;  %v2493_v6 = vrot.slane %v2482_v54, 4 }
 0x419   :  { %v2490_v31 = vrot.slane %v2476_v19, 4 }
 0x41a   :  { %v2693_v57 = vsel %vm1013_vm13, %v2674_v5, %v2685_v41  ;;  %v2501_v0 = vsel %vm818_vm12, %v2482_v54, %v2493_v6  ;;  %v4631_v54 = vor.u32 %v5096_v20, %v4628_v43 }
 0x41b   :  { %v2498_v28 = vsel %vm818_vm12, %v2476_v19, %v2490_v31  ;;  %2709 = vst.msk [vmem:[#allocation3 + $0x220] sm:$0xff] %vm5409_vm6, %v2693_v57  ;;  %3334 = vmatpush.bf16.msrb.mxu0 %v4619_v25  ;;  %3365 = vmatpush.bf16.msrb.mxu1 %v4667_v47  ;;  %v5094_v19 = vld [vmem:[#allocation3 + $0x24] sm:$0xf]  ;;  %v4542_v31 = vld [vmem:[%s7108_s6 + $0x28] sm:$0xf] }
 0x41c   :  { %2514 = vst.msk [vmem:[#allocation3 + $0x148] sm:$0xff] %vm5409_vm6, %v2498_v28  ;;  %v5091_v7 = vld [vmem:[#allocation3 + $0x4] sm:$0xf0]  ;;  %v4623_v41 = vor.u32 %v5094_v19, %v4620_v39  ;;  %v5077_v25 = vld [vmem:[%s7108_s6 + $0x38] sm:$0xf0] }
 0x41d   :  { %2517 = vst.msk [vmem:[#allocation3 + $0x160] sm:$0xff] %vm5409_vm6, %v2501_v0  ;;  %3960 = vperm.xlu1 %5199, %v3950_v58   ;;  %3965 = vperm.xlu2 %5200, %v3951_v60   ;;  %v4603_v1 = vor.u32 %v5091_v7, %v4602_v4  ;;  %v6668_v28 = vor.u32 %v5077_v25, %v4542_v31  ;;  %v4604_v40 = vld [vmem:[#allocation3 + $0x8] sm:$0xf0] }
 0x41e   :  { %3842 = vperm.xlu0 %5198, %v3839_v59   ;;  %3366 = vmatmul.bf16.vlgmr.msrb.gmra.mxu1 %v6611_v53  ;;  %v4780_v39 = vld [vmem:[#allocation3 + $0x168] sm:$0xf0] }
 0x41f   :  { %3474 = vmatpush.bf16.msra.mxu1 %v4663_v50  ;;  %3335 = vmatpush.bf16.msrb.mxu0 %v4611_v32  ;;  %v2546_v63 = vpop.permute.xlu2 %2545  ;;  %v2480_v56 = vpop.permute.xlu1 %2479  ;;  %v5092_v50 = vld [vmem:[#allocation3 + $0x14] sm:$0xf] }
 0x420   :  { %v2610_v17 = vpop.permute.xlu0 %2609  ;;  %v2557_v35 = vrot.slane %v2546_v63, 4  ;;  %v2492_v11 = vrot.slane %v2480_v56, 4  ;;  %v4615_v61 = vor.u32 %v5092_v50, %v4612_v51 }
 0x421   :  { %v2621_v46 = vrot.slane %v2610_v17, 4 }
 0x422   :  { %v2565_v26 = vsel %vm883_vm14, %v2546_v63, %v2557_v35  ;;  %v2500_v2 = vsel %vm818_vm12, %v2480_v56, %v2492_v11 }
 0x423   :  { %3475 = vmatpush.bf16.msra.mxu1 %v4655_v62  ;;  %v2629_v13 = vsel %vm948_vm11, %v2610_v17, %v2621_v46  ;;  %2581 = vst.msk [vmem:[#allocation3 + $0x1a0] sm:$0xff] %vm5409_vm6, %v2565_v26  ;;  %3336 = vmatpush.bf16.msrb.mxu0 %v4603_v1  ;;  %v5090_v62 = vld [vmem:[#allocation3 + $0x4] sm:$0xf]  ;;  %v6686_v1 = vor.u32 %v5080_v10, %v4564_v14  ;;  %v5136_v26 = vld [vmem:[#allocation3 + $0x174] sm:$0xf] }
 0x424   :  { %2645 = vst.msk [vmem:[#allocation3 + $0x1e0] sm:$0xff] %vm5409_vm6, %v2629_v13  ;;  %v4607_v7 = vor.u32 %v5090_v62, %v4604_v40  ;;  %v5134_v36 = vld [vmem:[#allocation3 + $0x164] sm:$0xf]  ;;  %v4764_v40 = vld [vmem:[#allocation3 + $0x148] sm:$0xf0] }
 0x425   :  { %2516 = vst.msk [vmem:[#allocation3 + $0x158] sm:$0xff] %vm5409_vm6, %v2500_v2  ;;  %4084 = vperm.xlu1 %5199, %v4081_v30   ;;  %v4762_v62 = vld [vmem:[#allocation3 + $0x140] sm:$0xf] }
 0x426   :  { %3337 = vmatmul.bf16.vlgmr.msrb.gmra.mxu0 %v6632_v9 }
 0x427   :  { %3476 = vmatpush.bf16.msra.mxu1 %v4647_v12  ;;  %v2616_v22 = vpop.permute.xlu2 %2615  ;;  %v2614_v23 = vpop.permute.xlu1 %2613 }
 0x428   :  { %v2608_v33 = vpop.permute.xlu0 %2607  ;;  %v2624_v3 = vrot.slane %v2616_v22, 4  ;;  %v2623_v55 = vrot.slane %v2614_v23, 4 }
 0x429   :  { %v2620_v38 = vrot.slane %v2608_v33, 4 }
 0x42a   :  { %v2632_v29 = vsel %vm948_vm11, %v2616_v22, %v2624_v3  ;;  %v2631_v5 = vsel %vm948_vm11, %v2614_v23, %v2623_v55  ;;  %v4778_v23 = vld [vmem:[#allocation3 + $0x160] sm:$0xf]  ;;  %v5135_v3 = vld [vmem:[#allocation3 + $0x164] sm:$0xf0]  ;;  %v4562_v55 = vld [vmem:[%s7108_s6 + $0x50] sm:$0xf] }
 0x42b   :  { %3477 = vmatpush.bf16.msra.mxu1 %v4639_v21  ;;  %v2628_v24 = vsel %vm948_vm11, %v2608_v33, %v2620_v38  ;;  %2648 = vst.msk [vmem:[#allocation3 + $0x1f8] sm:$0xff] %vm5409_vm6, %v2632_v29  ;;  %v4842_v44 = vld [vmem:[#allocation3 + $0x1e0] sm:$0xf]  ;;  %v5082_v38 = vld [vmem:[%s7108_s6 + $0x60] sm:$0xf0] }
 0x42c   :  { %2644 = vst.msk [vmem:[#allocation3 + $0x1d8] sm:$0xff] %vm5409_vm6, %v2628_v24  ;;  %v4834_v24 = vld [vmem:[#allocation3 + $0x1d0] sm:$0xf]  ;;  %v6709_v25 = vor.u32 %v5082_v38, %v4562_v55  ;;  %v4746_v55 = vld [vmem:[#allocation3 + $0x120] sm:$0xf] }
 0x42d   :  { %2647 = vst.msk [vmem:[#allocation3 + $0x1f0] sm:$0xff] %vm5409_vm6, %v2631_v5 }
 0x42e   :  { %3371 = vmatmul.bf16.gmra.mxu1 %v6650_v8 }
 0x42f   :  { %3478 = vmatpush.bf16.msra.mxu1 %v4631_v54  ;;  %v2680_v6 = vpop.permute.xlu2 %2679  ;;  %v2612_v45 = vpop.permute.xlu1 %2611  ;;  %v4779_v54 = vor.u32 %v5135_v3, %v4778_v23 }
 0x430   :  { %v2488_v47 = vpop.permute.xlu0 %2487  ;;  %v2688_v48 = vrot.slane %v2680_v6, 4  ;;  %v2622_v57 = vrot.slane %v2612_v45, 4 }
 0x431   :  { %v2496_v0 = vrot.slane %v2488_v47, 4 }
 0x432   :  { %v2696_v58 = vsel %vm1013_vm13, %v2680_v6, %v2688_v48  ;;  %v2630_v60 = vsel %vm948_vm11, %v2612_v45, %v2622_v57  ;;  %v5153_v59 = vld [vmem:[#allocation3 + $0x1f4] sm:$0xf0]  ;;  %v6705_v6 = vor.u32 %v5134_v36, %v4780_v39  ;;  %v4770_v57 = vld [vmem:[#allocation3 + $0x150] sm:$0xf] }
 0x433   :  { %3479 = vmatpush.bf16.msra.mxu1 %v4623_v41  ;;  %v2504_v15 = vsel %vm818_vm12, %v2488_v47, %v2496_v0  ;;  %2712 = vst.msk [vmem:[#allocation3 + $0x238] sm:$0xff] %vm5409_vm6, %v2696_v58  ;;  %v5149_v43 = vld [vmem:[#allocation3 + $0x1d4] sm:$0xf0]  ;;  %v4772_v47 = vld [vmem:[#allocation3 + $0x158] sm:$0xf0] }
 0x434   :  { %2520 = vst.msk [vmem:[#allocation3 + $0x178] sm:$0xff] %vm5409_vm6, %v2504_v15  ;;  %v4850_v32 = vld [vmem:[#allocation3 + $0x1f0] sm:$0xf]  ;;  %v4835_v41 = vor.u32 %v5149_v43, %v4834_v24  ;;  %v5133_v45 = vld [vmem:[#allocation3 + $0x154] sm:$0xf0] }
 0x435   :  { %2646 = vst.msk [vmem:[#allocation3 + $0x1e8] sm:$0xff] %vm5409_vm6, %v2630_v60  ;;  %v4851_v52 = vor.u32 %v5153_v59, %v4850_v32  ;;  %v5132_v0 = vld [vmem:[#allocation3 + $0x154] sm:$0xf]  ;;  %v4771_v50 = vor.u32 %v5133_v45, %v4770_v57  ;;  %v5131_v15 = vld [vmem:[#allocation3 + $0x144] sm:$0xf0] }
 0x436   :  { %3342 = vmatmul.bf16.gmra.mxu0 %v6668_v28  ;;  %v6719_v59 = vor.u32 %v5132_v0, %v4772_v47  ;;  %v5125_v45 = vld [vmem:[#allocation3 + $0x114] sm:$0xf0]  ;;  %v4738_v57 = vld [vmem:[#allocation3 + $0x110] sm:$0xf]  ;;  %v4740_v0 = vld [vmem:[#allocation3 + $0x118] sm:$0xf0] }
 0x437   :  { %3480 = vmatpush.bf16.msra.mxu1 %v4615_v61  ;;  %3416 = vmatpush.bf16.msrb.mxu3 %v4851_v52  ;;  %v2552_v63 = vpop.permute.xlu2 %2551  ;;  %v2678_v56 = vpop.permute.xlu1 %2677 }
 0x438   :  { %v2602_v49 = vpop.permute.xlu0 %2601  ;;  %v2560_v17 = vrot.slane %v2552_v63, 4  ;;  %v2687_v35 = vrot.slane %v2678_v56, 4 }
 0x439   :  { %v2617_v11 = vrot.slane %v2602_v49, 4 }
 0x43a   :  { %v2568_v4 = vsel %vm883_vm14, %v2552_v63, %v2560_v17  ;;  %v2695_v46 = vsel %vm1013_vm13, %v2678_v56, %v2687_v35  ;;  %v5161_v60 = vld [vmem:[#allocation3 + $0x234] sm:$0xf0]  ;;  %v4584_v63 = vld [vmem:[%s7108_s6 + $0x8c] sm:$0xf0]  ;;  %v5130_v17 = vld [vmem:[#allocation3 + $0x144] sm:$0xf] }
 0x43b   :  { %3481 = vmatpush.bf16.msra.mxu1 %v4607_v7  ;;  %v2625_v2 = vsel %vm948_vm11, %v2602_v49, %v2617_v11  ;;  %2584 = vst.msk [vmem:[#allocation3 + $0x1b8] sm:$0xff] %vm5409_vm6, %v2568_v4  ;;  %v5137_v12 = vld [vmem:[#allocation3 + $0x174] sm:$0xf0]  ;;  %v4788_v30 = vld [vmem:[#allocation3 + $0x178] sm:$0xf0]  ;;  %v4763_v49 = vor.u32 %v5131_v15, %v4762_v62  ;;  %v6729_v11 = vor.u32 %v5130_v17, %v4764_v40 }
 0x43c   :  { %2641 = vst.msk [vmem:[#allocation3 + $0x1c0] sm:$0xff] %vm5409_vm6, %v2625_v2  ;;  %v4787_v13 = vor.u32 %v5137_v12, %v4786_v18  ;;  %v5151_v16 = vld [vmem:[#allocation3 + $0x1e4] sm:$0xf0]  ;;  %v6693_v21 = vor.u32 %v5136_v26, %v4788_v30  ;;  %v5085_v7 = vld [vmem:[%s7108_s6 + $0x7c] sm:$0xf] }
 0x43d   :  { %2711 = vst.msk [vmem:[#allocation3 + $0x230] sm:$0xff] %vm5409_vm6, %v2695_v46  ;;  %v4843_v22 = vor.u32 %v5151_v16, %v4842_v44  ;;  %v5129_v4 = vld [vmem:[#allocation3 + $0x134] sm:$0xf0]  ;;  %v6733_v26 = vor.u32 %v5085_v7, %v4584_v63  ;;  %v4754_v2 = vld [vmem:[#allocation3 + $0x130] sm:$0xf] }
 0x43e   :  { %3376 = vmatmul.bf16.gmra.mxu1 %v6686_v1  ;;  %3387 = vmatpush.bf16.msra.mxu2 %v4787_v13  ;;  %v4756_v12 = vld [vmem:[#allocation3 + $0x138] sm:$0xf0]  ;;  %v4874_v13 = vld [vmem:[#allocation3 + $0x220] sm:$0xf]  ;;  %v4755_v16 = vor.u32 %v5129_v4, %v4754_v2  ;;  %v5124_v15 = vld [vmem:[#allocation3 + $0x114] sm:$0xf] }
 0x43f   :  { %3417 = vmatpush.bf16.msrb.mxu3 %v4843_v22  ;;  %3532 = vmatpush.bf16.msrb.mxu1 %v6693_v21  ;;  %v2668_v27 = vpop.permute.xlu2 %2667  ;;  %v2604_v33 = vpop.permute.xlu1 %2603  ;;  %v5123_v40 = vld [vmem:[#allocation3 + $0x104] sm:$0xf0]  ;;  %v5073_v7 = vld [vmem:[%s7108_s6 + $0x18] sm:$0xf0]  ;;  %v5120_v4 = vld [vmem:[#allocation3 + $0xf4] sm:$0xf] }
 0x440   :  { %v2676_v20 = vpop.permute.xlu0 %2675  ;;  %v2682_v29 = vrot.slane %v2668_v27, 4  ;;  %v2618_v5 = vrot.slane %v2604_v33, 4  ;;  %v4530_v62 = vld [vmem:[%s7108_s6 + $0x8] sm:$0xf] }
 0x441   :  { %v2686_v19 = vrot.slane %v2676_v20, 4  ;;  %v6774_v2 = vor.u32 %v5073_v7, %v4530_v62 }
 0x442   :  { %v2690_v51 = vsel %vm1013_vm13, %v2668_v27, %v2682_v29  ;;  %v2626_v31 = vsel %vm948_vm11, %v2604_v33, %v2618_v5  ;;  %3388 = vmatpush.bf16.msra.mxu2 %v4779_v54  ;;  %v5128_v27 = vld [vmem:[#allocation3 + $0x134] sm:$0xf]  ;;  %v5127_v33 = vld [vmem:[#allocation3 + $0x124] sm:$0xf0]  ;;  %v4582_v29 = vld [vmem:[%s7108_s6 + $0x78] sm:$0xf] }
 0x443   :  { %v2694_v48 = vsel %vm1013_vm13, %v2676_v20, %v2686_v19  ;;  %2706 = vst.msk [vmem:[#allocation3 + $0x208] sm:$0xff] %vm5409_vm6, %v2690_v51  ;;  %3418 = vmatpush.bf16.msrb.mxu3 %v4835_v41  ;;  %3533 = vmatpush.bf16.msrb.mxu1 %v6705_v6  ;;  %v4826_v22 = vld [vmem:[#allocation3 + $0x1c0] sm:$0xf]  ;;  %v6744_v3 = vor.u32 %v5128_v27, %v4756_v12  ;;  %v4748_v20 = vld [vmem:[#allocation3 + $0x128] sm:$0xf0] }
 0x444   :  { %2710 = vst.msk [vmem:[#allocation3 + $0x228] sm:$0xff] %vm5409_vm6, %v2694_v48  ;;  %v4882_v58 = vld [vmem:[#allocation3 + $0x230] sm:$0xf]  ;;  %v5087_v5 = vld [vmem:[%s7108_s6 + $0x88] sm:$0xf0]  ;;  %v4747_v39 = vor.u32 %v5127_v33, %v4746_v55 }
 0x445   :  { %2642 = vst.msk [vmem:[#allocation3 + $0x1c8] sm:$0xff] %vm5409_vm6, %v2626_v31  ;;  %v4883_v61 = vor.u32 %v5161_v60, %v4882_v58  ;;  %v5126_v41 = vld [vmem:[#allocation3 + $0x124] sm:$0xf]  ;;  %v6756_v47 = vor.u32 %v5087_v5, %v4582_v29  ;;  %v5145_v60 = vld [vmem:[#allocation3 + $0x1b4] sm:$0xf0] }
 0x446   :  { %3347 = vmatmul.bf16.gmra.mxu0 %v6709_v25  ;;  %3389 = vmatpush.bf16.msra.mxu2 %v4771_v50  ;;  %v6754_v31 = vor.u32 %v5126_v41, %v4748_v20  ;;  %v4739_v50 = vor.u32 %v5125_v45, %v4738_v57  ;;  %v5118_v12 = vld [vmem:[#allocation3 + $0xe4] sm:$0xf]  ;;  %v4852_v57 = vld [vmem:[#allocation3 + $0x1f8] sm:$0xf0] }
 0x447   :  { %3449 = vmatpush.bf16.msra.mxu0 %v4883_v61  ;;  %3534 = vmatpush.bf16.msrb.mxu1 %v6719_v59  ;;  %v2538_v32 = vpop.permute.xlu2 %2537  ;;  %v2550_v52 = vpop.permute.xlu1 %2549 }
 0x448   :  { %v2670_v56 = vpop.permute.xlu0 %2669  ;;  %v2553_v10 = vrot.slane %v2538_v32, 4  ;;  %v2559_v14 = vrot.slane %v2550_v52, 4 }
 0x449   :  { %v2683_v35 = vrot.slane %v2670_v56, 4 }
 0x44a   :  { %v2561_v46 = vsel %vm883_vm14, %v2538_v32, %v2553_v10  ;;  %v2567_v18 = vsel %vm883_vm14, %v2550_v52, %v2559_v14  ;;  %3390 = vmatpush.bf16.msra.mxu2 %v4763_v49  ;;  %v6765_v32 = vor.u32 %v5124_v15, %v4740_v0  ;;  %v4724_v52 = vld [vmem:[#allocation3 + $0xf8] sm:$0xf0]  ;;  %v4732_v10 = vld [vmem:[#allocation3 + $0x108] sm:$0xf0] }
 0x44b   :  { %v2691_v30 = vsel %vm1013_vm13, %v2670_v56, %v2683_v35  ;;  %2577 = vst.msk [vmem:[#allocation3 + $0x180] sm:$0xff] %vm5409_vm6, %v2561_v46  ;;  %3535 = vmatpush.bf16.msrb.mxu1 %v6729_v11  ;;  %v5159_v44 = vld [vmem:[#allocation3 + $0x224] sm:$0xf0]  ;;  %v4730_v56 = vld [vmem:[#allocation3 + $0x100] sm:$0xf] }
 0x44c   :  { %2707 = vst.msk [vmem:[#allocation3 + $0x210] sm:$0xff] %vm5409_vm6, %v2691_v30  ;;  %v5147_v23 = vld [vmem:[#allocation3 + $0x1c4] sm:$0xf0]  ;;  %v4875_v43 = vor.u32 %v5159_v44, %v4874_v13  ;;  %v4731_v17 = vor.u32 %v5123_v40, %v4730_v56  ;;  %v5122_v35 = vld [vmem:[#allocation3 + $0x104] sm:$0xf] }
 0x44d   :  { %2583 = vst.msk [vmem:[#allocation3 + $0x1b0] sm:$0xff] %vm5409_vm6, %v2567_v18  ;;  %v4827_v36 = vor.u32 %v5147_v23, %v4826_v22  ;;  %v4727_v18 = vor.u32 %v5120_v4, %v4724_v52  ;;  %v4716_v30 = vld [vmem:[#allocation3 + $0xe8] sm:$0xf0]  ;;  %v6777_v44 = vor.u32 %v5122_v35, %v4732_v10  ;;  %v5160_v23 = vld [vmem:[#allocation3 + $0x234] sm:$0xf] }
 0x44e   :  { %3381 = vmatmul.bf16.gmra.mxu1 %v6733_v26  ;;  %3391 = vmatpush.bf16.msra.mxu2 %v4755_v16  ;;  %v4719_v29 = vor.u32 %v5118_v12, %v4716_v30  ;;  %v4876_v5 = vld [vmem:[#allocation3 + $0x228] sm:$0xf0]  ;;  %v5155_v40 = vld [vmem:[#allocation3 + $0x204] sm:$0xf0]  ;;  %v5114_v56 = vld [vmem:[#allocation3 + $0xc4] sm:$0xf] }
 0x44f   :  { %3419 = vmatpush.bf16.msrb.mxu3 %v4827_v36  ;;  %3450 = vmatpush.bf16.msra.mxu0 %v4875_v43  ;;  %v2672_v38 = vpop.permute.xlu1 %2671  ;;  %v4810_v36 = vld [vmem:[#allocation3 + $0x1a0] sm:$0xf]  ;;  %v4692_v35 = vld [vmem:[#allocation3 + $0xb8] sm:$0xf0]  ;;  %v4844_v4 = vld [vmem:[#allocation3 + $0x1e8] sm:$0xf0] }
 0x450   :  { %3536 = vmatpush.bf16.msrb.mxu1 %v6744_v3  ;;  %v2548_v54 = vpop.permute.xlu0 %2547  ;;  %v2684_v24 = vrot.slane %v2672_v38, 4  ;;  %v5078_v12 = vld [vmem:[%s7108_s6 + $0x40] sm:$0xf0] }
 0x451   :  { %v2558_v19 = vrot.slane %v2548_v54, 4  ;;  %v5150_v30 = vld [vmem:[#allocation3 + $0x1e4] sm:$0xf] }
 0x452   :  { %v2692_v51 = vsel %vm1013_vm13, %v2672_v38, %v2684_v24  ;;  %3392 = vmatpush.bf16.msra.mxu2 %v4747_v39  ;;  %v4884_v38 = vld [vmem:[#allocation3 + $0x238] sm:$0xf0]  ;;  %v5158_v39 = vld [vmem:[#allocation3 + $0x224] sm:$0xf] }
 0x453   :  { %v2566_v48 = vsel %vm883_vm14, %v2548_v54, %v2558_v19  ;;  %2708 = vst.msk [vmem:[#allocation3 + $0x218] sm:$0xff] %vm5409_vm6, %v2692_v51  ;;  %v4866_v16 = vld [vmem:[#allocation3 + $0x210] sm:$0xf]  ;;  %v4887_v20 = vor.u32 %v5160_v23, %v4884_v38  ;;  %v4708_v54 = vld [vmem:[#allocation3 + $0xd8] sm:$0xf0] }
 0x454   :  { %2582 = vst.msk [vmem:[#allocation3 + $0x1a8] sm:$0xff] %vm5409_vm6, %v2566_v48  ;;  %3537 = vmatpush.bf16.msrb.mxu1 %v6754_v31  ;;  %v4818_v58 = vld [vmem:[#allocation3 + $0x1b0] sm:$0xf]  ;;  %v5116_v19 = vld [vmem:[#allocation3 + $0xd4] sm:$0xf] }
 0x455   :  { %v4819_v61 = vor.u32 %v5145_v60, %v4818_v58  ;;  %v4700_v51 = vld [vmem:[#allocation3 + $0xc8] sm:$0xf0]  ;;  %v5152_v48 = vld [vmem:[#allocation3 + $0x1f4] sm:$0xf]  ;;  %v4711_v58 = vor.u32 %v5116_v19, %v4708_v54  ;;  %v4538_v60 = vld [vmem:[%s7108_s6 + $0x10] sm:$0xf] }
 0x456   :  { %3352 = vmatmul.bf16.gmra.mxu0 %v6756_v47  ;;  %3393 = vmatpush.bf16.msra.mxu2 %v4739_v50  ;;  %v4879_v50 = vor.u32 %v5158_v39, %v4876_v5  ;;  %v4855_v10 = vor.u32 %v5152_v48, %v4852_v57  ;;  %v4684_v38 = vld [vmem:[#allocation3 + $0xa8] sm:$0xf0]  ;;  %v5110_v5 = vld [vmem:[#allocation3 + $0xa4] sm:$0xf]  ;;  %v4676_v48 = vld [vmem:[#allocation3 + $0x98] sm:$0xf0] }
 0x457   :  { %3420 = vmatpush.bf16.msrb.mxu3 %v4819_v61  ;;  %v2666_v63 = vpop.permute.xlu1 %2665  ;;  %v4687_v39 = vor.u32 %v5110_v5, %v4684_v38  ;;  %v4828_v19 = vld [vmem:[#allocation3 + $0x1c8] sm:$0xf0] }
 0x458   :  { %3538 = vmatpush.bf16.msrb.mxu1 %v6765_v32  ;;  %v2542_v14 = vpop.permute.xlu0 %2541  ;;  %v2681_v49 = vrot.slane %v2666_v63, 4 }
 0x459   :  { %v2555_v46 = vrot.slane %v2542_v14, 4 }
 0x45a   :  { %v2689_v13 = vsel %vm1013_vm13, %v2666_v63, %v2681_v49  ;;  %3394 = vmatpush.bf16.msra.mxu2 %v4731_v17  ;;  %v5157_v22 = vld [vmem:[#allocation3 + $0x214] sm:$0xf0]  ;;  %v4868_v52 = vld [vmem:[#allocation3 + $0x218] sm:$0xf0]  ;;  %v5156_v63 = vld [vmem:[#allocation3 + $0x214] sm:$0xf]  ;;  %v4703_v17 = vor.u32 %v5114_v56, %v4700_v51 }
 0x45b   :  { %v2563_v43 = vsel %vm883_vm14, %v2542_v14, %v2555_v46  ;;  %2705 = vst.msk [vmem:[#allocation3 + $0x200] sm:$0xff] %vm5409_vm6, %v2689_v13  ;;  %v5143_v27 = vld [vmem:[#allocation3 + $0x1a4] sm:$0xf0]  ;;  %v4867_v33 = vor.u32 %v5157_v22, %v4866_v16  ;;  %v4871_v49 = vor.u32 %v5156_v63, %v4868_v52  ;;  %v4860_v13 = vld [vmem:[#allocation3 + $0x208] sm:$0xf0]  ;;  %v4847_v22 = vor.u32 %v5150_v30, %v4844_v4 }
 0x45c   :  { %2579 = vst.msk [vmem:[#allocation3 + $0x190] sm:$0xff] %vm5409_vm6, %v2563_v43  ;;  %3539 = vmatpush.bf16.msrb.mxu1 %v6777_v44  ;;  %v4811_v55 = vor.u32 %v5143_v27, %v4810_v36  ;;  %v5112_v16 = vld [vmem:[#allocation3 + $0xb4] sm:$0xf]  ;;  %v4836_v27 = vld [vmem:[#allocation3 + $0x1d8] sm:$0xf0] }
 0x45d   :  { %3395 = vmatmul.bf16.vlgmr.msra.gmra.mxu2 %v6774_v2  ;;  %3451 = vmatpush.bf16.msra.mxu0 %v4867_v33  ;;  %v4695_v43 = vor.u32 %v5112_v16, %v4692_v35  ;;  %v4794_v51 = vld [vmem:[#allocation3 + $0x180] sm:$0xf]  ;;  %v4820_v52 = vld [vmem:[#allocation3 + $0x1b8] sm:$0xf0]  ;;  %v4552_v30 = vld [vmem:[%s7108_s6 + $0x44] sm:$0xf0] }
 0x45e   :  { %3503 = vmatpush.bf16.msrb.mxu2 %v4727_v18  ;;  %3421 = vmatpush.bf16.msrb.mxu3 %v4811_v55  ;;  %v4550_v18 = vld [vmem:[%s7108_s6 + $0x30] sm:$0xf] }
 0x45f   :  { %3482 = vmatmul.bf16.vlgmr.msra.gmra.mxu1 %v6632_v9  ;;  %v2544_v24 = vpop.permute.xlu1 %2543  ;;  %v5074_v9 = vld [vmem:[%s7108_s6 + $0x20] sm:$0xf0]  ;;  %v6809_v36 = vor.u32 %v5078_v12, %v4550_v18  ;;  %v5076_v12 = vld [vmem:[%s7108_s6 + $0x34] sm:$0xf] }
 0x460   :  { %3594 = vmatpush.bf16.msra.mxu1 %v4887_v20  ;;  %v2540_v41 = vpop.permute.xlu0 %2539  ;;  %v2556_v45 = vrot.slane %v2544_v24, 4  ;;  %v6799_v14 = vor.u32 %v5074_v9, %v4538_v60  ;;  %v4555_v16 = vor.u32 %v5076_v12, %v4552_v30 }
 0x461   :  { %v2554_v0 = vrot.slane %v2540_v41, 4 }
 0x462   :  { %3504 = vmatpush.bf16.msrb.mxu2 %v4719_v29  ;;  %v2564_v61 = vsel %vm883_vm14, %v2544_v24, %v2556_v45  ;;  %v4858_v15 = vld [vmem:[#allocation3 + $0x200] sm:$0xf]  ;;  %v5154_v46 = vld [vmem:[#allocation3 + $0x204] sm:$0xf]  ;;  %v5148_v29 = vld [vmem:[#allocation3 + $0x1d4] sm:$0xf] }
 0x463   :  { %v2562_v62 = vsel %vm883_vm14, %v2540_v41, %v2554_v0  ;;  %2580 = vst.msk [vmem:[#allocation3 + $0x198] sm:$0xff] %vm5409_vm6, %v2564_v61  ;;  %v4859_v7 = vor.u32 %v5155_v40, %v4858_v15  ;;  %v4863_v23 = vor.u32 %v5154_v46, %v4860_v13  ;;  %v4802_v33 = vld [vmem:[#allocation3 + $0x190] sm:$0xf]  ;;  %v4839_v54 = vor.u32 %v5148_v29, %v4836_v27  ;;  %v5071_v41 = vld [vmem:[%s7108_s6 + $0xc] sm:$0xf] }
 0x464   :  { %3595 = vmatpush.bf16.msra.mxu1 %v4879_v50  ;;  %2578 = vst.msk [vmem:[#allocation3 + $0x188] sm:$0xff] %vm5409_vm6, %v2562_v62  ;;  %v4532_v45 = vld [vmem:[%s7108_s6 + $0x1c] sm:$0xf0]  ;;  %v5146_v0 = vld [vmem:[#allocation3 + $0x1c4] sm:$0xf] }
 0x465   :  { %3452 = vmatpush.bf16.msra.mxu0 %v4859_v7  ;;  %v5108_v50 = vld [vmem:[#allocation3 + $0x94] sm:$0xf]  ;;  %v6819_v60 = vor.u32 %v5071_v41, %v4532_v45  ;;  %v4558_v15 = vld [vmem:[%s7108_s6 + $0x38] sm:$0xf]  ;;  %v4668_v40 = vld [vmem:[#allocation3 + $0x88] sm:$0xf0] }
 0x466   :  { %3505 = vmatpush.bf16.msrb.mxu2 %v4711_v58  ;;  %v4831_v58 = vor.u32 %v5146_v0, %v4828_v19  ;;  %v4679_v9 = vor.u32 %v5108_v50, %v4676_v48  ;;  %v5144_v61 = vld [vmem:[#allocation3 + $0x1b4] sm:$0xf]  ;;  %v5106_v62 = vld [vmem:[#allocation3 + $0x84] sm:$0xf] }
 0x467   :  { %v4823_v7 = vor.u32 %v5144_v61, %v4820_v52  ;;  %v4671_v56 = vor.u32 %v5106_v62, %v4668_v40  ;;  %v5140_v46 = vld [vmem:[#allocation3 + $0x194] sm:$0xf] }
 0x468   :  { %3596 = vmatpush.bf16.msra.mxu1 %v4871_v49  ;;  %4888 = vmatmul.msk.bf16.vlgmr.msra.gmra.mxu0 %vm1642_vm15, %v6799_v14  ;;  %v4570_v49 = vld [vmem:[%s7108_s6 + $0x58] sm:$0xf]  ;;  %v5088_v27 = vld [vmem:[%s7108_s6 + $0x90] sm:$0xf0] }
 0x469   :  { %3561 = vmatpush.bf16.msrb.mxu0 %v4855_v10  ;;  %v4812_v10 = vld [vmem:[#allocation3 + $0x1a8] sm:$0xf0] }
 0x46a   :  { %3506 = vmatpush.bf16.msrb.mxu2 %v4703_v17  ;;  %v5141_v55 = vld [vmem:[#allocation3 + $0x194] sm:$0xf0]  ;;  %v5142_v17 = vld [vmem:[#allocation3 + $0x1a4] sm:$0xf] }
 0x46b   :  { %v4803_v20 = vor.u32 %v5141_v55, %v4802_v33  ;;  %v5139_v24 = vld [vmem:[#allocation3 + $0x184] sm:$0xf0]  ;;  %v4815_v35 = vor.u32 %v5142_v17, %v4812_v10  ;;  %v4796_v13 = vld [vmem:[#allocation3 + $0x188] sm:$0xf0]  ;;  %v6874_v55 = vpop.permute.xlu1 %2849 }
 0x46c   :  { %3597 = vmatpush.bf16.msra.mxu1 %v4863_v23  ;;  %v4795_v57 = vor.u32 %v5139_v24, %v4794_v51  ;;  %v4578_v23 = vld [vmem:[%s7108_s6 + $0x60] sm:$0xf] }
 0x46d   :  { %3562 = vmatpush.bf16.msrb.mxu0 %v4847_v22  ;;  %3400 = vmatmul.bf16.gmra.mxu2 %v6809_v36 }
 0x46e   :  { %3507 = vmatpush.bf16.msrb.mxu2 %v4695_v43  ;;  %3422 = vmatpush.bf16.msrb.mxu3 %v4803_v20  ;;  %v5084_v43 = vld [vmem:[%s7108_s6 + $0x70] sm:$0xf0]  ;;  %v5089_v20 = vld [vmem:[%s7108_s6 + $0x98] sm:$0xf0] }
 0x46f   :  { %3487 = vmatmul.bf16.gmra.mxu1 %v6668_v28  ;;  %v5079_v28 = vld [vmem:[%s7108_s6 + $0x48] sm:$0xf0] }
 0x470   :  { %v6829_v63 = vor.u32 %v5079_v28, %v4558_v15 }
 0x471   :  { %3563 = vmatpush.bf16.msrb.mxu0 %v4839_v54 }
 0x472   :  { %3508 = vmatpush.bf16.msrb.mxu2 %v4687_v39  ;;  %3423 = vmatpush.bf16.msrb.mxu3 %v4795_v57 }
 0x473   :  { %v6884_v5 = vpop.permute.xlu1 %2844 }
 0x475   :  { %3564 = vmatpush.bf16.msrb.mxu0 %v4831_v58  ;;  %3424 = vmatmul.bf16.vlgmr.msrb.gmra.mxu3 %v6819_v60 }
 0x476   :  { %5181 = vmatpush.bf16.msra.mxu3 %v6693_v21  ;;  %3509 = vmatpush.bf16.msrb.mxu2 %v4679_v9  ;;  %v5083_v21 = vld [vmem:[%s7108_s6 + $0x68] sm:$0xf0] }
 0x477   :  { %v6840_v4 = vor.u32 %v5083_v21, %v4570_v49 }
 0x478   :  { %4889 = vmatmul.msk.bf16.gmra.mxu0 %vm1642_vm15, %v6829_v63 }
 0x479   :  { %3565 = vmatpush.bf16.msrb.mxu0 %v4823_v7 }
 0x47a   :  { %5182 = vmatpush.bf16.msra.mxu3 %v6705_v6  ;;  %3510 = vmatpush.bf16.msrb.mxu2 %v4671_v56  ;;  %v4804_v6 = vld [vmem:[#allocation3 + $0x198] sm:$0xf0] }
 0x47b   :  { %v4807_v18 = vor.u32 %v5140_v46, %v4804_v6  ;;  %v6895_v39 = vpop.permute.xlu1 %2819 }
 0x47d   :  { %3566 = vmatpush.bf16.msrb.mxu0 %v4815_v35  ;;  %3405 = vmatmul.bf16.gmra.mxu2 %v6840_v4 }
 0x47e   :  { %5183 = vmatpush.bf16.msra.mxu3 %v6719_v59  ;;  %v5138_v59 = vld [vmem:[#allocation3 + $0x184] sm:$0xf] }
 0x47f   :  { %3492 = vmatmul.bf16.gmra.mxu1 %v6709_v25  ;;  %v4799_v22 = vor.u32 %v5138_v59, %v4796_v13  ;;  %v4579_v25 = vor.u32 %v5084_v43, %v4578_v23 }
 0x481   :  { %3567 = vmatpush.bf16.msrb.mxu0 %v4807_v18 }
 0x482   :  { %5184 = vmatpush.bf16.msra.mxu3 %v6729_v11  ;;  %v4590_v11 = vld [vmem:[%s7108_s6 + $0x80] sm:$0xf] }
 0x483   :  { %v4591_v33 = vor.u32 %v5088_v27, %v4590_v11 }
 0x485   :  { %3568 = vmatpush.bf16.msrb.mxu0 %v4799_v22  ;;  %3429 = vmatmul.bf16.gmra.mxu3 %v4555_v16 }
 0x486   :  { %5185 = vmatpush.bf16.msra.mxu3 %v6744_v3  ;;  %v5081_v3 = vld [vmem:[%s7108_s6 + $0x5c] sm:$0xf] }
 0x488   :  { %4890 = vmatmul.msk.bf16.gmra.mxu0 %vm1642_vm15, %v4579_v25 }
 0x48a   :  { %5186 = vmatpush.bf16.msra.mxu3 %v6754_v31  ;;  %v4572_v31 = vld [vmem:[%s7108_s6 + $0x6c] sm:$0xf0] }
 0x48b   :  { %v4575_v38 = vor.u32 %v5081_v3, %v4572_v31 }
 0x48d   :  { %3410 = vmatmul.bf16.gmra.mxu2 %v4591_v33 }
 0x48e   :  { %5187 = vmatpush.bf16.msra.mxu3 %v6765_v32  ;;  %v4598_v32 = vld [vmem:[%s7108_s6 + $0x88] sm:$0xf] }
 0x48f   :  { %3497 = vmatmul.bf16.gmra.mxu1 %v6756_v47  ;;  %v4599_v29 = vor.u32 %v5089_v20, %v4598_v32  ;;  %v5086_v47 = vld [vmem:[%s7108_s6 + $0x84] sm:$0xf] }
 0x492   :  { %5188 = vmatpush.bf16.msra.mxu3 %v6777_v44  ;;  %v4592_v44 = vld [vmem:[%s7108_s6 + $0x94] sm:$0xf0] }
 0x493   :  { %v4595_v24 = vor.u32 %v5086_v47, %v4592_v44 }
 0x495   :  { %3434 = vmatmul.bf16.gmra.mxu3 %v4575_v38 }
 0x498   :  { %4891 = vmatmul.msk.bf16.gmra.mxu0 %vm1642_vm15, %v4599_v29 }
 0x49b   :  { %v3367_v54 = vpop.f32.mrf.mxu1 }
 0x49d   :  { %3511 = vmatmul.bf16.vlgmr.msrb.gmra.mxu2 %v6611_v53  ;;  %v6898_v53 = vpop.permute.xlu2 %2854 }
 0x49f   :  { %3540 = vmatmul.bf16.vlgmr.msrb.gmra.mxu1 %v6774_v2 }
 0x4a3   :  { %v3338_v19 = vpop.f32.mrf.mxu0  ;;  %v3369_v41 = vpop.f32.mrf.mxu1 }
 0x4a4   :  { %v3339_v45 = vadd.f32 %v3338_v19, %v6895_v39 }
 0x4a5   :  { %3439 = vmatmul.bf16.gmra.mxu3 %v4595_v24  ;;  %v6904_v2 = vpop.permute.xlu2 %2829 }
 0x4a6   :  { %v3368_v51 = vadd.f32 %v3367_v54, %v3339_v45 }
 0x4a8   :  { %3569 = vmatmul.bf16.vlgmr.msrb.gmra.mxu0 %v6819_v60 }
 0x4ab   :  { %v3340_v48 = vpop.f32.mrf.mxu0  ;;  %v3372_v57 = vpop.f32.mrf.mxu1 }
 0x4ad   :  { %3516 = vmatmul.bf16.gmra.mxu2 %v6650_v8  ;;  %v6913_v8 = vpop.permute.xlu0 %2839 }
 0x4af   :  { %4892 = vmatmul.msk.bf16.vlgmr.msra.gmra.mxu1 %vm1642_vm15, %v6799_v14 }
 0x4b3   :  { %v3343_v0 = vpop.f32.mrf.mxu0  ;;  %v6906_v50 = vpop.f32.mrf.mxu1 }
 0x4b4   :  { %v3344_v58 = vadd.f32 %v3343_v0, %v6904_v2 }
 0x4b5   :  { %3545 = vmatmul.bf16.vlgmr.msra.gmra.mxu3 %v6809_v36  ;;  %v6940_v19 = vpop.permute.xlu0 %2834 }
 0x4b6   :  { %v3373_v9 = vadd.f32 %v3372_v57, %v3344_v58 }
 0x4b8   :  { %3574 = vmatmul.bf16.gmra.mxu0 %v4555_v16 }
 0x4bb   :  { %v3345_v61 = vpop.f32.mrf.mxu0  ;;  %v3377_v60 = vpop.f32.mrf.mxu1 }
 0x4bd   :  { %3521 = vmatmul.bf16.gmra.mxu2 %v6686_v1 }
 0x4bf   :  { %4893 = vmatmul.msk.bf16.gmra.mxu1 %vm1642_vm15, %v6829_v63 }
 0x4c3   :  { %v3348_v14 = vpop.f32.mrf.mxu0  ;;  %v3379_v15 = vpop.f32.mrf.mxu1 }
 0x4c4   :  { %v3349_v28 = vadd.f32 %v3348_v14, %v6913_v8 }
 0x4c5   :  { %3550 = vmatmul.bf16.gmra.mxu3 %v6840_v4 }
 0x4c6   :  { %v3378_v40 = vadd.f32 %v3377_v60, %v3349_v28 }
 0x4c8   :  { %3579 = vmatmul.bf16.gmra.mxu0 %v4575_v38 }
 0x4cb   :  { %v3350_v36 = vpop.f32.mrf.mxu0  ;;  %v3382_v52 = vpop.f32.mrf.mxu1 }
 0x4cc   :  { %v3351_v47 = vadd.f32 %v3350_v36, %v6884_v5 }
 0x4cd   :  { %3526 = vmatmul.bf16.gmra.mxu2 %v6733_v26  ;;  %v6924_v26 = vpop.permute.xlu2 %2824 }
 0x4ce   :  { %v3341_v4 = vadd.f32 %v3340_v48, %v6924_v26 }
 0x4cf   :  { %4894 = vmatmul.msk.bf16.gmra.mxu1 %vm1642_vm15, %v4579_v25 }
 0x4d0   :  { %v3370_v18 = vadd.f32 %v3369_v41, %v3341_v4  ;;  %v3380_v41 = vadd.f32 %v3379_v15, %v3351_v47 }
 0x4d3   :  { %v3353_v1 = vpop.f32.mrf.mxu0  ;;  %v3384_v62 = vpop.f32.mrf.mxu1 }
 0x4d4   :  { %v3354_v7 = vadd.f32 %v3353_v1, %v6874_v55 }
 0x4d5   :  { %3555 = vmatmul.bf16.gmra.mxu3 %v4591_v33 }
 0x4d6   :  { %v3383_v63 = vadd.f32 %v3382_v52, %v3354_v7 }
 0x4d8   :  { %3584 = vmatmul.bf16.gmra.mxu0 %v4595_v24 }
 0x4db   :  { %v3355_v56 = vpop.f32.mrf.mxu0 }
 0x4dc   :  { %v6920_v10 = vpop.f32.mrf.mxu1  ;;  %v3356_v49 = vadd.f32 %v3355_v56, %v6898_v53 }
 0x4de   :  { %v3385_v21 = vadd.f32 %v3384_v62, %v3356_v49 }
 0x4df   :  { %4895 = vmatmul.msk.bf16.gmra.mxu1 %vm1642_vm15, %v4599_v29 }
 0x4e0   :  { %v3396_v17 = vpop.f32.mrf.mxu2 }
 0x4e1   :  { %v3397_v35 = vadd.f32 %v3396_v17, %v3368_v51  ;;  %v3346_v51 = vadd.f32 %v3345_v61, %v6940_v19 }
 0x4e3   :  { %v3375_v60 = vadd.f32 %v6906_v50, %v3346_v51 }
 0x4e4   :  { %v6927_v6 = vpop.f32.mrf.mxu1 }
 0x4e5   :  { %v3454_v46 = vpop.f32.mrf.mxu0 }
 0x4e8   :  { %v3398_v12 = vpop.f32.mrf.mxu2 }
 0x4e9   :  { %v3399_v30 = vadd.f32 %v3398_v12, %v3370_v18 }
 0x4ec   :  { %v6929_v13 = vpop.f32.mrf.mxu1 }
 0x4ed   :  { %v3456_v59 = vpop.f32.mrf.mxu0 }
 0x4f0   :  { %v3401_v16 = vpop.f32.mrf.mxu2 }
 0x4f1   :  { %v3402_v22 = vadd.f32 %v3401_v16, %v3373_v9 }
 0x4f4   :  { %v6931_v23 = vpop.f32.mrf.mxu1 }
 0x4f5   :  { %v3459_v43 = vpop.f32.mrf.mxu0 }
 0x4f8   :  { %v3425_v25 = vpop.f32.mrf.mxu3  ;;  %v3403_v11 = vpop.f32.mrf.mxu2 }
 0x4f9   :  { %v3426_v27 = vadd.f32 %v3425_v25, %v3397_v35 }
 0x4fb   :  { %v3455_v33 = vadd.f32 %v3454_v46, %v3426_v27 }
 0x4fc   :  { %v6933_v3 = vpop.f32.mrf.mxu1 }
 0x4fd   :  { %v3461_v31 = vpop.f32.mrf.mxu0 }
 0x500   :  { %v3427_v38 = vpop.f32.mrf.mxu3  ;;  %v3406_v32 = vpop.f32.mrf.mxu2 }
 0x501   :  { %v3428_v20 = vadd.f32 %v3427_v38, %v3399_v30  ;;  %v3407_v29 = vadd.f32 %v3406_v32, %v3378_v40  ;;  %v3404_v40 = vadd.f32 %v3403_v11, %v3375_v60 }
 0x503   :  { %v6935_v54 = vadd.f32 %v3456_v59, %v3428_v20  ;;  %v3619_v20 = vmax.f32 %v3455_v33, 0.0  ;;  %v3489_v33 = vadd.f32 %v6929_v13, %v6904_v2  ;;  %v3491_v2 = vadd.f32 %v6931_v23, %v6940_v19 }
 0x504   :  { %v6938_v44 = vpop.f32.mrf.mxu1  ;;  %v3494_v23 = vadd.f32 %v6933_v3, %v6913_v8 }
 0x505   :  { %v3464_v24 = vpop.f32.mrf.mxu0  ;;  %v3621_v60 = vmax.f32 %v6935_v54, 0.0  ;;  %v3496_v8 = vadd.f32 %v6938_v44, %v6884_v5 }
 0x508   :  { %v3430_v45 = vpop.f32.mrf.mxu3  ;;  %v3408_v48 = vpop.f32.mrf.mxu2 }
 0x509   :  { %v3431_v57 = vadd.f32 %v3430_v45, %v3402_v22  ;;  %v3409_v0 = vadd.f32 %v3408_v48, %v3380_v41  ;;  %v3635_v41 = vmul.f32 %v3619_v20, %v5401_v34 }
 0x50b   :  { %v6943_v58 = vadd.f32 %v3459_v43, %v3431_v57 }
 0x50c   :  { %v3498_v9 = vpop.f32.mrf.mxu1 }
 0x50d   :  { %v6947_v14 = vadd.f32 %v3498_v9, %v6874_v55  ;;  %v3466_v28 = vpop.f32.mrf.mxu0  ;;  %v3623_v13 = vmax.f32 %v6943_v58, 0.0 }
 0x510   :  { %v3432_v36 = vpop.f32.mrf.mxu3  ;;  %v3411_v52 = vpop.f32.mrf.mxu2 }
 0x511   :  { %v3433_v1 = vadd.f32 %v3432_v36, %v3404_v40  ;;  %v3412_v15 = vadd.f32 %v3411_v52, %v3383_v63  ;;  %v3484_v63 = vadd.f32 %v6920_v10, %v6895_v39 }
 0x513   :  { %v6949_v62 = vadd.f32 %v3461_v31, %v3433_v1 }
 0x514   :  { %v3500_v61 = vpop.f32.mrf.mxu1 }
 0x515   :  { %v6952_v7 = vadd.f32 %v3500_v61, %v6898_v53  ;;  %v3469_v56 = vpop.f32.mrf.mxu0  ;;  %v3625_v19 = vmax.f32 %v6949_v62, 0.0 }
 0x518   :  { %v3435_v49 = vpop.f32.mrf.mxu3  ;;  %v3413_v17 = vpop.f32.mrf.mxu2 }
 0x519   :  { %v3436_v35 = vadd.f32 %v3435_v49, %v3407_v29  ;;  %v3414_v50 = vadd.f32 %v3413_v17, %v3385_v21  ;;  %v3486_v21 = vadd.f32 %v6927_v6, %v6924_v26 }
 0x51b   :  { %v6954_v4 = vadd.f32 %v3464_v24, %v3436_v35 }
 0x51c   :  { %v3541_v55 = vpop.f32.mrf.mxu1 }
 0x51d   :  { %v3471_v46 = vpop.f32.mrf.mxu0  ;;  %v3627_v3 = vmax.f32 %v6954_v4, 0.0 }
 0x520   :  { %v3437_v18 = vpop.f32.mrf.mxu3  ;;  %v3512_v30 = vpop.f32.mrf.mxu2 }
 0x521   :  { %v3438_v12 = vadd.f32 %v3437_v18, %v3409_v0  ;;  %v3513_v53 = vadd.f32 %v3512_v30, %v3484_v63  ;;  %v3639_v30 = vmul.f32 %v3623_v13, %v5401_v34 }
 0x523   :  { %v6958_v59 = vadd.f32 %v3466_v28, %v3438_v12  ;;  %v3542_v25 = vadd.f32 %v3541_v55, %v3513_v53 }
 0x524   :  { %v3543_v16 = vpop.f32.mrf.mxu1 }
 0x525   :  { %v3570_v22 = vpop.f32.mrf.mxu0  ;;  %v3629_v5 = vmax.f32 %v6958_v59, 0.0 }
 0x526   :  { %v3571_v31 = vadd.f32 %v3570_v22, %v3542_v25 }
 0x528   :  { %v3440_v43 = vpop.f32.mrf.mxu3  ;;  %v3514_v27 = vpop.f32.mrf.mxu2 }
 0x529   :  { %v3441_v11 = vadd.f32 %v3440_v43, %v3412_v15  ;;  %v3515_v29 = vadd.f32 %v3514_v27, %v3486_v21  ;;  %v3637_v15 = vmul.f32 %v3621_v60, %v5401_v34 }
 0x52b   :  { %v6962_v38 = vadd.f32 %v3469_v56, %v3441_v11  ;;  %v3544_v51 = vadd.f32 %v3543_v16, %v3515_v29 }
 0x52c   :  { %v3599_v32 = vpop.f32.mrf.mxu1 }
 0x52d   :  { %v3600_v47 = vadd.f32 %v3599_v32, %v3571_v31  ;;  %v3572_v39 = vpop.f32.mrf.mxu0  ;;  %v3641_v32 = vmul.f32 %v3625_v19, %v5401_v34  ;;  %v3631_v59 = vmax.f32 %v6962_v38, 0.0 }
 0x52e   :  { %v3573_v9 = vadd.f32 %v3572_v39, %v3544_v51 }
 0x52f   :  { %v3620_v10 = vmax.f32 %v3600_v47, 0.0 }
 0x530   :  { %v3442_v24 = vpop.f32.mrf.mxu3  ;;  %v3517_v57 = vpop.f32.mrf.mxu2 }
 0x531   :  { %v3636_v45 = vmul.f32 %v3620_v10, %v5403_v37  ;;  %v3443_v48 = vadd.f32 %v3442_v24, %v3414_v50  ;;  %v3518_v36 = vadd.f32 %v3517_v57, %v3489_v33  ;;  %v3643_v57 = vmul.f32 %v3627_v3, %v5401_v34 }
 0x533   :  { %v3651_v0 = vpack.c.bf16 %v3636_v45, %v3635_v41  ;;  %v6966_v26 = vadd.f32 %v3471_v46, %v3443_v48 }
 0x534   :  { %v3601_v6 = vpop.f32.mrf.mxu1 }
 0x535   :  { %3659 = vst.msk [vmem:[#allocation2 + $0x4] sm:$0xff] %vm5409_vm6, %v3651_v0  ;;  %v3602_v28 = vadd.f32 %v3601_v6, %v3573_v9  ;;  %v3575_v40 = vpop.f32.mrf.mxu0 }
 0x537   :  { %v3622_v52 = vmax.f32 %v3602_v28, 0.0 }
 0x538   :  { %v3546_v1 = vpop.f32.mrf.mxu3  ;;  %v3519_v56 = vpop.f32.mrf.mxu2 }
 0x539   :  { %v3638_v61 = vmul.f32 %v3622_v52, %v5403_v37  ;;  %v3547_v49 = vadd.f32 %v3546_v1, %v3518_v36  ;;  %v3520_v46 = vadd.f32 %v3519_v56, %v3491_v2  ;;  %v3645_v1 = vmul.f32 %v3629_v5, %v5401_v34  ;;  %v5178_v5 = vld [vmem:[%s7110_s17 + $0x40] sm:$0xff] }
 0x53a   :  { %3923 = vmatpush.bf16.msrb.mxu3 %v5178_v5 }
 0x53b   :  { %v3652_v17 = vpack.c.bf16 %v3638_v61, %v3637_v15  ;;  %v3576_v35 = vadd.f32 %v3575_v40, %v3547_v49 }
 0x53c   :  { %v3604_v50 = vpop.f32.mrf.mxu1 }
 0x53d   :  { %3660 = vst.msk [vmem:[#allocation2 + $0x14] sm:$0xff] %vm5409_vm6, %v3652_v17  ;;  %v3605_v54 = vadd.f32 %v3604_v50, %v3576_v35  ;;  %v3577_v55 = vpop.f32.mrf.mxu0 }
 0x53e   :  { %4046 = vmatpush.bf16.msra.mxu3 %v5178_v5 }
 0x53f   :  { %v3624_v18 = vmax.f32 %v3605_v54, 0.0  ;;  %v3647_v54 = vmul.f32 %v3631_v59, %v5401_v34 }
 0x540   :  { %v3548_v12 = vpop.f32.mrf.mxu3  ;;  %v3522_v16 = vpop.f32.mrf.mxu2 }
 0x541   :  { %v3640_v63 = vmul.f32 %v3624_v18, %v5403_v37  ;;  %v3549_v53 = vadd.f32 %v3548_v12, %v3520_v46  ;;  %v3523_v27 = vadd.f32 %v3522_v16, %v3494_v23  ;;  %v3633_v16 = vmax.f32 %v6966_v26, 0.0  ;;  %v5177_v26 = vld [vmem:[%s7110_s17 + $0x38] sm:$0xff] }
 0x542   :  { %4010 = vmatpush.bf16.msra.mxu0 %v5177_v26 }
 0x543   :  { %v3653_v22 = vpack.c.bf16 %v3640_v63, %v3639_v30  ;;  %v3578_v43 = vadd.f32 %v3577_v55, %v3549_v53 }
 0x544   :  { %v3606_v25 = vpop.f32.mrf.mxu1 }
 0x545   :  { %3661 = vst.msk [vmem:[#allocation2 + $0x24] sm:$0xff] %vm5409_vm6, %v3653_v22  ;;  %v3607_v58 = vadd.f32 %v3606_v25, %v3578_v43  ;;  %v3580_v11 = vpop.f32.mrf.mxu0 }
 0x547   :  { %v3626_v21 = vmax.f32 %v3607_v58, 0.0 }
 0x548   :  { %v3551_v31 = vpop.f32.mrf.mxu3  ;;  %v3524_v29 = vpop.f32.mrf.mxu2 }
 0x549   :  { %v3642_v20 = vmul.f32 %v3626_v21, %v5403_v37  ;;  %v3552_v47 = vadd.f32 %v3551_v31, %v3523_v27  ;;  %v3525_v45 = vadd.f32 %v3524_v29, %v3496_v8  ;;  %v5175_v21 = vld [vmem:[%s7110_s17 + $0x28] sm:$0xff]  ;;  %v4898_v29 = vld [vmem:[#allocation2 + $0x4] sm:$0xf]  ;;  %v3675_v8 = vld [vmem:[%s7111_s8] sm:$0x3] }
 0x54b   :  { %v3654_v39 = vpack.c.bf16 %v3642_v20, %v3641_v32  ;;  %v3581_v10 = vadd.f32 %v3580_v11, %v3552_v47  ;;  %v5163_v32 = vld [vmem:[#allocation2 + $0x10] sm:$0xf0]  ;;  %v5174_v47 = vld [vmem:[%s7110_s17 + $0x20] sm:$0xff] }
 0x54c   :  { %v3609_v24 = vpop.f32.mrf.mxu1  ;;  %v4906_v42 = vld [vmem:[#allocation2 + $0x24] sm:$0xf] }
 0x54d   :  { %3662 = vst.msk [vmem:[#allocation2 + $0x34] sm:$0xff] %vm5409_vm6, %v3654_v39  ;;  %v3610_v62 = vadd.f32 %v3609_v24, %v3581_v10  ;;  %v3582_v41 = vpop.f32.mrf.mxu0  ;;  %v4899_v39 = vor.u32 %v5163_v32, %v4898_v29  ;;  %v3793_v32 = vld [vmem:[%s7114_s13 + $0x20] sm:$0xff] }
 0x54e   :  { %v3805_v29 = vunpack.c.l.bf16 %v3793_v32 }
 0x54f   :  { %v3628_v51 = vmax.f32 %v3610_v62, 0.0  ;;  %v5173_v62 = vld [vmem:[%s7110_s17 + $0x18] sm:$0xff] }
 0x550   :  { %v3553_v48 = vpop.f32.mrf.mxu3  ;;  %v3527_v6 = vpop.f32.mrf.mxu2 }
 0x551   :  { %v3644_v0 = vmul.f32 %v3628_v51, %v5403_v37  ;;  %v3554_v9 = vadd.f32 %v3553_v48, %v3525_v45  ;;  %v3528_v4 = vadd.f32 %v3527_v6, %v6947_v14  ;;  %v5164_v48 = vld [vmem:[#allocation2 + $0x28] sm:$0xf] }
 0x553   :  { %v3655_v33 = vpack.c.bf16 %v3644_v0, %v3643_v57  ;;  %v3583_v60 = vadd.f32 %v3582_v41, %v3554_v9  ;;  %v4900_v0 = vld [vmem:[#allocation2 + $0x14] sm:$0xf0]  ;;  %v5162_v9 = vld [vmem:[#allocation2 + $0x8] sm:$0xf] }
 0x554   :  { %v3611_v28 = vpop.f32.mrf.mxu1  ;;  %v5165_v27 = vld [vmem:[#allocation2 + $0x30] sm:$0xf0]  ;;  %v4908_v51 = vld [vmem:[#allocation2 + $0x34] sm:$0xf0]  ;;  %v4903_v6 = vor.u32 %v5162_v9, %v4900_v0 }
 0x555   :  { %3663 = vst.msk [vmem:[#allocation2 + $0x44] sm:$0xff] %vm5409_vm6, %v3655_v33  ;;  %v3612_v44 = vadd.f32 %v3611_v28, %v3583_v60  ;;  %v3585_v36 = vpop.f32.mrf.mxu0  ;;  %v4907_v31 = vor.u32 %v5165_v27, %v4906_v42  ;;  %v4911_v57 = vor.u32 %v5164_v48, %v4908_v51  ;;  %v5172_v33 = vld [vmem:[%s7110_s17 + $0x10] sm:$0xff]  ;;  %v5171_v60 = vld [vmem:[%s7110_s17 + $0x8] sm:$0xff]  ;;  %v5170_v28 = vld [vmem:[%s7110_s17] sm:$0xff] }
 0x556   :  { %v3795_v48 = vld [vmem:[%s7114_s13 + $0x30] sm:$0xff] }
 0x557   :  { %v3630_v40 = vmax.f32 %v3612_v44, 0.0  ;;  %v3771_v44 = vld [vmem:[%s7112_s10] sm:$0xff]  ;;  %v3809_v0 = vunpack.c.l.bf16 %v3795_v48 }
 0x558   :  { %v3556_v52 = vpop.f32.mrf.mxu3  ;;  %v3529_v17 = vpop.f32.mrf.mxu2 }
 0x559   :  { %v3646_v15 = vmul.f32 %v3630_v40, %v5403_v37  ;;  %v3557_v61 = vadd.f32 %v3556_v52, %v3528_v4  ;;  %v3530_v14 = vadd.f32 %v3529_v17, %v6952_v7  ;;  %v3649_v7 = vmul.f32 %v3633_v16, %v5401_v34  ;;  %v5176_v34 = vld [vmem:[%s7110_s17 + $0x30] sm:$0xff]  ;;  %v3680_v4 = vpop.permute.xlu0 %3679  ;;  %v3789_v52 = vld [vmem:[%s7114_s13] sm:$0xff]  ;;  %v3792_v16 = vld [vmem:[%s7114_s13 + $0x18] sm:$0xff] }
 0x55a   :  { %4011 = vmatpush.bf16.msra.mxu0 %v5176_v34  ;;  %v3797_v17 = vunpack.c.l.bf16 %v3789_v52 }
 0x55b   :  { %v3656_v56 = vpack.c.bf16 %v3646_v15, %v3645_v1  ;;  %v3586_v49 = vadd.f32 %v3585_v36, %v3557_v61  ;;  %v3778_v36 = vld [vmem:[%s7113_s11] sm:$0xff]  ;;  %v3790_v1 = vld [vmem:[%s7114_s13 + $0x8] sm:$0xff]  ;;  %v3772_v61 = vunpack.c.l.bf16 %v3771_v44 }
 0x55c   :  { %v3614_v35 = vpop.f32.mrf.mxu1  ;;  %v4914_v11 = vld [vmem:[#allocation2 + $0x44] sm:$0xf]  ;;  %v5166_v41 = vld [vmem:[#allocation2 + $0x48] sm:$0xf] }
 0x55d   :  { %3664 = vst.msk [vmem:[#allocation2 + $0x54] sm:$0xff] %vm5409_vm6, %v3656_v56  ;;  %v3615_v50 = vadd.f32 %v3614_v35, %v3586_v49  ;;  %v3587_v18 = vpop.f32.mrf.mxu0  ;;  %v3779_v49 = vunpack.c.l.bf16 %v3778_v36  ;;  %v3799_v35 = vunpack.c.l.bf16 %v3790_v1 }
 0x55e   :  { %4012 = vmatpush.bf16.msra.mxu0 %v5175_v21 }
 0x55f   :  { %v3632_v2 = vmax.f32 %v3615_v50, 0.0 }
 0x560   :  { %v3558_v13 = vpop.f32.mrf.mxu3 }
 0x561   :  { %v3648_v55 = vmul.f32 %v3632_v2, %v5403_v37  ;;  %v3559_v46 = vadd.f32 %v3558_v13, %v3530_v14 }
 0x562   :  { %4013 = vmatpush.bf16.msra.mxu0 %v5174_v47 }
 0x563   :  { %v3657_v12 = vpack.c.bf16 %v3648_v55, %v3647_v54  ;;  %v3588_v30 = vadd.f32 %v3587_v18, %v3559_v46 }
 0x564   :  { %v3616_v63 = vpop.f32.mrf.mxu1  ;;  %v5167_v58 = vld [vmem:[#allocation2 + $0x50] sm:$0xf0]  ;;  %v4916_v3 = vld [vmem:[#allocation2 + $0x54] sm:$0xf0] }
 0x565   :  { %3665 = vst.msk [vmem:[#allocation2 + $0x64] sm:$0xff] %vm5409_vm6, %v3657_v12  ;;  %v3617_v38 = vadd.f32 %v3616_v63, %v3588_v30  ;;  %v4919_v45 = vor.u32 %v5166_v41, %v4916_v3  ;;  %v3791_v63 = vld [vmem:[%s7114_s13 + $0x10] sm:$0xff] }
 0x566   :  { %4014 = vmatpush.bf16.msra.mxu0 %v5173_v62 }
 0x567   :  { %v3634_v53 = vmax.f32 %v3617_v38, 0.0 }
 0x569   :  { %v3650_v22 = vmul.f32 %v3634_v53, %v5403_v37  ;;  %v4915_v37 = vor.u32 %v5167_v58, %v4914_v11 }
 0x56a   :  { %4015 = vmatpush.bf16.msra.mxu0 %v5172_v33 }
 0x56b   :  { %v3658_v43 = vpack.c.bf16 %v3650_v22, %v3649_v7  ;;  %v3801_v7 = vunpack.c.l.bf16 %v3791_v63  ;;  %v3803_v22 = vunpack.c.l.bf16 %v3792_v16 }
 0x56c   :  { %v4922_v25 = vld [vmem:[#allocation2 + $0x64] sm:$0xf]  ;;  %v5168_v10 = vld [vmem:[#allocation2 + $0x68] sm:$0xf] }
 0x56d   :  { %3666 = vst.msk [vmem:[#allocation2 + $0x74] sm:$0xff] %vm5409_vm6, %v3658_v43 }
 0x56e   :  { %4016 = vmatpush.bf16.msra.mxu0 %v5171_v60 }
 0x572   :  { %4017 = vmatpush.bf16.msra.mxu0 %v5170_v28 }
 0x574   :  { %v5169_v23 = vld [vmem:[#allocation2 + $0x70] sm:$0xf0]  ;;  %v4924_v20 = vld [vmem:[#allocation2 + $0x74] sm:$0xf0] }
 0x575   :  { %v4923_v19 = vor.u32 %v5169_v23, %v4922_v25  ;;  %v4927_v24 = vor.u32 %v5168_v10, %v4924_v20  ;;  %v3773_v25 = vunpack.c.h.bf16 %v3771_v44  ;;  %v3780_v23 = vunpack.c.h.bf16 %v3778_v36  ;;  %v3794_v20 = vld [vmem:[%s7114_s13 + $0x28] sm:$0xff] }
 0x576   :  { %v3800_v10 = vunpack.c.h.bf16 %v3790_v1  ;;  %v3806_v36 = vunpack.c.h.bf16 %v3793_v32 }
 0x577   :  { %3729 = vmatpush.bf16.msra.mxu2 %v4923_v19 }
 0x57b   :  { %3730 = vmatpush.bf16.msra.mxu2 %v4915_v37 }
 0x57f   :  { %3731 = vmatpush.bf16.msra.mxu2 %v4907_v31 }
 0x583   :  { %3732 = vmatpush.bf16.msra.mxu2 %v4899_v39  ;;  %v3798_v39 = vunpack.c.h.bf16 %v3789_v52  ;;  %v3808_v52 = vunpack.c.h.bf16 %v3794_v20 }
 0x586   :  { %4928 = vmatmul.msk.bf16.vlgmr.msra.gmra.mxu2 %vm1642_vm15, %v3675_v8 }
 0x587   :  { %3742 = vmatpush.bf16.msrb.mxu2 %v4927_v24 }
 0x58b   :  { %3743 = vmatpush.bf16.msrb.mxu2 %v4919_v45 }
 0x58f   :  { %3744 = vmatpush.bf16.msrb.mxu2 %v4911_v57  ;;  %v3796_v57 = vld [vmem:[%s7114_s13 + $0x38] sm:$0xff] }
 0x590   :  { %v3811_v9 = vunpack.c.l.bf16 %v3796_v57 }
 0x593   :  { %3745 = vmatpush.bf16.msrb.mxu2 %v4903_v6  ;;  %v3802_v6 = vunpack.c.h.bf16 %v3791_v63 }
 0x596   :  { %4929 = vmatmul.msk.bf16.vlgmr.msrb.gmra.mxu2 %vm1642_vm15, %v3675_v8 }
 0x597   :  { %3903 = vmatpush.bf16.msra.mxu2 %v5177_v26 }
 0x59b   :  { %3904 = vmatpush.bf16.msra.mxu2 %v5176_v34 }
 0x59f   :  { %3905 = vmatpush.bf16.msra.mxu2 %v5175_v21 }
 0x5a3   :  { %3906 = vmatpush.bf16.msra.mxu2 %v5174_v47  ;;  %v3807_v47 = vunpack.c.l.bf16 %v3794_v20 }
 0x5a7   :  { %3907 = vmatpush.bf16.msra.mxu2 %v5173_v62 }
 0x5ab   :  { %3908 = vmatpush.bf16.msra.mxu2 %v5172_v33  ;;  %v3804_v33 = vunpack.c.h.bf16 %v3792_v16 }
 0x5af   :  { %3909 = vmatpush.bf16.msra.mxu2 %v5171_v60 }
 0x5b3   :  { %3910 = vmatpush.bf16.msra.mxu2 %v5170_v28 }
 0x609   :  { %v3734_v40 = vpop.f32.mrf.mxu2 }
 0x60a   :  { %v3735_v15 = vadd.f32 %v3734_v40, %v3680_v4 }
 0x60c   :  { %v3751_v56 = vmax.f32 %v3735_v15, 0.0 }
 0x60e   :  { %v3774_v59 = vperm.slane %v3751_v56, 0  ;;  %v3781_v50 = vperm.slane %v3751_v56, 1  ;;  %v3813_v14 = vperm.slane %v3751_v56, 2  ;;  %v3810_v56 = vunpack.c.h.bf16 %v3795_v48 }
 0x610   :  { %v3776_v2 = vmul.f32 %v3774_v59, %v3772_v61  ;;  %v3783_v13 = vmul.f32 %v3781_v50, %v3779_v49  ;;  %v3815_v54 = vmul.f32 %v3813_v14, %v3797_v17  ;;  %v3817_v55 = vmul.f32 %v3813_v14, %v3799_v35  ;;  %v3981_v50 = vpop.permute.xlu0 %3980 }
 0x611   :  { %v3736_v46 = vpop.f32.mrf.mxu2  ;;  %v3819_v26 = vmul.f32 %v3813_v14, %v3801_v7  ;;  %v3821_v11 = vmul.f32 %v3813_v14, %v3803_v22  ;;  %v3823_v8 = vmul.f32 %v3813_v14, %v3805_v29  ;;  %v3825_v3 = vmul.f32 %v3813_v14, %v3807_v47 }
 0x612   :  { %v3785_v18 = vadd.f32 %v3783_v13, %v3776_v2  ;;  %v3831_v12 = vpack.c.bf16 %v3817_v55, %v3815_v54  ;;  %v3827_v60 = vmul.f32 %v3813_v14, %v3809_v0  ;;  %v3829_v28 = vmul.f32 %v3813_v14, %v3811_v9  ;;  %v3991_v54 = vpop.permute.xlu1 %3990 }
 0x613   :  { %v3833_v21 = vpack.c.bf16 %v3821_v11, %v3819_v26  ;;  %v3835_v45 = vpack.c.bf16 %v3825_v3, %v3823_v8  ;;  %v3812_v49 = vunpack.c.h.bf16 %v3796_v57 }
 0x614   :  { %v3787_v30 = vpack.c.bf16 %v3785_v18, %v3785_v18  ;;  %4018 = vmatmul.bf16.vlgmr.msra.gmra.mxu0 %v3831_v12 }
 0x616   :  { %3911 = vmatmul.bf16.vlgmr.msra.gmra.mxu2 %v3787_v30 }
 0x618   :  { %v3976_v2 = vpop.permute.xlu0 %3975 }
 0x619   :  { %v3747_v38 = vpop.f32.mrf.mxu2 }
 0x61a   :  { %v3748_v53 = vadd.f32 %v3747_v38, %v3680_v4  ;;  %v3837_v4 = vpack.c.bf16 %v3829_v28, %v3827_v60  ;;  %v3986_v16 = vpop.permute.xlu1 %3985 }
 0x61c   :  { %v3752_v43 = vmax.f32 %v3748_v53, 0.0 }
 0x61e   :  { %v3775_v19 = vperm.slane %v3752_v43, 0  ;;  %v3782_v58 = vperm.slane %v3752_v43, 1  ;;  %v3814_v24 = vperm.slane %v3752_v43, 2 }
 0x620   :  { %v3777_v34 = vmul.f32 %v3775_v19, %v3773_v25  ;;  %v3784_v37 = vmul.f32 %v3782_v58, %v3780_v23  ;;  %v3816_v62 = vmul.f32 %v3814_v24, %v3798_v39  ;;  %v3818_v41 = vmul.f32 %v3814_v24, %v3800_v10  ;;  %v3843_v55 = vpop.permute.xlu0 %3842 }
 0x621   :  { %v3749_v27 = vpop.f32.mrf.mxu2  ;;  %v3820_v5 = vmul.f32 %v3814_v24, %v3802_v6  ;;  %v3822_v44 = vmul.f32 %v3814_v24, %v3804_v33  ;;  %v3824_v1 = vmul.f32 %v3814_v24, %v3806_v36  ;;  %v3826_v15 = vmul.f32 %v3814_v24, %v3808_v52  ;;  %v3996_v6 = vpop.permute.xlu2 %3995 }
 0x622   :  { %v3786_v42 = vadd.f32 %v3784_v37, %v3777_v34  ;;  %v3832_v51 = vpack.c.bf16 %v3818_v41, %v3816_v62  ;;  %v3828_v17 = vmul.f32 %v3814_v24, %v3810_v56  ;;  %v3830_v35 = vmul.f32 %v3814_v24, %v3812_v49  ;;  %v3961_v19 = vpop.permute.xlu1 %3960 }
 0x623   :  { %v3834_v40 = vpack.c.bf16 %v3822_v44, %v3820_v5  ;;  %v3836_v61 = vpack.c.bf16 %v3826_v15, %v3824_v1 }
 0x624   :  { %v3788_v31 = vpack.c.bf16 %v3786_v42, %v3786_v42  ;;  %4023 = vmatmul.bf16.gmra.mxu0 %v3833_v21  ;;  %v3838_v59 = vpack.c.bf16 %v3830_v35, %v3828_v17 }
 0x626   :  { %4966 = vmatmul.msk.bf16.vlgmr.msrb.gmra.mxu3 %vm3899_vm0, %v3788_v31 }
 0x629   :  { %v3971_v28 = vpop.permute.xlu2 %3970 }
 0x634   :  { %4028 = vmatmul.bf16.gmra.mxu0 %v3835_v45 }
 0x636   :  { %4967 = vmatmul.msk.bf16.vlgmr.msra.gmra.mxu3 %vm3899_vm0, %v3832_v51 }
 0x644   :  { %4033 = vmatmul.bf16.gmra.mxu0 %v3837_v4 }
 0x646   :  { %4968 = vmatmul.msk.bf16.gmra.mxu3 %vm3899_vm0, %v3834_v40 }
 0x656   :  { %4969 = vmatmul.msk.bf16.gmra.mxu3 %vm3899_vm0, %v3836_v61 }
 0x666   :  { %4970 = vmatmul.msk.bf16.gmra.mxu3 %vm3899_vm0, %v3838_v59 }
 0x691   :  { %v4019_v46 = vpop.f32.mrf.mxu0 }
 0x692   :  { %v4020_v26 = vadd.f32 %v4019_v46, %v3961_v19  ;;  %v3966_v46 = vpop.permute.xlu2 %3965 }
 0x699   :  { %v3912_v14 = vpop.f32.mrf.mxu2  ;;  %v4021_v7 = vpop.f32.mrf.mxu0 }
 0x69a   :  { %v3913_v18 = vadd.f32 %v3912_v14, %v3843_v55 }
 0x6a1   :  { %v3914_v13 = vpop.f32.mrf.mxu2  ;;  %v4024_v27 = vpop.f32.mrf.mxu0 }
 0x6a2   :  { %v4025_v59 = vadd.f32 %v4024_v27, %v3971_v28 }
 0x6a9   :  { %v3925_v12 = vpop.f32.mrf.mxu3  ;;  %v4026_v29 = vpop.f32.mrf.mxu0 }
 0x6aa   :  { %v3926_v30 = vadd.f32 %v3925_v12, %v3913_v18  ;;  %v4027_v56 = vadd.f32 %v4026_v29, %v3976_v2  ;;  %v4022_v18 = vadd.f32 %v4021_v7, %v3966_v46  ;;  %v4085_v7 = vpop.permute.xlu1 %4084 }
 0x6ac   :  { %v3930_v63 = vsel %vm3929_vm1, %v3926_v30, -inf }
 0x6ad   :  { %v3931_v38 = vrot.slane %v3930_v63, 4 }
 0x6af   :  { %v3932_v53 = vmax.f32 %v3930_v63, %v3931_v38 }
 0x6b1   :  { %v3933_v22 = vrot.slane %v3932_v53, 2  ;;  %v3927_v43 = vpop.f32.mrf.mxu3  ;;  %v4029_v62 = vpop.f32.mrf.mxu0 }
 0x6b2   :  { %v4030_v1 = vadd.f32 %v4029_v62, %v3981_v50  ;;  %v4076_v43 = vld [vmem:[%s7116_s15] sm:$0x1] }
 0x6b3   :  { %v3934_v25 = vmax.f32 %v3932_v53, %v3933_v22 }
 0x6b5   :  { %v3935_v23 = vrot.slane %v3934_v25, 1 }
 0x6b7   :  { %v3936_v58 = vmax.f32 %v3934_v25, %v3935_v23  ;;  %v4087_v25 = vperm.slane %v4085_v7, 0 }
 0x6b9   :  { %v3937_v11 = vsub.f32 %v3926_v30, %v3936_v58  ;;  %v4048_v34 = vpop.f32.mrf.mxu3  ;;  %v4031_v48 = vpop.f32.mrf.mxu0 }
 0x6ba   :  { %v7083_v37 = vadd.f32 %v4048_v34, %v4020_v26  ;;  %v4032_v4 = vadd.f32 %v4031_v48, %v3986_v16 }
 0x6bb   :  { %v3938_v42 = vmul.f32 1.442695, %v3937_v11 }
 0x6bc   :  { %v4068_v2 = vmax.f32 %v7083_v37, 0.0 }
 0x6bd   :  { %5201 = vpow2.f32 %v3938_v42 }
 0x6c1   :  { %v4050_v21 = vpop.f32.mrf.mxu3  ;;  %v4034_v33 = vpop.f32.mrf.mxu0 }
 0x6c2   :  { %v4035_v44 = vadd.f32 %v4034_v33, %v3991_v54  ;;  %v4051_v54 = vadd.f32 %v4050_v21, %v4022_v18 }
 0x6c3   :  { %v5202_v31 = vpop.eup %5201 }
 0x6c4   :  { %v3940_v32 = vsel %vm3929_vm1, %v5202_v31, 0.0  ;;  %v4069_v50 = vmax.f32 %v4051_v54, 0.0 }
 0x6c5   :  { %v3941_v20 = vrot.slane %v3940_v32, 4 }
 0x6c6   :  { %v4077_v22 = vpack.c.bf16 %v4069_v50, %v4068_v2 }
 0x6c7   :  { %v3942_v47 = vadd.f32 %v3941_v20, %v3940_v32 }
 0x6c9   :  { %v3943_v39 = vrot.slane %v3942_v47, 2  ;;  %v4053_v10 = vpop.f32.mrf.mxu3  ;;  %v4036_v5 = vpop.f32.mrf.mxu0 }
 0x6ca   :  { %v4037_v40 = vadd.f32 %v4036_v5, %v3996_v6  ;;  %v4054_v12 = vadd.f32 %v4053_v10, %v4025_v59 }
 0x6cb   :  { %v3944_v24 = vadd.f32 %v3943_v39, %v3942_v47 }
 0x6cc   :  { %v4070_v38 = vmax.f32 %v4054_v12, 0.0 }
 0x6cd   :  { %v3945_v8 = vrot.slane %v3944_v24, 1 }
 0x6cf   :  { %v3946_v3 = vadd.f32 %v3945_v8, %v3944_v24 }
 0x6d1   :  { %5203 = vlog2.f32 %v3946_v3  ;;  %v4055_v41 = vpop.f32.mrf.mxu3 }
 0x6d2   :  { %v4056_v14 = vadd.f32 %v4055_v41, %v4027_v56 }
 0x6d4   :  { %v4071_v63 = vmax.f32 %v4056_v14, 0.0 }
 0x6d6   :  { %v4078_v53 = vpack.c.bf16 %v4071_v63, %v4070_v38 }
 0x6d7   :  { %v5204_v45 = vpop.eup %5203 }
 0x6d8   :  { %v3948_v51 = vmul.f32 0.6931472, %v5204_v45 }
 0x6d9   :  { %v4058_v57 = vpop.f32.mrf.mxu3 }
 0x6da   :  { %v3949_v0 = vsub.f32 %v3937_v11, %v3948_v51  ;;  %v4059_v49 = vadd.f32 %v4058_v57, %v4030_v1 }
 0x6dc   :  { %4105 = vst.msk [vmem:[%s7115_s18] sm:$0x7f] %vm3929_vm1, %v3949_v0  ;;  %v4072_v30 = vmax.f32 %v4059_v49, 0.0 }
 0x6e1   :  { %v4060_v9 = vpop.f32.mrf.mxu3 }
 0x6e2   :  { %v4061_v15 = vadd.f32 %v4060_v9, %v4032_v4 }
 0x6e4   :  { %v4073_v13 = vmax.f32 %v4061_v15, 0.0 }
 0x6e6   :  { %v4079_v16 = vpack.c.bf16 %v4073_v13, %v4072_v30 }
 0x6e9   :  { %v4063_v60 = vpop.f32.mrf.mxu3 }
 0x6ea   :  { %v4064_v36 = vadd.f32 %v4063_v60, %v4035_v44 }
 0x6ec   :  { %v4074_v17 = vmax.f32 %v4064_v36, 0.0 }
 0x6f1   :  { %v4065_v52 = vpop.f32.mrf.mxu3 }
 0x6f2   :  { %v4066_v61 = vadd.f32 %v4065_v52, %v4037_v40 }
 0x6f4   :  { %v4075_v35 = vmax.f32 %v4066_v61, 0.0 }
 0x6f6   :  { %v4080_v55 = vpack.c.bf16 %v4075_v35, %v4074_v17 }
 0x6f8   :  { %4095 = vmatpush.bf16.msrb.mxu1 %v4080_v55 }
 0x6fc   :  { %4096 = vmatpush.bf16.msrb.mxu1 %v4079_v16 }
 0x700   :  { %4097 = vmatpush.bf16.msrb.mxu1 %v4078_v53 }
 0x704   :  { %4098 = vmatpush.bf16.msrb.mxu1 %v4077_v22 }
 0x707   :  { %4971 = vmatmul.msk.bf16.vlgmr.msrb.gmra.mxu1 %vm1642_vm15, %v4076_v43 }
 0x784   :  { %v4100_v23 = vpop.f32.mrf.mxu1 }
 0x785   :  { %v4101_v19 = vadd.f32 %v4100_v23, %v4087_v25 }
 0x787   :  { %5205 = vtanh.f32 %v4101_v19 }
 0x78c   :  { %v4102_v58 = vpop.f32.mrf.mxu1 }
 0x78d   :  { %v5206_v26 = vpop.eup %5205 }
 0x78e   :  { %4107 = vst.msk [vmem:[%s7115_s18 + $0x7] sm:$0x1] %vm4106_vm2, %v5206_v26 }

</bundles_post_ra>
